<compile_context>
chip_gen: v7x
topology: tpu7x:2x2x1
jax: 0.10.0
libtpu: 0.0.40
codegen_flags: <defaults>
</compile_context>

<pallas_src>
import functools
import math

import jax
import jax.numpy as jnp
from jax.experimental import pallas as pl
from jax.experimental.pallas import tpu as pltpu

# ----------------------- scaled-down configuration -------------------------
BATCH = 2
IMG_C, IMG_HW = 3, 16
PATCH = 8                    # -> 2x2 = 4 patches
D_MODEL = 32                 # vision hidden == mapper width (1024 in real model)
V_LAYERS = 2                 # vision transformer layers (24 in ViT-L/14)
V_HEADS = 4
M_LAYERS = 5                 # mapper: Transformer(n_ctx=1, width=D, layers=5, heads=1)
MLP_MULT = 4
LN_EPS = 1e-5

N_PATCH = (IMG_HW // PATCH) ** 2     # 4
S_VALID = N_PATCH + 1                # 5 = CLS + patches
SEQ = ((S_VALID + 7) // 8) * 8       # 8: pad rows to a sublane multiple; padded keys are masked


# ----------------------- in-kernel math helpers -----------------------------
def _quick_gelu(x):
    # HF CLIP ViT hidden_act = "quick_gelu": x * sigmoid(1.702 x)   (f32 on VPU/EUP)
    return x * jax.nn.sigmoid(1.702 * x)


def _gelu_tanh(x):
    # TODO(synk): GLIDE xf.MLP uses exact erf-based nn.GELU(); tanh approximation used
    # (~1e-3 deviation) since lax.erf has no guaranteed Mosaic lowering.
    return 0.5 * x * (1.0 + jnp.tanh(0.7978845608028654 * (x + 0.044715 * x * x * x)))


def _ln(x, g, b, eps=LN_EPS):
    # Row-wise LayerNorm over the last (hidden) axis, all math in f32.
    x = x.astype(jnp.float32)
    mu = jnp.mean(x, axis=-1, keepdims=True)
    xc = x - mu
    var = jnp.mean(xc * xc, axis=-1, keepdims=True)
    return xc * jax.lax.rsqrt(var + eps) * g + b


def _mm(x, w):
    # bf16 MXU matmul with f32 accumulate; weights stored bf16, activations cast only at the
    # matmul input so LN/gelu/residual math stays f32.
    return jnp.dot(x.astype(jnp.bfloat16), w.astype(jnp.bfloat16),
                   preferred_element_type=jnp.float32)


def _rep_spec(shape):
    # Constant block index -> Pallas DMAs the operand once and keeps it resident (1-D grids).
    zeros = (0,) * len(shape)
    return pl.BlockSpec(shape, lambda i, _z=zeros: _z)


def _layer_spec(x, two_idx=False):
    # Stream slab l of a layer-stacked parameter [L, ...]; Pallas double-buffers layer l+1's
    # weights behind layer l's compute.
    shape = (1,) + x.shape[1:]
    zeros = (0,) * (x.ndim - 1)
    if two_idx:
        return pl.BlockSpec(shape, lambda b, l, _z=zeros: (l,) + _z)
    return pl.BlockSpec(shape, lambda l, _z=zeros: (l,) + _z)


def _vision_cost(B, L, S, D, H, F):
    dh = D // H
    flops = B * L * (2 * S * D * (3 * D + D + 2 * F) + 4 * H * S * S * dh)
    transcendentals = B * L * (H * S * S + S * F)          # softmax exp + quick_gelu sigmoid
    bytes_accessed = (L * 2 * D * (4 * D + 2 * F)           # bf16 matmul weights
                      + 2 * B * S * D * 4)                  # residual stream in + out (f32)
    return pl.CostEstimate(flops=flops, transcendentals=transcendentals,
                           bytes_accessed=bytes_accessed)


# ----------------------------- Pallas kernels ------------------------------
def _embed_kernel(patch_ref, w_ref, clspos_ref, g_ref, b_ref, o_ref):
    # patches (zero row 0 for the CLS slot, zero pad rows at the end) @ W + (cls|pos|0) table, pre-LN.
    emb = _mm(patch_ref[0], w_ref[...]) + clspos_ref[...]            # [S, D] f32
    o_ref[0] = _ln(emb, g_ref[...], b_ref[...]).astype(o_ref.dtype)


def _vision_layers_kernel(h_ref, ln1_g, ln1_b, qkv_w, qkv_b, o_w, o_b,
                          ln2_g, ln2_b, fc1_w, fc1_b, fc2_w, fc2_b,
                          o_ref, qkv_s, *, heads, scale, s_valid):
    """One (batch b, layer l) grid step of the fused vision transformer.

    The residual stream for batch b lives in the resident output block (same block index for
    every l): loaded from HBM once (l==0), written back once after the last layer. Per-layer
    weights stream through VMEM along the 'arbitrary' layer axis.
    """
    @pl.when(pl.program_id(1) == 0)
    def _():
        o_ref[0] = h_ref[0]                                          # seed residual stream

    h = o_ref[0].astype(jnp.float32)                                 # [S, D]
    S, D = h.shape
    Dh = D // heads

    # ---- LN1 + fused [D, 3D] QKV projection (single MXU-friendly matmul) ----
    hn = _ln(h, ln1_g[0], ln1_b[0])
    qkv = _mm(hn, qkv_w[0]) + qkv_b[0]                               # [S, 3D] f32

    # ---- scatter q|k|v into a head-major scratch: per-head indexing on a leading axis ----
    for g in range(3 * heads):                                       # static unroll
        qkv_s[g] = qkv[:, g * Dh:(g + 1) * Dh]
    q = qkv_s[0:heads, :, :] * scale                                 # [H, S, Dh]
    k = qkv_s[heads:2 * heads, :, :]
    v = qkv_s[2 * heads:3 * heads, :, :]

    # ---- attention: one batched score matmul + masked softmax + one batched p@v ----
    s = jnp.einsum("hqd,hkd->hqk", q, k, preferred_element_type=jnp.float32)     # [H, S, S]
    if s_valid < S:                                                  # mask padded key rows
        kidx = jax.lax.broadcasted_iota(jnp.int32, (1, 1, S), 2)
        s = jnp.where(kidx < s_valid, s, -1e30)
    s = s - jnp.max(s, axis=-1, keepdims=True)
    e = jnp.exp(s)
    p = e * pl.reciprocal(jnp.sum(e, axis=-1, keepdims=True), approx=True)
    attn = jnp.einsum("hqk,hkd->hqd", p, v, preferred_element_type=jnp.float32)  # [H, S, Dh]
    attn = jnp.concatenate([attn[hh] for hh in range(heads)], axis=-1)           # [S, D]

    # ---- output projection + residual ----
    h = _mm(attn, o_w[0]) + o_b[0] + h

    # ---- MLP (quick_gelu) + residual ----
    hn = _ln(h, ln2_g[0], ln2_b[0])
    f = _quick_gelu(_mm(hn, fc1_w[0]) + fc1_b[0])
    h = _mm(f, fc2_w[0]) + fc2_b[0] + h
    o_ref[0] = h.astype(o_ref.dtype)


def _mapper_kernel(cls_ref, post_g, post_b,
                   ln1_g, ln1_b, v_w, v_b, proj_w, proj_b,
                   ln2_g, ln2_b, fc_w, fc_b, fcp_w, fcp_b,
                   fin_g, fin_b, o_ref, *, n_layers):
    """Pooler post-LN + one mapper ResidualAttentionBlock per grid step + final_ln.

    x [B, D] lives in the resident output block; the per-layer weights are streamed.
    Sequence length is exactly 1 token -> softmax over one key == 1 -> attention == v,
    so q/k projections are dead and never loaded or computed.
    """
    l = pl.program_id(0)

    @pl.when(l == 0)
    def _():
        # CLIP vision pooler: post-LN applied to the CLS hidden state.
        o_ref[...] = _ln(cls_ref[...], post_g[...], post_b[...]).astype(o_ref.dtype)

    x = o_ref[...].astype(jnp.float32)                               # [B, D]
    h = _ln(x, ln1_g[0], ln1_b[0])
    v = _mm(h, v_w[0]) + v_b[0]                                      # attention output == v
    x = _mm(v, proj_w[0]) + proj_b[0] + x
    h = _ln(x, ln2_g[0], ln2_b[0])
    f = _gelu_tanh(_mm(h, fc_w[0]) + fc_b[0])
    x = _mm(f, fcp_w[0]) + fcp_b[0] + x

    @pl.when(l < n_layers - 1)
    def _():
        o_ref[...] = x.astype(o_ref.dtype)

    @pl.when(l == n_layers - 1)
    def _():
        o_ref[...] = _ln(x, fin_g[...], fin_b[...]).astype(o_ref.dtype)


# ------------------------------- wrappers -----------------------------------
def _im2col(image, patch):
    # NCHW -> [B, num_patches, C*patch*patch] flattened in (c, kh, kw) order,
    # matching a Conv2d(kernel=patch, stride=patch) weight of shape [D, C, P, P].
    B, C, H, W = image.shape
    hp, wp = H // patch, W // patch
    x = image.reshape(B, C, hp, patch, wp, patch)
    x = x.transpose(0, 2, 4, 1, 3, 5)
    return x.reshape(B, hp * wp, C * patch * patch)


def patch_embed(image, p):
    patches = _im2col(image, PATCH)                                  # [B, N, C*P*P]
    B, N, CPP = patches.shape
    pad_rows = SEQ - 1 - N
    # Fold the CLS token into the matmul: a zero patch row at position 0 contributes 0 and the
    # combined (class_emb + pos[0] | pos[1:] | 0) table adds the right embedding; extra zero rows
    # pad the sequence to a sublane multiple (masked as attention keys downstream).
    patches = jnp.concatenate(
        [jnp.zeros((B, 1, CPP), patches.dtype), patches,
         jnp.zeros((B, pad_rows, CPP), patches.dtype)], axis=1)      # [B, SEQ, CPP]
    cls_pos = jnp.concatenate(
        [p["class_emb"] + p["pos_emb"][:1], p["pos_emb"][1:],
         jnp.zeros((pad_rows, D_MODEL), jnp.float32)], axis=0)       # [SEQ, D]
    operands = (patches, p["patch_w"], cls_pos, p["pre_ln_g"], p["pre_ln_b"])
    in_specs = [pl.BlockSpec((1, SEQ, CPP), lambda b: (b, 0, 0))]
    in_specs += [_rep_spec(op.shape) for op in operands[1:]]
    return pl.pallas_call(
        _embed_kernel,
        out_shape=jax.ShapeDtypeStruct((B, SEQ, D_MODEL), jnp.float32),
        grid=(B,),
        in_specs=in_specs,
        out_specs=pl.BlockSpec((1, SEQ, D_MODEL), lambda b: (b, 0, 0)),
        compiler_params=pltpu.CompilerParams(dimension_semantics=("parallel",)),
    )(*operands)


def vision_transformer(h, v):
    # All transformer layers in ONE pallas_call; grid=(batch 'parallel', layer 'arbitrary').
    B, S, D = h.shape
    L, F = v["qkv_w"].shape[0], v["fc1_w"].shape[-1]
    layer_ops = (v["ln1_g"], v["ln1_b"], v["qkv_w"], v["qkv_b"],
                 v["o_w"], v["o_b"], v["ln2_g"], v["ln2_b"],
                 v["fc1_w"], v["fc1_b"], v["fc2_w"], v["fc2_b"])
    in_specs = [pl.BlockSpec((1, S, D), lambda b, l: (b, 0, 0))]     # resident across l
    in_specs += [_layer_spec(op, two_idx=True) for op in layer_ops]  # streamed per layer
    kern = functools.partial(_vision_layers_kernel, heads=V_HEADS,
                             scale=1.0 / math.sqrt(D // V_HEADS), s_valid=S_VALID)
    return pl.pallas_call(
        kern,
        out_shape=jax.ShapeDtypeStruct((B, S, D), jnp.float32),
        grid=(B, L),
        in_specs=in_specs,
        out_specs=pl.BlockSpec((1, S, D), lambda b, l: (b, 0, 0)),   # residual-stream accumulator
        scratch_shapes=[pltpu.VMEM((3 * V_HEADS, S, D // V_HEADS), jnp.float32)],
        compiler_params=pltpu.CompilerParams(
            dimension_semantics=("parallel", "arbitrary"),
            vmem_limit_bytes=64 * 1024 * 1024),
        cost_estimate=_vision_cost(B, L, S, D, V_HEADS, F),
    )(h, *layer_ops)


def mapper_head(cls_tok, params):
    # Pooler post-LN + 5 mapper blocks + final_ln; grid over mapper layers, weights streamed.
    B, D = cls_tok.shape
    v = params["vision"]
    m = params["mapper"]
    # Single-token attention == v -> only the v-third of the fused qkv projection is live
    # (sliced once on the parameters; tiny XLA op outside the kernel).
    v_w = m["qkv_w"][:, :, 2 * D:]
    v_b = m["qkv_b"][:, :, 2 * D:]
    const_ops = (cls_tok, v["post_ln_g"], v["post_ln_b"])
    layer_ops = (m["ln1_g"], m["ln1_b"], v_w, v_b, m["proj_w"], m["proj_b"],
                 m["ln2_g"], m["ln2_b"], m["fc_w"], m["fc_b"],
                 m["fc_proj_w"], m["fc_proj_b"])
    tail_ops = (params["final_ln_g"], params["final_ln_b"])
    in_specs = ([_rep_spec(op.shape) for op in const_ops]
                + [_layer_spec(op) for op in layer_ops]
                + [_rep_spec(op.shape) for op in tail_ops])
    return pl.pallas_call(
        functools.partial(_mapper_kernel, n_layers=M_LAYERS),
        out_shape=jax.ShapeDtypeStruct((B, D), jnp.float32),
        grid=(M_LAYERS,),
        in_specs=in_specs,
        out_specs=pl.BlockSpec((B, D), lambda l: (0, 0)),            # x resident across layers
        compiler_params=pltpu.CompilerParams(
            dimension_semantics=("arbitrary",),
            vmem_limit_bytes=64 * 1024 * 1024),
    )(*const_ops, *layer_ops, *tail_ops)


# ------------------------------ full forward --------------------------------
def frozen_clip_image_embedder(params, image):
    h = patch_embed(image, params["vision"])          # [B, SEQ, D] patch emb + CLS + pos + pre-LN
    h = vision_transformer(h, params["vision"])       # all vision layers, one fused call
    cls_tok = h[:, 0, :]                              # CLS hidden state [B, D]
    z = mapper_head(cls_tok, params)                  # pooler post-LN + mapper + final_ln
    return z[:, None, :]                              # [B, 1, D]


# ------------------------- deterministic parameters --------------------------
def init_params(key):
    keys = iter(jax.random.split(key, 64))

    def nrm(shape, scale=0.02, dtype=jnp.float32):
        return (scale * jax.random.normal(next(keys), shape, dtype=jnp.float32)).astype(dtype)

    D, F = D_MODEL, MLP_MULT * D_MODEL
    Lv, Lm = V_LAYERS, M_LAYERS
    patch_dim = IMG_C * PATCH * PATCH
    W = jnp.bfloat16   # matmul weights bf16 (MXU native, half HBM traffic); LN / bias in f32

    # Vision layer params stacked over the layer axis so the whole encoder runs in one kernel.
    vision = dict(
        patch_w=nrm((patch_dim, D), dtype=W),          # patch conv (bias=False)
        class_emb=nrm((1, D)),
        pos_emb=nrm((S_VALID, D)),
        pre_ln_g=1.0 + nrm((1, D), 0.05), pre_ln_b=nrm((1, D)),
        ln1_g=1.0 + nrm((Lv, 1, D), 0.05), ln1_b=nrm((Lv, 1, D)),
        qkv_w=nrm((Lv, D, 3 * D), dtype=W), qkv_b=nrm((Lv, 1, 3 * D)),   # fused q|k|v
        o_w=nrm((Lv, D, D), dtype=W), o_b=nrm((Lv, 1, D)),
        ln2_g=1.0 + nrm((Lv, 1, D), 0.05), ln2_b=nrm((Lv, 1, D)),
        fc1_w=nrm((Lv, D, F), dtype=W), fc1_b=nrm((Lv, 1, F)),
        fc2_w=nrm((Lv, F, D), dtype=W), fc2_b=nrm((Lv, 1, D)),
        post_ln_g=1.0 + nrm((1, D), 0.05), post_ln_b=nrm((1, D)),
    )

    # Mapper parameters stacked over its 5 layers (streamed one layer per grid step).
    mapper = dict(
        ln1_g=1.0 + nrm((Lm, 1, D), 0.05), ln1_b=nrm((Lm, 1, D)),
        qkv_w=nrm((Lm, D, 3 * D), dtype=W), qkv_b=nrm((Lm, 1, 3 * D)),
        proj_w=nrm((Lm, D, D), dtype=W), proj_b=nrm((Lm, 1, D)),
        ln2_g=1.0 + nrm((Lm, 1, D), 0.05), ln2_b=nrm((Lm, 1, D)),
        fc_w=nrm((Lm, D, F), dtype=W), fc_b=nrm((Lm, 1, F)),
        fc_proj_w=nrm((Lm, F, D), dtype=W), fc_proj_b=nrm((Lm, 1, D)),
    )

    return dict(vision=vision, mapper=mapper,
                final_ln_g=1.0 + nrm((1, D), 0.05), final_ln_b=nrm((1, D)))


if __name__ == "__main__":
    key = jax.random.PRNGKey(0)
    pkey, xkey = jax.random.split(key)
    params = init_params(pkey)
    image = jax.random.normal(xkey, (BATCH, IMG_C, IMG_HW, IMG_HW), dtype=jnp.float32)

    z = jax.jit(frozen_clip_image_embedder)(params, image)
    z = jax.block_until_ready(z)
    assert z.shape == (BATCH, 1, D_MODEL) and z.dtype == jnp.float32
    assert bool(jnp.all(jnp.isfinite(z)))
    print("KERNEL_OK")
</pallas_src>

<mosaic_0001>
module attributes {stable_mosaic.version = 11 : i64} {
  func.func @_embed_kernel(%arg0: i32, %arg1: memref<1x8x192xf32, #tpu.memory_space<vmem>>, %arg2: memref<192x32xbf16, #tpu.memory_space<vmem>>, %arg3: memref<8x32xf32, #tpu.memory_space<vmem>>, %arg4: memref<1x32xf32, #tpu.memory_space<vmem>>, %arg5: memref<1x32xf32, #tpu.memory_space<vmem>>, %arg6: memref<1x8x32xf32, #tpu.memory_space<vmem>>) attributes {dimension_semantics = [#tpu.dimension_semantics<parallel>], iteration_bounds = array<i64: 2>, scalar_prefetch = 0 : i64, scratch_operands = 0 : i64, tpu.core_type = #tpu.core_type<tc>, window_params = [{transform_indices = @transform_0, window_bounds = array<i64: 1, 8, 192>}, {pipeline_mode = #tpu.pipeline_mode<synchronous>, transform_indices = @transform_1, window_bounds = array<i64: 192, 32>}, {pipeline_mode = #tpu.pipeline_mode<synchronous>, transform_indices = @transform_2, window_bounds = array<i64: 8, 32>}, {pipeline_mode = #tpu.pipeline_mode<synchronous>, transform_indices = @transform_3, window_bounds = array<i64: 1, 32>}, {pipeline_mode = #tpu.pipeline_mode<synchronous>, transform_indices = @transform_4, window_bounds = array<i64: 1, 32>}, {transform_indices = @transform_5, window_bounds = array<i64: 1, 8, 32>}]} {
    %c0 = arith.constant 0 : index
    %c0_0 = arith.constant 0 : index
    %c0_1 = arith.constant 0 : index
    %0 = vector.load %arg1[%c0, %c0_0, %c0_1] : memref<1x8x192xf32, #tpu.memory_space<vmem>>, vector<1x8x192xf32>
    %1 = vector.shape_cast %0 : vector<1x8x192xf32> to vector<8x192xf32>
    %c0_2 = arith.constant 0 : index
    %c0_3 = arith.constant 0 : index
    %2 = vector.load %arg2[%c0_2, %c0_3] : memref<192x32xbf16, #tpu.memory_space<vmem>>, vector<192x32xbf16>
    %3 = arith.truncf %1 : vector<8x192xf32> to vector<8x192xbf16>
    %cst = arith.constant dense<0.000000e+00> : vector<8x32xf32>
    %4 = tpu.matmul %3, %2, %cst {dimension_numbers = #tpu.dot_dimension_numbers<[1], [0], [0], [1], [0, 0, 1, 1], [], []>} : vector<8x192xbf16>, vector<192x32xbf16>, vector<8x32xf32> -> vector<8x32xf32>
    %c0_4 = arith.constant 0 : index
    %c0_5 = arith.constant 0 : index
    %5 = vector.load %arg3[%c0_4, %c0_5] : memref<8x32xf32, #tpu.memory_space<vmem>>, vector<8x32xf32>
    %6 = arith.addf %4, %5 : vector<8x32xf32>
    %c0_6 = arith.constant 0 : index
    %c0_7 = arith.constant 0 : index
    %7 = vector.load %arg4[%c0_6, %c0_7] : memref<1x32xf32, #tpu.memory_space<vmem>>, vector<1x32xf32>
    %c0_8 = arith.constant 0 : index
    %c0_9 = arith.constant 0 : index
    %8 = vector.load %arg5[%c0_8, %c0_9] : memref<1x32xf32, #tpu.memory_space<vmem>>, vector<1x32xf32>
    %cst_10 = arith.constant dense<0.000000e+00> : vector<8xf32>
    %9 = vector.multi_reduction <add>, %6, %cst_10 [1] : vector<8x32xf32> to vector<8xf32>
    %10 = vector.shape_cast %9 : vector<8xf32> to vector<8x1xf32>
    %cst_11 = arith.constant 3.200000e+01 : f32
    %11 = vector.broadcast %cst_11 : f32 to vector<8x1xf32>
    %12 = arith.divf %10, %11 : vector<8x1xf32>
    %13 = vector.broadcast %12 : vector<8x1xf32> to vector<8x32xf32>
    %14 = arith.subf %6, %13 : vector<8x32xf32>
    %15 = arith.mulf %14, %14 : vector<8x32xf32>
    %cst_12 = arith.constant dense<0.000000e+00> : vector<8xf32>
    %16 = vector.multi_reduction <add>, %15, %cst_12 [1] : vector<8x32xf32> to vector<8xf32>
    %17 = vector.shape_cast %16 : vector<8xf32> to vector<8x1xf32>
    %cst_13 = arith.constant 3.200000e+01 : f32
    %18 = vector.broadcast %cst_13 : f32 to vector<8x1xf32>
    %19 = arith.divf %17, %18 : vector<8x1xf32>
    %cst_14 = arith.constant 9.99999974E-6 : f32
    %20 = vector.broadcast %cst_14 : f32 to vector<8x1xf32>
    %21 = arith.addf %19, %20 : vector<8x1xf32>
    %22 = math.rsqrt %21 : vector<8x1xf32>
    %23 = vector.broadcast %22 : vector<8x1xf32> to vector<8x32xf32>
    %24 = arith.mulf %14, %23 : vector<8x32xf32>
    %25 = vector.broadcast %7 : vector<1x32xf32> to vector<8x32xf32>
    %26 = arith.mulf %24, %25 : vector<8x32xf32>
    %27 = vector.broadcast %8 : vector<1x32xf32> to vector<8x32xf32>
    %28 = arith.addf %26, %27 : vector<8x32xf32>
    %c0_15 = arith.constant 0 : index
    %c0_16 = arith.constant 0 : index
    %c0_17 = arith.constant 0 : index
    %29 = vector.load %arg6[%c0_15, %c0_16, %c0_17] : memref<1x8x32xf32, #tpu.memory_space<vmem>>, vector<1x8x32xf32>
    %30 = vector.shape_cast %29 : vector<1x8x32xf32> to vector<8x32xf32>
    %31 = vector.shape_cast %28 : vector<8x32xf32> to vector<1x8x32xf32>
    tpu.vector_store %arg6[%c0_15, %c0_16, %c0_17], %31 {strides = array<i32>} : memref<1x8x32xf32, #tpu.memory_space<vmem>>, vector<1x8x32xf32>,
    return
  }
  func.func @transform_0(%arg0: i32) -> (i32, i32, i32) {
    %c0_i32 = arith.constant 0 : i32
    %c0_i32_0 = arith.constant 0 : i32
    %c0_i32_1 = arith.constant 0 : i32
    return %arg0, %c0_i32, %c0_i32_0 : i32, i32, i32
  }
  func.func @transform_1(%arg0: i32) -> (i32, i32) {
    %c0_i32 = arith.constant 0 : i32
    %c0_i32_0 = arith.constant 0 : i32
    %c0_i32_1 = arith.constant 0 : i32
    return %c0_i32, %c0_i32_0 : i32, i32
  }
  func.func @transform_2(%arg0: i32) -> (i32, i32) {
    %c0_i32 = arith.constant 0 : i32
    %c0_i32_0 = arith.constant 0 : i32
    %c0_i32_1 = arith.constant 0 : i32
    return %c0_i32, %c0_i32_0 : i32, i32
  }
  func.func @transform_3(%arg0: i32) -> (i32, i32) {
    %c0_i32 = arith.constant 0 : i32
    %c0_i32_0 = arith.constant 0 : i32
    %c0_i32_1 = arith.constant 0 : i32
    return %c0_i32, %c0_i32_0 : i32, i32
  }
  func.func @transform_4(%arg0: i32) -> (i32, i32) {
    %c0_i32 = arith.constant 0 : i32
    %c0_i32_0 = arith.constant 0 : i32
    %c0_i32_1 = arith.constant 0 : i32
    return %c0_i32, %c0_i32_0 : i32, i32
  }
  func.func @transform_5(%arg0: i32) -> (i32, i32, i32) {
    %c0_i32 = arith.constant 0 : i32
    %c0_i32_0 = arith.constant 0 : i32
    %c0_i32_1 = arith.constant 0 : i32
    return %arg0, %c0_i32, %c0_i32_0 : i32, i32, i32
  }
}

module attributes {stable_mosaic.version = 11 : i64} {
  func.func @_mapper_kernel(%arg0: i32, %arg1: memref<2x32xf32, #tpu.memory_space<vmem>>, %arg2: memref<1x32xf32, #tpu.memory_space<vmem>>, %arg3: memref<1x32xf32, #tpu.memory_space<vmem>>, %arg4: memref<1x1x32xf32, #tpu.memory_space<vmem>>, %arg5: memref<1x1x32xf32, #tpu.memory_space<vmem>>, %arg6: memref<1x32x32xbf16, #tpu.memory_space<vmem>>, %arg7: memref<1x1x32xf32, #tpu.memory_space<vmem>>, %arg8: memref<1x32x32xbf16, #tpu.memory_space<vmem>>, %arg9: memref<1x1x32xf32, #tpu.memory_space<vmem>>, %arg10: memref<1x1x32xf32, #tpu.memory_space<vmem>>, %arg11: memref<1x1x32xf32, #tpu.memory_space<vmem>>, %arg12: memref<1x32x128xbf16, #tpu.memory_space<vmem>>, %arg13: memref<1x1x128xf32, #tpu.memory_space<vmem>>, %arg14: memref<1x128x32xbf16, #tpu.memory_space<vmem>>, %arg15: memref<1x1x32xf32, #tpu.memory_space<vmem>>, %arg16: memref<1x32xf32, #tpu.memory_space<vmem>>, %arg17: memref<1x32xf32, #tpu.memory_space<vmem>>, %arg18: memref<2x32xf32, #tpu.memory_space<vmem>>) attributes {dimension_semantics = [#tpu.dimension_semantics<arbitrary>], iteration_bounds = array<i64: 5>, scalar_prefetch = 0 : i64, scratch_operands = 0 : i64, tpu.core_type = #tpu.core_type<tc>, window_params = [{pipeline_mode = #tpu.pipeline_mode<synchronous>, transform_indices = @transform_0, window_bounds = array<i64: 2, 32>}, {pipeline_mode = #tpu.pipeline_mode<synchronous>, transform_indices = @transform_1, window_bounds = array<i64: 1, 32>}, {pipeline_mode = #tpu.pipeline_mode<synchronous>, transform_indices = @transform_2, window_bounds = array<i64: 1, 32>}, {transform_indices = @transform_3, window_bounds = array<i64: 1, 1, 32>}, {transform_indices = @transform_4, window_bounds = array<i64: 1, 1, 32>}, {transform_indices = @transform_5, window_bounds = array<i64: 1, 32, 32>}, {transform_indices = @transform_6, window_bounds = array<i64: 1, 1, 32>}, {transform_indices = @transform_7, window_bounds = array<i64: 1, 32, 32>}, {transform_indices = @transform_8, window_bounds = array<i64: 1, 1, 32>}, {transform_indices = @transform_9, window_bounds = array<i64: 1, 1, 32>}, {transform_indices = @transform_10, window_bounds = array<i64: 1, 1, 32>}, {transform_indices = @transform_11, window_bounds = array<i64: 1, 32, 128>}, {transform_indices = @transform_12, window_bounds = array<i64: 1, 1, 128>}, {transform_indices = @transform_13, window_bounds = array<i64: 1, 128, 32>}, {transform_indices = @transform_14, window_bounds = array<i64: 1, 1, 32>}, {pipeline_mode = #tpu.pipeline_mode<synchronous>, transform_indices = @transform_15, window_bounds = array<i64: 1, 32>}, {pipeline_mode = #tpu.pipeline_mode<synchronous>, transform_indices = @transform_16, window_bounds = array<i64: 1, 32>}, {pipeline_mode = #tpu.pipeline_mode<synchronous>, transform_indices = @transform_17, window_bounds = array<i64: 2, 32>}]} {
    %c0_i32 = arith.constant 0 : i32
    %0 = arith.cmpi eq, %arg0, %c0_i32 : i32
    %1 = arith.extui %0 : i1 to i32
    %c0_i32_0 = arith.constant 0 : i32
    %2 = arith.cmpi ne, %1, %c0_i32_0 : i32
    scf.if %2 {
      %c0_58 = arith.constant 0 : index
      %c0_59 = arith.constant 0 : index
      %105 = vector.load %arg1[%c0_58, %c0_59] : memref<2x32xf32, #tpu.memory_space<vmem>>, vector<2x32xf32>
      %c0_60 = arith.constant 0 : index
      %c0_61 = arith.constant 0 : index
      %106 = vector.load %arg2[%c0_60, %c0_61] : memref<1x32xf32, #tpu.memory_space<vmem>>, vector<1x32xf32>
      %c0_62 = arith.constant 0 : index
      %c0_63 = arith.constant 0 : index
      %107 = vector.load %arg3[%c0_62, %c0_63] : memref<1x32xf32, #tpu.memory_space<vmem>>, vector<1x32xf32>
      %cst_64 = arith.constant dense<0.000000e+00> : vector<2xf32>
      %108 = vector.multi_reduction <add>, %105, %cst_64 [1] : vector<2x32xf32> to vector<2xf32>
      %109 = vector.shape_cast %108 : vector<2xf32> to vector<2x1xf32>
      %cst_65 = arith.constant 3.200000e+01 : f32
      %110 = vector.broadcast %cst_65 : f32 to vector<2x1xf32>
      %111 = arith.divf %109, %110 : vector<2x1xf32>
      %112 = vector.broadcast %111 : vector<2x1xf32> to vector<2x32xf32>
      %113 = arith.subf %105, %112 : vector<2x32xf32>
      %114 = arith.mulf %113, %113 : vector<2x32xf32>
      %cst_66 = arith.constant dense<0.000000e+00> : vector<2xf32>
      %115 = vector.multi_reduction <add>, %114, %cst_66 [1] : vector<2x32xf32> to vector<2xf32>
      %116 = vector.shape_cast %115 : vector<2xf32> to vector<2x1xf32>
      %cst_67 = arith.constant 3.200000e+01 : f32
      %117 = vector.broadcast %cst_67 : f32 to vector<2x1xf32>
      %118 = arith.divf %116, %117 : vector<2x1xf32>
      %cst_68 = arith.constant 9.99999974E-6 : f32
      %119 = vector.broadcast %cst_68 : f32 to vector<2x1xf32>
      %120 = arith.addf %118, %119 : vector<2x1xf32>
      %121 = math.rsqrt %120 : vector<2x1xf32>
      %122 = vector.broadcast %121 : vector<2x1xf32> to vector<2x32xf32>
      %123 = arith.mulf %113, %122 : vector<2x32xf32>
      %124 = vector.broadcast %106 : vector<1x32xf32> to vector<2x32xf32>
      %125 = arith.mulf %123, %124 : vector<2x32xf32>
      %126 = vector.broadcast %107 : vector<1x32xf32> to vector<2x32xf32>
      %127 = arith.addf %125, %126 : vector<2x32xf32>
      %c0_69 = arith.constant 0 : index
      %c0_70 = arith.constant 0 : index
      %128 = vector.load %arg18[%c0_69, %c0_70] : memref<2x32xf32, #tpu.memory_space<vmem>>, vector<2x32xf32>
      tpu.vector_store %arg18[%c0_69, %c0_70], %127 {strides = array<i32>} : memref<2x32xf32, #tpu.memory_space<vmem>>, vector<2x32xf32>,
    } else {
    }
    %c0 = arith.constant 0 : index
    %c0_1 = arith.constant 0 : index
    %3 = vector.load %arg18[%c0, %c0_1] : memref<2x32xf32, #tpu.memory_space<vmem>>, vector<2x32xf32>
    %c0_2 = arith.constant 0 : index
    %c0_3 = arith.constant 0 : index
    %c0_4 = arith.constant 0 : index
    %4 = vector.load %arg4[%c0_2, %c0_3, %c0_4] : memref<1x1x32xf32, #tpu.memory_space<vmem>>, vector<1x1x32xf32>
    %5 = vector.shape_cast %4 : vector<1x1x32xf32> to vector<1x32xf32>
    %c0_5 = arith.constant 0 : index
    %c0_6 = arith.constant 0 : index
    %c0_7 = arith.constant 0 : index
    %6 = vector.load %arg5[%c0_5, %c0_6, %c0_7] : memref<1x1x32xf32, #tpu.memory_space<vmem>>, vector<1x1x32xf32>
    %7 = vector.shape_cast %6 : vector<1x1x32xf32> to vector<1x32xf32>
    %cst = arith.constant dense<0.000000e+00> : vector<2xf32>
    %8 = vector.multi_reduction <add>, %3, %cst [1] : vector<2x32xf32> to vector<2xf32>
    %9 = vector.shape_cast %8 : vector<2xf32> to vector<2x1xf32>
    %cst_8 = arith.constant 3.200000e+01 : f32
    %10 = vector.broadcast %cst_8 : f32 to vector<2x1xf32>
    %11 = arith.divf %9, %10 : vector<2x1xf32>
    %12 = vector.broadcast %11 : vector<2x1xf32> to vector<2x32xf32>
    %13 = arith.subf %3, %12 : vector<2x32xf32>
    %14 = arith.mulf %13, %13 : vector<2x32xf32>
    %cst_9 = arith.constant dense<0.000000e+00> : vector<2xf32>
    %15 = vector.multi_reduction <add>, %14, %cst_9 [1] : vector<2x32xf32> to vector<2xf32>
    %16 = vector.shape_cast %15 : vector<2xf32> to vector<2x1xf32>
    %cst_10 = arith.constant 3.200000e+01 : f32
    %17 = vector.broadcast %cst_10 : f32 to vector<2x1xf32>
    %18 = arith.divf %16, %17 : vector<2x1xf32>
    %cst_11 = arith.constant 9.99999974E-6 : f32
    %19 = vector.broadcast %cst_11 : f32 to vector<2x1xf32>
    %20 = arith.addf %18, %19 : vector<2x1xf32>
    %21 = math.rsqrt %20 : vector<2x1xf32>
    %22 = vector.broadcast %21 : vector<2x1xf32> to vector<2x32xf32>
    %23 = arith.mulf %13, %22 : vector<2x32xf32>
    %24 = vector.broadcast %5 : vector<1x32xf32> to vector<2x32xf32>
    %25 = arith.mulf %23, %24 : vector<2x32xf32>
    %26 = vector.broadcast %7 : vector<1x32xf32> to vector<2x32xf32>
    %27 = arith.addf %25, %26 : vector<2x32xf32>
    %c0_12 = arith.constant 0 : index
    %c0_13 = arith.constant 0 : index
    %c0_14 = arith.constant 0 : index
    %28 = vector.load %arg6[%c0_12, %c0_13, %c0_14] : memref<1x32x32xbf16, #tpu.memory_space<vmem>>, vector<1x32x32xbf16>
    %29 = vector.shape_cast %28 : vector<1x32x32xbf16> to vector<32x32xbf16>
    %30 = arith.truncf %27 : vector<2x32xf32> to vector<2x32xbf16>
    %cst_15 = arith.constant dense<0.000000e+00> : vector<2x32xf32>
    %31 = tpu.matmul %30, %29, %cst_15 {dimension_numbers = #tpu.dot_dimension_numbers<[1], [0], [0], [1], [0, 0, 1, 1], [], []>} : vector<2x32xbf16>, vector<32x32xbf16>, vector<2x32xf32> -> vector<2x32xf32>
    %c0_16 = arith.constant 0 : index
    %c0_17 = arith.constant 0 : index
    %c0_18 = arith.constant 0 : index
    %32 = vector.load %arg7[%c0_16, %c0_17, %c0_18] : memref<1x1x32xf32, #tpu.memory_space<vmem>>, vector<1x1x32xf32>
    %33 = vector.shape_cast %32 : vector<1x1x32xf32> to vector<1x32xf32>
    %34 = vector.broadcast %33 : vector<1x32xf32> to vector<2x32xf32>
    %35 = arith.addf %31, %34 : vector<2x32xf32>
    %c0_19 = arith.constant 0 : index
    %c0_20 = arith.constant 0 : index
    %c0_21 = arith.constant 0 : index
    %36 = vector.load %arg8[%c0_19, %c0_20, %c0_21] : memref<1x32x32xbf16, #tpu.memory_space<vmem>>, vector<1x32x32xbf16>
    %37 = vector.shape_cast %36 : vector<1x32x32xbf16> to vector<32x32xbf16>
    %38 = arith.truncf %35 : vector<2x32xf32> to vector<2x32xbf16>
    %cst_22 = arith.constant dense<0.000000e+00> : vector<2x32xf32>
    %39 = tpu.matmul %38, %37, %cst_22 {dimension_numbers = #tpu.dot_dimension_numbers<[1], [0], [0], [1], [0, 0, 1, 1], [], []>} : vector<2x32xbf16>, vector<32x32xbf16>, vector<2x32xf32> -> vector<2x32xf32>
    %c0_23 = arith.constant 0 : index
    %c0_24 = arith.constant 0 : index
    %c0_25 = arith.constant 0 : index
    %40 = vector.load %arg9[%c0_23, %c0_24, %c0_25] : memref<1x1x32xf32, #tpu.memory_space<vmem>>, vector<1x1x32xf32>
    %41 = vector.shape_cast %40 : vector<1x1x32xf32> to vector<1x32xf32>
    %42 = vector.broadcast %41 : vector<1x32xf32> to vector<2x32xf32>
    %43 = arith.addf %39, %42 : vector<2x32xf32>
    %44 = arith.addf %43, %3 : vector<2x32xf32>
    %c0_26 = arith.constant 0 : index
    %c0_27 = arith.constant 0 : index
    %c0_28 = arith.constant 0 : index
    %45 = vector.load %arg10[%c0_26, %c0_27, %c0_28] : memref<1x1x32xf32, #tpu.memory_space<vmem>>, vector<1x1x32xf32>
    %46 = vector.shape_cast %45 : vector<1x1x32xf32> to vector<1x32xf32>
    %c0_29 = arith.constant 0 : index
    %c0_30 = arith.constant 0 : index
    %c0_31 = arith.constant 0 : index
    %47 = vector.load %arg11[%c0_29, %c0_30, %c0_31] : memref<1x1x32xf32, #tpu.memory_space<vmem>>, vector<1x1x32xf32>
    %48 = vector.shape_cast %47 : vector<1x1x32xf32> to vector<1x32xf32>
    %cst_32 = arith.constant dense<0.000000e+00> : vector<2xf32>
    %49 = vector.multi_reduction <add>, %44, %cst_32 [1] : vector<2x32xf32> to vector<2xf32>
    %50 = vector.shape_cast %49 : vector<2xf32> to vector<2x1xf32>
    %cst_33 = arith.constant 3.200000e+01 : f32
    %51 = vector.broadcast %cst_33 : f32 to vector<2x1xf32>
    %52 = arith.divf %50, %51 : vector<2x1xf32>
    %53 = vector.broadcast %52 : vector<2x1xf32> to vector<2x32xf32>
    %54 = arith.subf %44, %53 : vector<2x32xf32>
    %55 = arith.mulf %54, %54 : vector<2x32xf32>
    %cst_34 = arith.constant dense<0.000000e+00> : vector<2xf32>
    %56 = vector.multi_reduction <add>, %55, %cst_34 [1] : vector<2x32xf32> to vector<2xf32>
    %57 = vector.shape_cast %56 : vector<2xf32> to vector<2x1xf32>
    %cst_35 = arith.constant 3.200000e+01 : f32
    %58 = vector.broadcast %cst_35 : f32 to vector<2x1xf32>
    %59 = arith.divf %57, %58 : vector<2x1xf32>
    %cst_36 = arith.constant 9.99999974E-6 : f32
    %60 = vector.broadcast %cst_36 : f32 to vector<2x1xf32>
    %61 = arith.addf %59, %60 : vector<2x1xf32>
    %62 = math.rsqrt %61 : vector<2x1xf32>
    %63 = vector.broadcast %62 : vector<2x1xf32> to vector<2x32xf32>
    %64 = arith.mulf %54, %63 : vector<2x32xf32>
    %65 = vector.broadcast %46 : vector<1x32xf32> to vector<2x32xf32>
    %66 = arith.mulf %64, %65 : vector<2x32xf32>
    %67 = vector.broadcast %48 : vector<1x32xf32> to vector<2x32xf32>
    %68 = arith.addf %66, %67 : vector<2x32xf32>
    %c0_37 = arith.constant 0 : index
    %c0_38 = arith.constant 0 : index
    %c0_39 = arith.constant 0 : index
    %69 = vector.load %arg12[%c0_37, %c0_38, %c0_39] : memref<1x32x128xbf16, #tpu.memory_space<vmem>>, vector<1x32x128xbf16>
    %70 = vector.shape_cast %69 : vector<1x32x128xbf16> to vector<32x128xbf16>
    %71 = arith.truncf %68 : vector<2x32xf32> to vector<2x32xbf16>
    %cst_40 = arith.constant dense<0.000000e+00> : vector<2x128xf32>
    %72 = tpu.matmul %71, %70, %cst_40 {dimension_numbers = #tpu.dot_dimension_numbers<[1], [0], [0], [1], [0, 0, 1, 1], [], []>} : vector<2x32xbf16>, vector<32x128xbf16>, vector<2x128xf32> -> vector<2x128xf32>
    %c0_41 = arith.constant 0 : index
    %c0_42 = arith.constant 0 : index
    %c0_43 = arith.constant 0 : index
    %73 = vector.load %arg13[%c0_41, %c0_42, %c0_43] : memref<1x1x128xf32, #tpu.memory_space<vmem>>, vector<1x1x128xf32>
    %74 = vector.shape_cast %73 : vector<1x1x128xf32> to vector<1x128xf32>
    %75 = vector.broadcast %74 : vector<1x128xf32> to vector<2x128xf32>
    %76 = arith.addf %72, %75 : vector<2x128xf32>
    %cst_44 = arith.constant 5.000000e-01 : f32
    %77 = vector.broadcast %cst_44 : f32 to vector<2x128xf32>
    %78 = arith.mulf %77, %76 : vector<2x128xf32>
    %cst_45 = arith.constant 4.471500e-02 : f32
    %79 = vector.broadcast %cst_45 : f32 to vector<2x128xf32>
    %80 = arith.mulf %79, %76 : vector<2x128xf32>
    %81 = arith.mulf %80, %76 : vector<2x128xf32>
    %82 = arith.mulf %81, %76 : vector<2x128xf32>
    %83 = arith.addf %76, %82 : vector<2x128xf32>
    %cst_46 = arith.constant 0.797884583 : f32
    %84 = vector.broadcast %cst_46 : f32 to vector<2x128xf32>
    %85 = arith.mulf %84, %83 : vector<2x128xf32>
    %86 = math.tanh %85 : vector<2x128xf32>
    %cst_47 = arith.constant 1.000000e+00 : f32
    %87 = vector.broadcast %cst_47 : f32 to vector<2x128xf32>
    %88 = arith.addf %87, %86 : vector<2x128xf32>
    %89 = arith.mulf %78, %88 : vector<2x128xf32>
    %c0_48 = arith.constant 0 : index
    %c0_49 = arith.constant 0 : index
    %c0_50 = arith.constant 0 : index
    %90 = vector.load %arg14[%c0_48, %c0_49, %c0_50] : memref<1x128x32xbf16, #tpu.memory_space<vmem>>, vector<1x128x32xbf16>
    %91 = vector.shape_cast %90 : vector<1x128x32xbf16> to vector<128x32xbf16>
    %92 = arith.truncf %89 : vector<2x128xf32> to vector<2x128xbf16>
    %cst_51 = arith.constant dense<0.000000e+00> : vector<2x32xf32>
    %93 = tpu.matmul %92, %91, %cst_51 {dimension_numbers = #tpu.dot_dimension_numbers<[1], [0], [0], [1], [0, 0, 1, 1], [], []>} : vector<2x128xbf16>, vector<128x32xbf16>, vector<2x32xf32> -> vector<2x32xf32>
    %c0_52 = arith.constant 0 : index
    %c0_53 = arith.constant 0 : index
    %c0_54 = arith.constant 0 : index
    %94 = vector.load %arg15[%c0_52, %c0_53, %c0_54] : memref<1x1x32xf32, #tpu.memory_space<vmem>>, vector<1x1x32xf32>
    %95 = vector.shape_cast %94 : vector<1x1x32xf32> to vector<1x32xf32>
    %96 = vector.broadcast %95 : vector<1x32xf32> to vector<2x32xf32>
    %97 = arith.addf %93, %96 : vector<2x32xf32>
    %98 = arith.addf %97, %44 : vector<2x32xf32>
    %c4_i32 = arith.constant 4 : i32
    %99 = arith.cmpi slt, %arg0, %c4_i32 : i32
    %100 = arith.extui %99 : i1 to i32
    %c0_i32_55 = arith.constant 0 : i32
    %101 = arith.cmpi ne, %100, %c0_i32_55 : i32
    scf.if %101 {
      %c0_58 = arith.constant 0 : index
      %c0_59 = arith.constant 0 : index
      %105 = vector.load %arg18[%c0_58, %c0_59] : memref<2x32xf32, #tpu.memory_space<vmem>>, vector<2x32xf32>
      tpu.vector_store %arg18[%c0_58, %c0_59], %98 {strides = array<i32>} : memref<2x32xf32, #tpu.memory_space<vmem>>, vector<2x32xf32>,
    } else {
    }
    %c4_i32_56 = arith.constant 4 : i32
    %102 = arith.cmpi eq, %arg0, %c4_i32_56 : i32
    %103 = arith.extui %102 : i1 to i32
    %c0_i32_57 = arith.constant 0 : i32
    %104 = arith.cmpi ne, %103, %c0_i32_57 : i32
    scf.if %104 {
      %c0_58 = arith.constant 0 : index
      %c0_59 = arith.constant 0 : index
      %105 = vector.load %arg16[%c0_58, %c0_59] : memref<1x32xf32, #tpu.memory_space<vmem>>, vector<1x32xf32>
      %c0_60 = arith.constant 0 : index
      %c0_61 = arith.constant 0 : index
      %106 = vector.load %arg17[%c0_60, %c0_61] : memref<1x32xf32, #tpu.memory_space<vmem>>, vector<1x32xf32>
      %cst_62 = arith.constant dense<0.000000e+00> : vector<2xf32>
      %107 = vector.multi_reduction <add>, %98, %cst_62 [1] : vector<2x32xf32> to vector<2xf32>
      %108 = vector.shape_cast %107 : vector<2xf32> to vector<2x1xf32>
      %cst_63 = arith.constant 3.200000e+01 : f32
      %109 = vector.broadcast %cst_63 : f32 to vector<2x1xf32>
      %110 = arith.divf %108, %109 : vector<2x1xf32>
      %111 = vector.broadcast %110 : vector<2x1xf32> to vector<2x32xf32>
      %112 = arith.subf %98, %111 : vector<2x32xf32>
      %113 = arith.mulf %112, %112 : vector<2x32xf32>
      %cst_64 = arith.constant dense<0.000000e+00> : vector<2xf32>
      %114 = vector.multi_reduction <add>, %113, %cst_64 [1] : vector<2x32xf32> to vector<2xf32>
      %115 = vector.shape_cast %114 : vector<2xf32> to vector<2x1xf32>
      %cst_65 = arith.constant 3.200000e+01 : f32
      %116 = vector.broadcast %cst_65 : f32 to vector<2x1xf32>
      %117 = arith.divf %115, %116 : vector<2x1xf32>
      %cst_66 = arith.constant 9.99999974E-6 : f32
      %118 = vector.broadcast %cst_66 : f32 to vector<2x1xf32>
      %119 = arith.addf %117, %118 : vector<2x1xf32>
      %120 = math.rsqrt %119 : vector<2x1xf32>
      %121 = vector.broadcast %120 : vector<2x1xf32> to vector<2x32xf32>
      %122 = arith.mulf %112, %121 : vector<2x32xf32>
      %123 = vector.broadcast %105 : vector<1x32xf32> to vector<2x32xf32>
      %124 = arith.mulf %122, %123 : vector<2x32xf32>
      %125 = vector.broadcast %106 : vector<1x32xf32> to vector<2x32xf32>
      %126 = arith.addf %124, %125 : vector<2x32xf32>
      %c0_67 = arith.constant 0 : index
      %c0_68 = arith.constant 0 : index
      %127 = vector.load %arg18[%c0_67, %c0_68] : memref<2x32xf32, #tpu.memory_space<vmem>>, vector<2x32xf32>
      tpu.vector_store %arg18[%c0_67, %c0_68], %126 {strides = array<i32>} : memref<2x32xf32, #tpu.memory_space<vmem>>, vector<2x32xf32>,
    } else {
    }
    return
  }
  func.func @transform_0(%arg0: i32) -> (i32, i32) {
    %c0_i32 = arith.constant 0 : i32
    %c0_i32_0 = arith.constant 0 : i32
    %c0_i32_1 = arith.constant 0 : i32
    return %c0_i32, %c0_i32_0 : i32, i32
  }
  func.func @transform_1(%arg0: i32) -> (i32, i32) {
    %c0_i32 = arith.constant 0 : i32
    %c0_i32_0 = arith.constant 0 : i32
    %c0_i32_1 = arith.constant 0 : i32
    return %c0_i32, %c0_i32_0 : i32, i32
  }
  func.func @transform_2(%arg0: i32) -> (i32, i32) {
    %c0_i32 = arith.constant 0 : i32
    %c0_i32_0 = arith.constant 0 : i32
    %c0_i32_1 = arith.constant 0 : i32
    return %c0_i32, %c0_i32_0 : i32, i32
  }
  func.func @transform_3(%arg0: i32) -> (i32, i32, i32) {
    %c0_i32 = arith.constant 0 : i32
    %c0_i32_0 = arith.constant 0 : i32
    %c0_i32_1 = arith.constant 0 : i32
    return %arg0, %c0_i32, %c0_i32_0 : i32, i32, i32
  }
  func.func @transform_4(%arg0: i32) -> (i32, i32, i32) {
    %c0_i32 = arith.constant 0 : i32
    %c0_i32_0 = arith.constant 0 : i32
    %c0_i32_1 = arith.constant 0 : i32
    return %arg0, %c0_i32, %c0_i32_0 : i32, i32, i32
  }
  func.func @transform_5(%arg0: i32) -> (i32, i32, i32) {
    %c0_i32 = arith.constant 0 : i32
    %c0_i32_0 = arith.constant 0 : i32
    %c0_i32_1 = arith.constant 0 : i32
    return %arg0, %c0_i32, %c0_i32_0 : i32, i32, i32
  }
  func.func @transform_6(%arg0: i32) -> (i32, i32, i32) {
    %c0_i32 = arith.constant 0 : i32
    %c0_i32_0 = arith.constant 0 : i32
    %c0_i32_1 = arith.constant 0 : i32
    return %arg0, %c0_i32, %c0_i32_0 : i32, i32, i32
  }
  func.func @transform_7(%arg0: i32) -> (i32, i32, i32) {
    %c0_i32 = arith.constant 0 : i32
    %c0_i32_0 = arith.constant 0 : i32
    %c0_i32_1 = arith.constant 0 : i32
    return %arg0, %c0_i32, %c0_i32_0 : i32, i32, i32
  }
  func.func @transform_8(%arg0: i32) -> (i32, i32, i32) {
    %c0_i32 = arith.constant 0 : i32
    %c0_i32_0 = arith.constant 0 : i32
    %c0_i32_1 = arith.constant 0 : i32
    return %arg0, %c0_i32, %c0_i32_0 : i32, i32, i32
  }
  func.func @transform_9(%arg0: i32) -> (i32, i32, i32) {
    %c0_i32 = arith.constant 0 : i32
    %c0_i32_0 = arith.constant 0 : i32
    %c0_i32_1 = arith.constant 0 : i32
    return %arg0, %c0_i32, %c0_i32_0 : i32, i32, i32
  }
  func.func @transform_10(%arg0: i32) -> (i32, i32, i32) {
    %c0_i32 = arith.constant 0 : i32
    %c0_i32_0 = arith.constant 0 : i32
    %c0_i32_1 = arith.constant 0 : i32
    return %arg0, %c0_i32, %c0_i32_0 : i32, i32, i32
  }
  func.func @transform_11(%arg0: i32) -> (i32, i32, i32) {
    %c0_i32 = arith.constant 0 : i32
    %c0_i32_0 = arith.constant 0 : i32
    %c0_i32_1 = arith.constant 0 : i32
    return %arg0, %c0_i32, %c0_i32_0 : i32, i32, i32
  }
  func.func @transform_12(%arg0: i32) -> (i32, i32, i32) {
    %c0_i32 = arith.constant 0 : i32
    %c0_i32_0 = arith.constant 0 : i32
    %c0_i32_1 = arith.constant 0 : i32
    return %arg0, %c0_i32, %c0_i32_0 : i32, i32, i32
  }
  func.func @transform_13(%arg0: i32) -> (i32, i32, i32) {
    %c0_i32 = arith.constant 0 : i32
    %c0_i32_0 = arith.constant 0 : i32
    %c0_i32_1 = arith.constant 0 : i32
    return %arg0, %c0_i32, %c0_i32_0 : i32, i32, i32
  }
  func.func @transform_14(%arg0: i32) -> (i32, i32, i32) {
    %c0_i32 = arith.constant 0 : i32
    %c0_i32_0 = arith.constant 0 : i32
    %c0_i32_1 = arith.constant 0 : i32
    return %arg0, %c0_i32, %c0_i32_0 : i32, i32, i32
  }
  func.func @transform_15(%arg0: i32) -> (i32, i32) {
    %c0_i32 = arith.constant 0 : i32
    %c0_i32_0 = arith.constant 0 : i32
    %c0_i32_1 = arith.constant 0 : i32
    return %c0_i32, %c0_i32_0 : i32, i32
  }
  func.func @transform_16(%arg0: i32) -> (i32, i32) {
    %c0_i32 = arith.constant 0 : i32
    %c0_i32_0 = arith.constant 0 : i32
    %c0_i32_1 = arith.constant 0 : i32
    return %c0_i32, %c0_i32_0 : i32, i32
  }
  func.func @transform_17(%arg0: i32) -> (i32, i32) {
    %c0_i32 = arith.constant 0 : i32
    %c0_i32_0 = arith.constant 0 : i32
    %c0_i32_1 = arith.constant 0 : i32
    return %c0_i32, %c0_i32_0 : i32, i32
  }
}

module attributes {stable_mosaic.version = 11 : i64} {
  func.func @_vision_layers_kernel(%arg0: i32, %arg1: i32, %arg2: memref<1x8x32xf32, #tpu.memory_space<vmem>>, %arg3: memref<1x1x32xf32, #tpu.memory_space<vmem>>, %arg4: memref<1x1x32xf32, #tpu.memory_space<vmem>>, %arg5: memref<1x32x96xbf16, #tpu.memory_space<vmem>>, %arg6: memref<1x1x96xf32, #tpu.memory_space<vmem>>, %arg7: memref<1x32x32xbf16, #tpu.memory_space<vmem>>, %arg8: memref<1x1x32xf32, #tpu.memory_space<vmem>>, %arg9: memref<1x1x32xf32, #tpu.memory_space<vmem>>, %arg10: memref<1x1x32xf32, #tpu.memory_space<vmem>>, %arg11: memref<1x32x128xbf16, #tpu.memory_space<vmem>>, %arg12: memref<1x1x128xf32, #tpu.memory_space<vmem>>, %arg13: memref<1x128x32xbf16, #tpu.memory_space<vmem>>, %arg14: memref<1x1x32xf32, #tpu.memory_space<vmem>>, %arg15: memref<1x8x32xf32, #tpu.memory_space<vmem>>, %arg16: memref<12x8x8xf32, #tpu.memory_space<vmem>>) attributes {dimension_semantics = [#tpu.dimension_semantics<parallel>, #tpu.dimension_semantics<arbitrary>], iteration_bounds = array<i64: 2, 2>, scalar_prefetch = 0 : i64, scratch_operands = 1 : i64, tpu.core_type = #tpu.core_type<tc>, window_params = [{transform_indices = @transform_0, window_bounds = array<i64: 1, 8, 32>}, {transform_indices = @transform_1, window_bounds = array<i64: 1, 1, 32>}, {transform_indices = @transform_2, window_bounds = array<i64: 1, 1, 32>}, {transform_indices = @transform_3, window_bounds = array<i64: 1, 32, 96>}, {transform_indices = @transform_4, window_bounds = array<i64: 1, 1, 96>}, {transform_indices = @transform_5, window_bounds = array<i64: 1, 32, 32>}, {transform_indices = @transform_6, window_bounds = array<i64: 1, 1, 32>}, {transform_indices = @transform_7, window_bounds = array<i64: 1, 1, 32>}, {transform_indices = @transform_8, window_bounds = array<i64: 1, 1, 32>}, {transform_indices = @transform_9, window_bounds = array<i64: 1, 32, 128>}, {transform_indices = @transform_10, window_bounds = array<i64: 1, 1, 128>}, {transform_indices = @transform_11, window_bounds = array<i64: 1, 128, 32>}, {transform_indices = @transform_12, window_bounds = array<i64: 1, 1, 32>}, {transform_indices = @transform_13, window_bounds = array<i64: 1, 8, 32>}]} {
    %c0_i32 = arith.constant 0 : i32
    %0 = arith.cmpi eq, %arg1, %c0_i32 : i32
    %1 = arith.extui %0 : i1 to i32
    %c0_i32_0 = arith.constant 0 : i32
    %2 = arith.cmpi ne, %1, %c0_i32_0 : i32
    scf.if %2 {
      %c0_97 = arith.constant 0 : index
      %c0_98 = arith.constant 0 : index
      %c0_99 = arith.constant 0 : index
      %179 = vector.load %arg2[%c0_97, %c0_98, %c0_99] : memref<1x8x32xf32, #tpu.memory_space<vmem>>, vector<1x8x32xf32>
      %180 = vector.shape_cast %179 : vector<1x8x32xf32> to vector<8x32xf32>
      %c0_100 = arith.constant 0 : index
      %c0_101 = arith.constant 0 : index
      %c0_102 = arith.constant 0 : index
      %181 = vector.load %arg15[%c0_100, %c0_101, %c0_102] : memref<1x8x32xf32, #tpu.memory_space<vmem>>, vector<1x8x32xf32>
      %182 = vector.shape_cast %181 : vector<1x8x32xf32> to vector<8x32xf32>
      %183 = vector.shape_cast %180 : vector<8x32xf32> to vector<1x8x32xf32>
      tpu.vector_store %arg15[%c0_100, %c0_101, %c0_102], %183 {strides = array<i32>} : memref<1x8x32xf32, #tpu.memory_space<vmem>>, vector<1x8x32xf32>,
    } else {
    }
    %c0 = arith.constant 0 : index
    %c0_1 = arith.constant 0 : index
    %c0_2 = arith.constant 0 : index
    %3 = vector.load %arg15[%c0, %c0_1, %c0_2] : memref<1x8x32xf32, #tpu.memory_space<vmem>>, vector<1x8x32xf32>
    %4 = vector.shape_cast %3 : vector<1x8x32xf32> to vector<8x32xf32>
    %c0_3 = arith.constant 0 : index
    %c0_4 = arith.constant 0 : index
    %c0_5 = arith.constant 0 : index
    %5 = vector.load %arg3[%c0_3, %c0_4, %c0_5] : memref<1x1x32xf32, #tpu.memory_space<vmem>>, vector<1x1x32xf32>
    %6 = vector.shape_cast %5 : vector<1x1x32xf32> to vector<1x32xf32>
    %c0_6 = arith.constant 0 : index
    %c0_7 = arith.constant 0 : index
    %c0_8 = arith.constant 0 : index
    %7 = vector.load %arg4[%c0_6, %c0_7, %c0_8] : memref<1x1x32xf32, #tpu.memory_space<vmem>>, vector<1x1x32xf32>
    %8 = vector.shape_cast %7 : vector<1x1x32xf32> to vector<1x32xf32>
    %cst = arith.constant dense<0.000000e+00> : vector<8xf32>
    %9 = vector.multi_reduction <add>, %4, %cst [1] : vector<8x32xf32> to vector<8xf32>
    %10 = vector.shape_cast %9 : vector<8xf32> to vector<8x1xf32>
    %cst_9 = arith.constant 3.200000e+01 : f32
    %11 = vector.broadcast %cst_9 : f32 to vector<8x1xf32>
    %12 = arith.divf %10, %11 : vector<8x1xf32>
    %13 = vector.broadcast %12 : vector<8x1xf32> to vector<8x32xf32>
    %14 = arith.subf %4, %13 : vector<8x32xf32>
    %15 = arith.mulf %14, %14 : vector<8x32xf32>
    %cst_10 = arith.constant dense<0.000000e+00> : vector<8xf32>
    %16 = vector.multi_reduction <add>, %15, %cst_10 [1] : vector<8x32xf32> to vector<8xf32>
    %17 = vector.shape_cast %16 : vector<8xf32> to vector<8x1xf32>
    %cst_11 = arith.constant 3.200000e+01 : f32
    %18 = vector.broadcast %cst_11 : f32 to vector<8x1xf32>
    %19 = arith.divf %17, %18 : vector<8x1xf32>
    %cst_12 = arith.constant 9.99999974E-6 : f32
    %20 = vector.broadcast %cst_12 : f32 to vector<8x1xf32>
    %21 = arith.addf %19, %20 : vector<8x1xf32>
    %22 = math.rsqrt %21 : vector<8x1xf32>
    %23 = vector.broadcast %22 : vector<8x1xf32> to vector<8x32xf32>
    %24 = arith.mulf %14, %23 : vector<8x32xf32>
    %25 = vector.broadcast %6 : vector<1x32xf32> to vector<8x32xf32>
    %26 = arith.mulf %24, %25 : vector<8x32xf32>
    %27 = vector.broadcast %8 : vector<1x32xf32> to vector<8x32xf32>
    %28 = arith.addf %26, %27 : vector<8x32xf32>
    %c0_13 = arith.constant 0 : index
    %c0_14 = arith.constant 0 : index
    %c0_15 = arith.constant 0 : index
    %29 = vector.load %arg5[%c0_13, %c0_14, %c0_15] : memref<1x32x96xbf16, #tpu.memory_space<vmem>>, vector<1x32x96xbf16>
    %30 = vector.shape_cast %29 : vector<1x32x96xbf16> to vector<32x96xbf16>
    %31 = arith.truncf %28 : vector<8x32xf32> to vector<8x32xbf16>
    %cst_16 = arith.constant dense<0.000000e+00> : vector<8x96xf32>
    %32 = tpu.matmul %31, %30, %cst_16 {dimension_numbers = #tpu.dot_dimension_numbers<[1], [0], [0], [1], [0, 0, 1, 1], [], []>} : vector<8x32xbf16>, vector<32x96xbf16>, vector<8x96xf32> -> vector<8x96xf32>
    %c0_17 = arith.constant 0 : index
    %c0_18 = arith.constant 0 : index
    %c0_19 = arith.constant 0 : index
    %33 = vector.load %arg6[%c0_17, %c0_18, %c0_19] : memref<1x1x96xf32, #tpu.memory_space<vmem>>, vector<1x1x96xf32>
    %34 = vector.shape_cast %33 : vector<1x1x96xf32> to vector<1x96xf32>
    %35 = vector.broadcast %34 : vector<1x96xf32> to vector<8x96xf32>
    %36 = arith.addf %32, %35 : vector<8x96xf32>
    %37 = vector.extract_strided_slice %36 {offsets = [0, 0], sizes = [8, 8], strides = [1, 1]} : vector<8x96xf32> to vector<8x8xf32>
    %c0_20 = arith.constant 0 : index
    %c0_21 = arith.constant 0 : index
    %c0_22 = arith.constant 0 : index
    %38 = vector.load %arg16[%c0_20, %c0_21, %c0_22] : memref<12x8x8xf32, #tpu.memory_space<vmem>>, vector<1x8x8xf32>
    %39 = vector.shape_cast %38 : vector<1x8x8xf32> to vector<8x8xf32>
    %40 = vector.shape_cast %37 : vector<8x8xf32> to vector<1x8x8xf32>
    tpu.vector_store %arg16[%c0_20, %c0_21, %c0_22], %40 {strides = array<i32>} : memref<12x8x8xf32, #tpu.memory_space<vmem>>, vector<1x8x8xf32>,
    %41 = vector.extract_strided_slice %36 {offsets = [0, 8], sizes = [8, 8], strides = [1, 1]} : vector<8x96xf32> to vector<8x8xf32>
    %c1 = arith.constant 1 : index
    %c0_23 = arith.constant 0 : index
    %c0_24 = arith.constant 0 : index
    %42 = vector.load %arg16[%c1, %c0_23, %c0_24] : memref<12x8x8xf32, #tpu.memory_space<vmem>>, vector<1x8x8xf32>
    %43 = vector.shape_cast %42 : vector<1x8x8xf32> to vector<8x8xf32>
    %44 = vector.shape_cast %41 : vector<8x8xf32> to vector<1x8x8xf32>
    tpu.vector_store %arg16[%c1, %c0_23, %c0_24], %44 {strides = array<i32>} : memref<12x8x8xf32, #tpu.memory_space<vmem>>, vector<1x8x8xf32>,
    %45 = vector.extract_strided_slice %36 {offsets = [0, 16], sizes = [8, 8], strides = [1, 1]} : vector<8x96xf32> to vector<8x8xf32>
    %c2 = arith.constant 2 : index
    %c0_25 = arith.constant 0 : index
    %c0_26 = arith.constant 0 : index
    %46 = vector.load %arg16[%c2, %c0_25, %c0_26] : memref<12x8x8xf32, #tpu.memory_space<vmem>>, vector<1x8x8xf32>
    %47 = vector.shape_cast %46 : vector<1x8x8xf32> to vector<8x8xf32>
    %48 = vector.shape_cast %45 : vector<8x8xf32> to vector<1x8x8xf32>
    tpu.vector_store %arg16[%c2, %c0_25, %c0_26], %48 {strides = array<i32>} : memref<12x8x8xf32, #tpu.memory_space<vmem>>, vector<1x8x8xf32>,
    %49 = vector.extract_strided_slice %36 {offsets = [0, 24], sizes = [8, 8], strides = [1, 1]} : vector<8x96xf32> to vector<8x8xf32>
    %c3 = arith.constant 3 : index
    %c0_27 = arith.constant 0 : index
    %c0_28 = arith.constant 0 : index
    %50 = vector.load %arg16[%c3, %c0_27, %c0_28] : memref<12x8x8xf32, #tpu.memory_space<vmem>>, vector<1x8x8xf32>
    %51 = vector.shape_cast %50 : vector<1x8x8xf32> to vector<8x8xf32>
    %52 = vector.shape_cast %49 : vector<8x8xf32> to vector<1x8x8xf32>
    tpu.vector_store %arg16[%c3, %c0_27, %c0_28], %52 {strides = array<i32>} : memref<12x8x8xf32, #tpu.memory_space<vmem>>, vector<1x8x8xf32>,
    %53 = vector.extract_strided_slice %36 {offsets = [0, 32], sizes = [8, 8], strides = [1, 1]} : vector<8x96xf32> to vector<8x8xf32>
    %c4 = arith.constant 4 : index
    %c0_29 = arith.constant 0 : index
    %c0_30 = arith.constant 0 : index
    %54 = vector.load %arg16[%c4, %c0_29, %c0_30] : memref<12x8x8xf32, #tpu.memory_space<vmem>>, vector<1x8x8xf32>
    %55 = vector.shape_cast %54 : vector<1x8x8xf32> to vector<8x8xf32>
    %56 = vector.shape_cast %53 : vector<8x8xf32> to vector<1x8x8xf32>
    tpu.vector_store %arg16[%c4, %c0_29, %c0_30], %56 {strides = array<i32>} : memref<12x8x8xf32, #tpu.memory_space<vmem>>, vector<1x8x8xf32>,
    %57 = vector.extract_strided_slice %36 {offsets = [0, 40], sizes = [8, 8], strides = [1, 1]} : vector<8x96xf32> to vector<8x8xf32>
    %c5 = arith.constant 5 : index
    %c0_31 = arith.constant 0 : index
    %c0_32 = arith.constant 0 : index
    %58 = vector.load %arg16[%c5, %c0_31, %c0_32] : memref<12x8x8xf32, #tpu.memory_space<vmem>>, vector<1x8x8xf32>
    %59 = vector.shape_cast %58 : vector<1x8x8xf32> to vector<8x8xf32>
    %60 = vector.shape_cast %57 : vector<8x8xf32> to vector<1x8x8xf32>
    tpu.vector_store %arg16[%c5, %c0_31, %c0_32], %60 {strides = array<i32>} : memref<12x8x8xf32, #tpu.memory_space<vmem>>, vector<1x8x8xf32>,
    %61 = vector.extract_strided_slice %36 {offsets = [0, 48], sizes = [8, 8], strides = [1, 1]} : vector<8x96xf32> to vector<8x8xf32>
    %c6 = arith.constant 6 : index
    %c0_33 = arith.constant 0 : index
    %c0_34 = arith.constant 0 : index
    %62 = vector.load %arg16[%c6, %c0_33, %c0_34] : memref<12x8x8xf32, #tpu.memory_space<vmem>>, vector<1x8x8xf32>
    %63 = vector.shape_cast %62 : vector<1x8x8xf32> to vector<8x8xf32>
    %64 = vector.shape_cast %61 : vector<8x8xf32> to vector<1x8x8xf32>
    tpu.vector_store %arg16[%c6, %c0_33, %c0_34], %64 {strides = array<i32>} : memref<12x8x8xf32, #tpu.memory_space<vmem>>, vector<1x8x8xf32>,
    %65 = vector.extract_strided_slice %36 {offsets = [0, 56], sizes = [8, 8], strides = [1, 1]} : vector<8x96xf32> to vector<8x8xf32>
    %c7 = arith.constant 7 : index
    %c0_35 = arith.constant 0 : index
    %c0_36 = arith.constant 0 : index
    %66 = vector.load %arg16[%c7, %c0_35, %c0_36] : memref<12x8x8xf32, #tpu.memory_space<vmem>>, vector<1x8x8xf32>
    %67 = vector.shape_cast %66 : vector<1x8x8xf32> to vector<8x8xf32>
    %68 = vector.shape_cast %65 : vector<8x8xf32> to vector<1x8x8xf32>
    tpu.vector_store %arg16[%c7, %c0_35, %c0_36], %68 {strides = array<i32>} : memref<12x8x8xf32, #tpu.memory_space<vmem>>, vector<1x8x8xf32>,
    %69 = vector.extract_strided_slice %36 {offsets = [0, 64], sizes = [8, 8], strides = [1, 1]} : vector<8x96xf32> to vector<8x8xf32>
    %c8 = arith.constant 8 : index
    %c0_37 = arith.constant 0 : index
    %c0_38 = arith.constant 0 : index
    %70 = vector.load %arg16[%c8, %c0_37, %c0_38] : memref<12x8x8xf32, #tpu.memory_space<vmem>>, vector<1x8x8xf32>
    %71 = vector.shape_cast %70 : vector<1x8x8xf32> to vector<8x8xf32>
    %72 = vector.shape_cast %69 : vector<8x8xf32> to vector<1x8x8xf32>
    tpu.vector_store %arg16[%c8, %c0_37, %c0_38], %72 {strides = array<i32>} : memref<12x8x8xf32, #tpu.memory_space<vmem>>, vector<1x8x8xf32>,
    %73 = vector.extract_strided_slice %36 {offsets = [0, 72], sizes = [8, 8], strides = [1, 1]} : vector<8x96xf32> to vector<8x8xf32>
    %c9 = arith.constant 9 : index
    %c0_39 = arith.constant 0 : index
    %c0_40 = arith.constant 0 : index
    %74 = vector.load %arg16[%c9, %c0_39, %c0_40] : memref<12x8x8xf32, #tpu.memory_space<vmem>>, vector<1x8x8xf32>
    %75 = vector.shape_cast %74 : vector<1x8x8xf32> to vector<8x8xf32>
    %76 = vector.shape_cast %73 : vector<8x8xf32> to vector<1x8x8xf32>
    tpu.vector_store %arg16[%c9, %c0_39, %c0_40], %76 {strides = array<i32>} : memref<12x8x8xf32, #tpu.memory_space<vmem>>, vector<1x8x8xf32>,
    %77 = vector.extract_strided_slice %36 {offsets = [0, 80], sizes = [8, 8], strides = [1, 1]} : vector<8x96xf32> to vector<8x8xf32>
    %c10 = arith.constant 10 : index
    %c0_41 = arith.constant 0 : index
    %c0_42 = arith.constant 0 : index
    %78 = vector.load %arg16[%c10, %c0_41, %c0_42] : memref<12x8x8xf32, #tpu.memory_space<vmem>>, vector<1x8x8xf32>
    %79 = vector.shape_cast %78 : vector<1x8x8xf32> to vector<8x8xf32>
    %80 = vector.shape_cast %77 : vector<8x8xf32> to vector<1x8x8xf32>
    tpu.vector_store %arg16[%c10, %c0_41, %c0_42], %80 {strides = array<i32>} : memref<12x8x8xf32, #tpu.memory_space<vmem>>, vector<1x8x8xf32>,
    %81 = vector.extract_strided_slice %36 {offsets = [0, 88], sizes = [8, 8], strides = [1, 1]} : vector<8x96xf32> to vector<8x8xf32>
    %c11 = arith.constant 11 : index
    %c0_43 = arith.constant 0 : index
    %c0_44 = arith.constant 0 : index
    %82 = vector.load %arg16[%c11, %c0_43, %c0_44] : memref<12x8x8xf32, #tpu.memory_space<vmem>>, vector<1x8x8xf32>
    %83 = vector.shape_cast %82 : vector<1x8x8xf32> to vector<8x8xf32>
    %84 = vector.shape_cast %81 : vector<8x8xf32> to vector<1x8x8xf32>
    tpu.vector_store %arg16[%c11, %c0_43, %c0_44], %84 {strides = array<i32>} : memref<12x8x8xf32, #tpu.memory_space<vmem>>, vector<1x8x8xf32>,
    %c0_45 = arith.constant 0 : index
    %c0_46 = arith.constant 0 : index
    %c0_47 = arith.constant 0 : index
    %85 = vector.load %arg16[%c0_45, %c0_46, %c0_47] : memref<12x8x8xf32, #tpu.memory_space<vmem>>, vector<4x8x8xf32>
    %cst_48 = arith.constant 0.353553385 : f32
    %86 = vector.broadcast %cst_48 : f32 to vector<4x8x8xf32>
    %87 = arith.mulf %85, %86 : vector<4x8x8xf32>
    %c4_49 = arith.constant 4 : index
    %c0_50 = arith.constant 0 : index
    %c0_51 = arith.constant 0 : index
    %88 = vector.load %arg16[%c4_49, %c0_50, %c0_51] : memref<12x8x8xf32, #tpu.memory_space<vmem>>, vector<4x8x8xf32>
    %c8_52 = arith.constant 8 : index
    %c0_53 = arith.constant 0 : index
    %c0_54 = arith.constant 0 : index
    %89 = vector.load %arg16[%c8_52, %c0_53, %c0_54] : memref<12x8x8xf32, #tpu.memory_space<vmem>>, vector<4x8x8xf32>
    "tpu.trace_start"() <{level = 10 : i32, message = "hqd,hkd->hqk"}> : () -> ()
    %cst_55 = arith.constant dense<0.000000e+00> : vector<4x8x8xf32>
    %90 = tpu.matmul %87, %88, %cst_55 {dimension_numbers = #tpu.dot_dimension_numbers<[2], [2], [1], [1], [0, 0, 0, 1, 1, 1], [0], [0]>} : vector<4x8x8xf32>, vector<4x8x8xf32>, vector<4x8x8xf32> -> vector<4x8x8xf32>
    "tpu.trace_stop"() : () -> ()
    %91 = tpu.iota {dimensions = array<i32: 2>} : vector<1x1x8xi32>
    %c5_i32 = arith.constant 5 : i32
    %92 = vector.broadcast %c5_i32 : i32 to vector<1x1x8xi32>
    %93 = arith.cmpi slt, %91, %92 : vector<1x1x8xi32>
    %cst_56 = arith.constant -1.000000e+30 : f32
    %94 = vector.shape_cast %93 : vector<1x1x8xi1> to vector<1x1x8xi1>
    %95 = vector.broadcast %94 : vector<1x1x8xi1> to vector<4x8x8xi1>
    %96 = vector.broadcast %cst_56 : f32 to vector<4x8x8xf32>
    %97 = arith.select %95, %90, %96 : vector<4x8x8xi1>, vector<4x8x8xf32>
    %cst_57 = arith.constant dense<0xFF800000> : vector<4x8xf32>
    %98 = vector.multi_reduction <maximumf>, %97, %cst_57 [2] : vector<4x8x8xf32> to vector<4x8xf32>
    %99 = vector.shape_cast %98 : vector<4x8xf32> to vector<4x8x1xf32>
    %100 = vector.broadcast %99 : vector<4x8x1xf32> to vector<4x8x8xf32>
    %101 = arith.subf %97, %100 : vector<4x8x8xf32>
    %102 = math.exp %101 : vector<4x8x8xf32>
    %cst_58 = arith.constant dense<0.000000e+00> : vector<4x8xf32>
    %103 = vector.multi_reduction <add>, %102, %cst_58 [2] : vector<4x8x8xf32> to vector<4x8xf32>
    %104 = vector.shape_cast %103 : vector<4x8xf32> to vector<4x8x1xf32>
    %105 = tpu.reciprocal %104 {approx = true} : vector<4x8x1xf32> -> vector<4x8x1xf32>
    %106 = vector.broadcast %105 : vector<4x8x1xf32> to vector<4x8x8xf32>
    %107 = arith.mulf %102, %106 : vector<4x8x8xf32>
    "tpu.trace_start"() <{level = 10 : i32, message = "hqk,hkd->hqd"}> : () -> ()
    %cst_59 = arith.constant dense<0.000000e+00> : vector<4x8x8xf32>
    %108 = tpu.matmul %107, %89, %cst_59 {dimension_numbers = #tpu.dot_dimension_numbers<[2], [1], [1], [2], [0, 0, 0, 1, 1, 2], [0], [0]>} : vector<4x8x8xf32>, vector<4x8x8xf32>, vector<4x8x8xf32> -> vector<4x8x8xf32>
    "tpu.trace_stop"() : () -> ()
    %109 = vector.extract_strided_slice %108 {offsets = [0, 0, 0], sizes = [1, 8, 8], strides = [1, 1, 1]} : vector<4x8x8xf32> to vector<1x8x8xf32>
    %110 = vector.shape_cast %109 : vector<1x8x8xf32> to vector<8x8xf32>
    %111 = vector.extract_strided_slice %108 {offsets = [1, 0, 0], sizes = [1, 8, 8], strides = [1, 1, 1]} : vector<4x8x8xf32> to vector<1x8x8xf32>
    %112 = vector.shape_cast %111 : vector<1x8x8xf32> to vector<8x8xf32>
    %113 = vector.extract_strided_slice %108 {offsets = [2, 0, 0], sizes = [1, 8, 8], strides = [1, 1, 1]} : vector<4x8x8xf32> to vector<1x8x8xf32>
    %114 = vector.shape_cast %113 : vector<1x8x8xf32> to vector<8x8xf32>
    %115 = vector.extract_strided_slice %108 {offsets = [3, 0, 0], sizes = [1, 8, 8], strides = [1, 1, 1]} : vector<4x8x8xf32> to vector<1x8x8xf32>
    %116 = vector.shape_cast %115 : vector<1x8x8xf32> to vector<8x8xf32>
    %117 = tpu.concatenate %110, %112, %114, %116 in 1 : vector<8x8xf32>, vector<8x8xf32>, vector<8x8xf32>, vector<8x8xf32> -> vector<8x32xf32>
    %c0_60 = arith.constant 0 : index
    %c0_61 = arith.constant 0 : index
    %c0_62 = arith.constant 0 : index
    %118 = vector.load %arg7[%c0_60, %c0_61, %c0_62] : memref<1x32x32xbf16, #tpu.memory_space<vmem>>, vector<1x32x32xbf16>
    %119 = vector.shape_cast %118 : vector<1x32x32xbf16> to vector<32x32xbf16>
    %120 = arith.truncf %117 : vector<8x32xf32> to vector<8x32xbf16>
    %cst_63 = arith.constant dense<0.000000e+00> : vector<8x32xf32>
    %121 = tpu.matmul %120, %119, %cst_63 {dimension_numbers = #tpu.dot_dimension_numbers<[1], [0], [0], [1], [0, 0, 1, 1], [], []>} : vector<8x32xbf16>, vector<32x32xbf16>, vector<8x32xf32> -> vector<8x32xf32>
    %c0_64 = arith.constant 0 : index
    %c0_65 = arith.constant 0 : index
    %c0_66 = arith.constant 0 : index
    %122 = vector.load %arg8[%c0_64, %c0_65, %c0_66] : memref<1x1x32xf32, #tpu.memory_space<vmem>>, vector<1x1x32xf32>
    %123 = vector.shape_cast %122 : vector<1x1x32xf32> to vector<1x32xf32>
    %124 = vector.broadcast %123 : vector<1x32xf32> to vector<8x32xf32>
    %125 = arith.addf %121, %124 : vector<8x32xf32>
    %126 = arith.addf %125, %4 : vector<8x32xf32>
    %c0_67 = arith.constant 0 : index
    %c0_68 = arith.constant 0 : index
    %c0_69 = arith.constant 0 : index
    %127 = vector.load %arg9[%c0_67, %c0_68, %c0_69] : memref<1x1x32xf32, #tpu.memory_space<vmem>>, vector<1x1x32xf32>
    %128 = vector.shape_cast %127 : vector<1x1x32xf32> to vector<1x32xf32>
    %c0_70 = arith.constant 0 : index
    %c0_71 = arith.constant 0 : index
    %c0_72 = arith.constant 0 : index
    %129 = vector.load %arg10[%c0_70, %c0_71, %c0_72] : memref<1x1x32xf32, #tpu.memory_space<vmem>>, vector<1x1x32xf32>
    %130 = vector.shape_cast %129 : vector<1x1x32xf32> to vector<1x32xf32>
    %cst_73 = arith.constant dense<0.000000e+00> : vector<8xf32>
    %131 = vector.multi_reduction <add>, %126, %cst_73 [1] : vector<8x32xf32> to vector<8xf32>
    %132 = vector.shape_cast %131 : vector<8xf32> to vector<8x1xf32>
    %cst_74 = arith.constant 3.200000e+01 : f32
    %133 = vector.broadcast %cst_74 : f32 to vector<8x1xf32>
    %134 = arith.divf %132, %133 : vector<8x1xf32>
    %135 = vector.broadcast %134 : vector<8x1xf32> to vector<8x32xf32>
    %136 = arith.subf %126, %135 : vector<8x32xf32>
    %137 = arith.mulf %136, %136 : vector<8x32xf32>
    %cst_75 = arith.constant dense<0.000000e+00> : vector<8xf32>
    %138 = vector.multi_reduction <add>, %137, %cst_75 [1] : vector<8x32xf32> to vector<8xf32>
    %139 = vector.shape_cast %138 : vector<8xf32> to vector<8x1xf32>
    %cst_76 = arith.constant 3.200000e+01 : f32
    %140 = vector.broadcast %cst_76 : f32 to vector<8x1xf32>
    %141 = arith.divf %139, %140 : vector<8x1xf32>
    %cst_77 = arith.constant 9.99999974E-6 : f32
    %142 = vector.broadcast %cst_77 : f32 to vector<8x1xf32>
    %143 = arith.addf %141, %142 : vector<8x1xf32>
    %144 = math.rsqrt %143 : vector<8x1xf32>
    %145 = vector.broadcast %144 : vector<8x1xf32> to vector<8x32xf32>
    %146 = arith.mulf %136, %145 : vector<8x32xf32>
    %147 = vector.broadcast %128 : vector<1x32xf32> to vector<8x32xf32>
    %148 = arith.mulf %146, %147 : vector<8x32xf32>
    %149 = vector.broadcast %130 : vector<1x32xf32> to vector<8x32xf32>
    %150 = arith.addf %148, %149 : vector<8x32xf32>
    %c0_78 = arith.constant 0 : index
    %c0_79 = arith.constant 0 : index
    %c0_80 = arith.constant 0 : index
    %151 = vector.load %arg11[%c0_78, %c0_79, %c0_80] : memref<1x32x128xbf16, #tpu.memory_space<vmem>>, vector<1x32x128xbf16>
    %152 = vector.shape_cast %151 : vector<1x32x128xbf16> to vector<32x128xbf16>
    %153 = arith.truncf %150 : vector<8x32xf32> to vector<8x32xbf16>
    %cst_81 = arith.constant dense<0.000000e+00> : vector<8x128xf32>
    %154 = tpu.matmul %153, %152, %cst_81 {dimension_numbers = #tpu.dot_dimension_numbers<[1], [0], [0], [1], [0, 0, 1, 1], [], []>} : vector<8x32xbf16>, vector<32x128xbf16>, vector<8x128xf32> -> vector<8x128xf32>
    %c0_82 = arith.constant 0 : index
    %c0_83 = arith.constant 0 : index
    %c0_84 = arith.constant 0 : index
    %155 = vector.load %arg12[%c0_82, %c0_83, %c0_84] : memref<1x1x128xf32, #tpu.memory_space<vmem>>, vector<1x1x128xf32>
    %156 = vector.shape_cast %155 : vector<1x1x128xf32> to vector<1x128xf32>
    %157 = vector.broadcast %156 : vector<1x128xf32> to vector<8x128xf32>
    %158 = arith.addf %154, %157 : vector<8x128xf32>
    %cst_85 = arith.constant 1.702000e+00 : f32
    %159 = vector.broadcast %cst_85 : f32 to vector<8x128xf32>
    %160 = arith.mulf %159, %158 : vector<8x128xf32>
    %161 = arith.negf %160 : vector<8x128xf32>
    %162 = math.exp %161 : vector<8x128xf32>
    %cst_86 = arith.constant 1.000000e+00 : f32
    %163 = vector.broadcast %cst_86 : f32 to vector<8x128xf32>
    %164 = arith.addf %163, %162 : vector<8x128xf32>
    %165 = arith.divf %163, %164 : vector<8x128xf32>
    %166 = arith.mulf %158, %165 : vector<8x128xf32>
    %c0_87 = arith.constant 0 : index
    %c0_88 = arith.constant 0 : index
    %c0_89 = arith.constant 0 : index
    %167 = vector.load %arg13[%c0_87, %c0_88, %c0_89] : memref<1x128x32xbf16, #tpu.memory_space<vmem>>, vector<1x128x32xbf16>
    %168 = vector.shape_cast %167 : vector<1x128x32xbf16> to vector<128x32xbf16>
    %169 = arith.truncf %166 : vector<8x128xf32> to vector<8x128xbf16>
    %cst_90 = arith.constant dense<0.000000e+00> : vector<8x32xf32>
    %170 = tpu.matmul %169, %168, %cst_90 {dimension_numbers = #tpu.dot_dimension_numbers<[1], [0], [0], [1], [0, 0, 1, 1], [], []>} : vector<8x128xbf16>, vector<128x32xbf16>, vector<8x32xf32> -> vector<8x32xf32>
    %c0_91 = arith.constant 0 : index
    %c0_92 = arith.constant 0 : index
    %c0_93 = arith.constant 0 : index
    %171 = vector.load %arg14[%c0_91, %c0_92, %c0_93] : memref<1x1x32xf32, #tpu.memory_space<vmem>>, vector<1x1x32xf32>
    %172 = vector.shape_cast %171 : vector<1x1x32xf32> to vector<1x32xf32>
    %173 = vector.broadcast %172 : vector<1x32xf32> to vector<8x32xf32>
    %174 = arith.addf %170, %173 : vector<8x32xf32>
    %175 = arith.addf %174, %126 : vector<8x32xf32>
    %c0_94 = arith.constant 0 : index
    %c0_95 = arith.constant 0 : index
    %c0_96 = arith.constant 0 : index
    %176 = vector.load %arg15[%c0_94, %c0_95, %c0_96] : memref<1x8x32xf32, #tpu.memory_space<vmem>>, vector<1x8x32xf32>
    %177 = vector.shape_cast %176 : vector<1x8x32xf32> to vector<8x32xf32>
    %178 = vector.shape_cast %175 : vector<8x32xf32> to vector<1x8x32xf32>
    tpu.vector_store %arg15[%c0_94, %c0_95, %c0_96], %178 {strides = array<i32>} : memref<1x8x32xf32, #tpu.memory_space<vmem>>, vector<1x8x32xf32>,
    return
  }
  func.func @transform_0(%arg0: i32, %arg1: i32) -> (i32, i32, i32) {
    %c0_i32 = arith.constant 0 : i32
    %c0_i32_0 = arith.constant 0 : i32
    %c0_i32_1 = arith.constant 0 : i32
    return %arg0, %c0_i32, %c0_i32_0 : i32, i32, i32
  }
  func.func @transform_1(%arg0: i32, %arg1: i32) -> (i32, i32, i32) {
    %c0_i32 = arith.constant 0 : i32
    %c0_i32_0 = arith.constant 0 : i32
    %c0_i32_1 = arith.constant 0 : i32
    return %arg1, %c0_i32, %c0_i32_0 : i32, i32, i32
  }
  func.func @transform_2(%arg0: i32, %arg1: i32) -> (i32, i32, i32) {
    %c0_i32 = arith.constant 0 : i32
    %c0_i32_0 = arith.constant 0 : i32
    %c0_i32_1 = arith.constant 0 : i32
    return %arg1, %c0_i32, %c0_i32_0 : i32, i32, i32
  }
  func.func @transform_3(%arg0: i32, %arg1: i32) -> (i32, i32, i32) {
    %c0_i32 = arith.constant 0 : i32
    %c0_i32_0 = arith.constant 0 : i32
    %c0_i32_1 = arith.constant 0 : i32
    return %arg1, %c0_i32, %c0_i32_0 : i32, i32, i32
  }
  func.func @transform_4(%arg0: i32, %arg1: i32) -> (i32, i32, i32) {
    %c0_i32 = arith.constant 0 : i32
    %c0_i32_0 = arith.constant 0 : i32
    %c0_i32_1 = arith.constant 0 : i32
    return %arg1, %c0_i32, %c0_i32_0 : i32, i32, i32
  }
  func.func @transform_5(%arg0: i32, %arg1: i32) -> (i32, i32, i32) {
    %c0_i32 = arith.constant 0 : i32
    %c0_i32_0 = arith.constant 0 : i32
    %c0_i32_1 = arith.constant 0 : i32
    return %arg1, %c0_i32, %c0_i32_0 : i32, i32, i32
  }
  func.func @transform_6(%arg0: i32, %arg1: i32) -> (i32, i32, i32) {
    %c0_i32 = arith.constant 0 : i32
    %c0_i32_0 = arith.constant 0 : i32
    %c0_i32_1 = arith.constant 0 : i32
    return %arg1, %c0_i32, %c0_i32_0 : i32, i32, i32
  }
  func.func @transform_7(%arg0: i32, %arg1: i32) -> (i32, i32, i32) {
    %c0_i32 = arith.constant 0 : i32
    %c0_i32_0 = arith.constant 0 : i32
    %c0_i32_1 = arith.constant 0 : i32
    return %arg1, %c0_i32, %c0_i32_0 : i32, i32, i32
  }
  func.func @transform_8(%arg0: i32, %arg1: i32) -> (i32, i32, i32) {
    %c0_i32 = arith.constant 0 : i32
    %c0_i32_0 = arith.constant 0 : i32
    %c0_i32_1 = arith.constant 0 : i32
    return %arg1, %c0_i32, %c0_i32_0 : i32, i32, i32
  }
  func.func @transform_9(%arg0: i32, %arg1: i32) -> (i32, i32, i32) {
    %c0_i32 = arith.constant 0 : i32
    %c0_i32_0 = arith.constant 0 : i32
    %c0_i32_1 = arith.constant 0 : i32
    return %arg1, %c0_i32, %c0_i32_0 : i32, i32, i32
  }
  func.func @transform_10(%arg0: i32, %arg1: i32) -> (i32, i32, i32) {
    %c0_i32 = arith.constant 0 : i32
    %c0_i32_0 = arith.constant 0 : i32
    %c0_i32_1 = arith.constant 0 : i32
    return %arg1, %c0_i32, %c0_i32_0 : i32, i32, i32
  }
  func.func @transform_11(%arg0: i32, %arg1: i32) -> (i32, i32, i32) {
    %c0_i32 = arith.constant 0 : i32
    %c0_i32_0 = arith.constant 0 : i32
    %c0_i32_1 = arith.constant 0 : i32
    return %arg1, %c0_i32, %c0_i32_0 : i32, i32, i32
  }
  func.func @transform_12(%arg0: i32, %arg1: i32) -> (i32, i32, i32) {
    %c0_i32 = arith.constant 0 : i32
    %c0_i32_0 = arith.constant 0 : i32
    %c0_i32_1 = arith.constant 0 : i32
    return %arg1, %c0_i32, %c0_i32_0 : i32, i32, i32
  }
  func.func @transform_13(%arg0: i32, %arg1: i32) -> (i32, i32, i32) {
    %c0_i32 = arith.constant 0 : i32
    %c0_i32_0 = arith.constant 0 : i32
    %c0_i32_1 = arith.constant 0 : i32
    return %arg0, %c0_i32, %c0_i32_0 : i32, i32, i32
  }
}

</mosaic_0001>

<bundles_post_ra>
// kernel: frozen_clip_image_embedder.3
= control target key start
LH: loop header
LB: loop body
LE: loop exit
PB: predicated region body
PF: predicated region fallthrough
CT: control target
= control target key end

     0   :  { %10 = vsyncpa [#allocation3], 0  ;;  %s803_s0 = inlined_call_operand.vmem [shape: f32[2,8,192], index: 0, kind: input, shape index: {}]   ;;  %s804_s1 = inlined_call_operand.vmem [shape: bf16[192,32], index: 1, kind: input, shape index: {}]   ;;  %s805_s2 = inlined_call_operand.vmem [shape: f32[8,32], index: 2, kind: input, shape index: {}]   ;;  %s806_s3 = inlined_call_operand.vmem [shape: f32[1,32], index: 3, kind: input, shape index: {}]   ;;  %s807_s4 = inlined_call_operand.vmem [shape: f32[1,32], index: 4, kind: input, shape index: {}]   ;;  %s808_s5 = inlined_call_operand.hbm [shape: f32[2,8,32], index: 5, kind: output, shape index: {}]  }
   0x1   :  { %12 = vsyncpa [#allocation3 + $0x1], 0  ;;  %s651_s18 = smov 0   ;;  %s653_s19 = smov 0  }
   0x2   :  { %s655_s20 = smov 0   ;;  %s657_s21 = smov 0  }
   0x3 LB: > { %s672_s22 = sadd.s32 4294967295, %s617_s21   ;;  %s474_s23 = sadd.s32 4294967294, %s617_s21   ;;  %s617_s21 = sphi %s657_s21, %s814_s21   ;;  %s613_s20 = sphi %s655_s20, %s813_s20   ;;  %s609_s19 = sphi %s653_s19, %s812_s19   ;;  %s605_s18 = sphi %s651_s18, %s811_s18  }
   0x4   : > { %s676_s24 = sadd.s32 1, %s617_s21   ;;  %s135_s25 = sadd.s32 1, %s613_s20 }
   0x5   : > { %s132_s26 = ssub.s32 %s617_s21, %s676_s24  ;;  %p145_p0 = scmp.ne.s32.totalorder %s613_s20, %s609_s19 }
   0x6   : > { %p133_p1 = scmp.eq.s32.totalorder %s132_s26, 0  ;;  %p146_p2 = scmp.eq.s32.totalorder %s672_s22, 1 }
   0x7   : > { %p151_p3 = scmp.ne.s32.totalorder %s609_s19, %s605_s18  ;;  %p152_p4 = scmp.eq.s32.totalorder %s474_s23, 1 }
   0x8   : > { %s687_s27 = scalar_select %p133_p1, %s613_s20, %s135_s25  }
   0x9   : > { %p689_p5 = por %p146_p2, %p145_p0  ;;  %p693_p6 = por %p152_p4, %p151_p3 }
   0xa   : > { %p477_p7 = scmp.ge.s32.totalorder %s617_s21, 1  ;;  %p190_p8 = scmp.lt.s32.totalorder %s617_s21, 3 }
   0xc   : > { %p191_p9 = pnand %p477_p7, %p190_p8 }
   0xd   : > { %v541_v0 = vld [vmem:[%s804_s1] sm:$0xff] (!%p191_p9)   ;;  %v619_v1 = vmov (!%p191_p9), 0   ;;  %p218_p10 = scmp.lt.s32.totalorder (!%p191_p9), %s672_s22, 1  ;;  %v542_v2 = vld [vmem:[%s804_s1 + $0x8] sm:$0xff] (!%p191_p9)   ;;  %v543_v3 = vld [vmem:[%s804_s1 + $0x10] sm:$0xff] (!%p191_p9)   ;;  %vm325_vm0 = vcmask (!%p191_p9), 523264  }
   0xe   : > { %194 = sbr.rel (%p191_p9) target bundleno = 603 (0x25b), region = 40  ;;  %329 = vmatprep.subr.bf16.mxu0 (!%p191_p9), %v619_v1  ;;  %v544_v4 = vld [vmem:[%s804_s1 + $0x18] sm:$0xff] (!%p191_p9)   ;;  %v545_v7 = vld [vmem:[%s804_s1 + $0x20] sm:$0xff] (!%p191_p9)   ;;  %v546_v8 = vld [vmem:[%s804_s1 + $0x28] sm:$0xff] (!%p191_p9)   ;;  %vm371_vm1 = vcmask (!%p191_p9), 261120   ;;  %s497_s10 = sshll.u32 (!%p191_p9), %s672_s22, 7 }
   0xf   : > { %330 = vmatpush1.bf16.msra.mxu0 (!%p191_p9), %v541_v0  ;;  %v547_v9 = vld [vmem:[%s804_s1 + $0x30] sm:$0xff] (!%p191_p9)   ;;  %v548_v10 = vld [vmem:[%s804_s1 + $0x38] sm:$0xff] (!%p191_p9)   ;;  %v549_v11 = vld [vmem:[%s804_s1 + $0x40] sm:$0xff] (!%p191_p9)   ;;  %s760_s16 = scalar_lea.hbm (!%p191_p9), %s808_s5, %s497_s10 }
  0x10   : > { %331 = vmatprep.subr.bf16.mxu0 (!%p191_p9), %v619_v1  ;;  %v550_v12 = vld [vmem:[%s804_s1 + $0x48] sm:$0xff] (!%p191_p9)   ;;  %v551_v13 = vld [vmem:[%s804_s1 + $0x50] sm:$0xff] (!%p191_p9)   ;;  %v552_v14 = vld [vmem:[%s804_s1 + $0x58] sm:$0xff] (!%p191_p9)  }
  0x11   : > { %v252_v17 = vld [vmem:[%s805_s2] sm:$0xff] (!%p191_p9) }
  0x12   : > { %v494_v33 = vld [vmem:[%s806_s3] ss:$0 sm:$0xff] (!%p191_p9) }
  0x13   : > { %332 = vmatpush1.bf16.msra.mxu0 (!%p191_p9), %v542_v2  ;;  %v495_v35 = vld [vmem:[%s807_s4] ss:$0 sm:$0xff] (!%p191_p9) }
  0x14   : > { %333 = vmatprep.subr.bf16.mxu0 (!%p191_p9), %v619_v1 }
  0x15   : > { %s219_s9 = scalar_select %p218_p10, %s672_s22, 1 }
  0x16   : > { %s620_s22 = smov [#allocation2]  }
  0x17   : > { %s500_s12 = sshll.u32 %s219_s9, 4  ;;  %334 = vmatpush1.bf16.msra.mxu0 %v543_v3  ;;  %s559_s25 = sshll.u32 %s620_s22, 4  ;;  %s560_s25 = int_to_ptr.vmem [resolvable:$false] %s559_s25 }
  0x18   : > { %s713_s15 = scalar_lea.vmem %s803_s0, %s500_s12  ;;  %335 = vmatprep.subr.bf16.mxu0 %v619_v1  ;;  %s561_s26 = scalar_lea.vmem %s560_s25, 256 }
  0x19   : > { %v225_v5 = vld [vmem:[%s713_s15 + $0x8] sm:$0xff]  ;;  %v224_v15 = vld [vmem:[%s713_s15] sm:$0xff]  ;;  %s215_s15 = sand.u32 1, %s609_s19  }
  0x1a   : > { %v251_v6 = vpack.c.bf16 %v225_v5, %v225_v5  ;;  %v250_v16 = vpack.c.bf16 %v224_v15, %v224_v15  ;;  %s478_s30 = sshll.u32 %s215_s15, 3  ;;  %s402_s17 = scalar_lea.sflag [#allocation3], %s215_s15 }
  0x1b   : > { %336 = vmatpush1.bf16.msra.mxu0 %v544_v4  ;;  %s217_s11 = scalar_lea.vmem [#allocation2], %s478_s30 }
  0x1c   : > { %337 = vmatprep.subr.bf16.mxu0 %v619_v1  ;;  %493 = vmatprep.mubr.msk.bf16.mxu0 %vm325_vm0, %v251_v6  ;;  %s415_s12 = sshll.u32 %s217_s11, 4  ;;  %s762_s12 = int_to_ptr.vmem [resolvable:$true] %s415_s12 }
  0x1d   : > { %s555_s23 = scalar_lea.vmem %s762_s12, 128  ;;  %p562_p0 = scmp.lt.s32.totalorder %s762_s12, %s560_s25 }
  0x1e   : > { %p556_p11 = scmp.ne.s32.totalorder %s762_s12, %s555_s23  ;;  %p563_p1 = scmp.lt.s32.totalorder %s561_s26, %s555_s23 }
  0x1f   : > { %338 = vmatpush1.bf16.msra.mxu0 %v545_v7 }
  0x20   : > { %339 = vmatprep.subr.bf16.mxu0 %v619_v1  ;;  %p557_p12 = pnand %p556_p11, %p689_p5  ;;  %p564_p2 = por %p563_p1, %p562_p0 }
  0x22   : > { %p558_p13 = pneg %p557_p12 }
  0x23   : > { %340 = vmatpush1.bf16.msra.mxu0 %v546_v8 }
  0x24   : > { %341 = vmatprep.subr.bf16.mxu0 %v619_v1  ;;  %p565_p3 = pnand %p564_p2, %p558_p13 }
  0x27   : > { %342 = vmatpush1.bf16.msra.mxu0 %v547_v9 }
  0x28   : > { %343 = vmatprep.subr.bf16.mxu0 %v619_v1 }
  0x2b   : > { %344 = vmatpush1.bf16.msra.mxu0 %v548_v10 }
  0x2c   : > { %345 = vmatprep.subr.bf16.mxu0 %v619_v1 }
  0x2f   : > { %346 = vmatpush1.bf16.msra.mxu0 %v549_v11 }
  0x30   : > { %347 = vmatprep.subr.bf16.mxu0 %v619_v1 }
  0x33   : > { %348 = vmatpush1.bf16.msra.mxu0 %v550_v12 }
  0x34   : > { %349 = vmatprep.subr.bf16.mxu0 %v619_v1 }
  0x37   : > { %350 = vmatpush1.bf16.msra.mxu0 %v551_v13 }
  0x38   : > { %351 = vmatprep.subr.bf16.mxu0 %v619_v1 }
  0x3b   : > { %352 = vmatpush1.bf16.msra.mxu0 %v552_v14 }
  0x3e   : > { %362 = vmatmul.mubr.bf16.vlgmr.msra.gmra.mrb[0].mxu0 %v250_v16 }
 0x111   : > { %v363_v18 = vpop.f32.mrb[0].mxu0 }
 0x112   : > { %v364_v19 = vadd.f32 %v363_v18, %v252_v17  ;;  %v365_v20 = vpop.f32.mrb[1].mxu0 }
 0x113   : > { %v366_v21 = vpop.f32.mrb[2].mxu0 }
 0x114   : > { %v367_v22 = vpop.f32.mrb[3].mxu0  ;;  %v372_v23 = vsel %vm371_vm1, %v364_v19, 0.0 }
 0x115   : > { %373 = vadd.xlane.f32.xlu0 %v372_v23 }
 0x1a2   : > { %v374_v24 = vpop.xlane.xlu0 %373 }
 0x1a3   : > { %v376_v25 = vmul.f32 0.03125, %v374_v24 }
 0x1a5   : > { %v377_v26 = vsub.f32 %v364_v19, %v376_v25 }
 0x1a7   : > { %v378_v27 = vmul.f32 %v377_v26, %v377_v26 }
 0x1a9   : > { %v379_v28 = vsel %vm371_vm1, %v378_v27, 0.0 }
 0x1aa   : > { %380 = vadd.xlane.f32.xlu0 %v379_v28 }
 0x237   : > { %v381_v29 = vpop.xlane.xlu0 %380 }
 0x238   : > { %v382_v30 = vmul.f32 0.03125, %v381_v29 }
 0x23a   : > { %v383_v31 = vadd.f32 1e-05, %v382_v30 }
 0x23c   : > { %553 = vrsqrt.f32 %v383_v31 }
 0x246   : > { %v554_v32 = vpop.eup %553 }
 0x247   : > { %v385_v34 = vmul.f32 %v554_v32, %v377_v26 }
 0x249   : > { %v392_v36 = vmul.f32 %v494_v33, %v385_v34 }
 0x24b   : > { %v399_v37 = vadd.f32 %v495_v35, %v392_v36 }
 0x24d   : > { %400 = vst.msk [vmem:[%s217_s11] sm:$0xff] %vm371_vm1, %v399_v37 }
 0x24e   : > { %568 = shalt.err (!%p565_p3)
}
 0x24f   : > { %s569_s15 = scalar_lea.hbm %s760_s16, 128  ;;  %s573_s7 = scalar_lea.hbm %s808_s5, 256 }
 0x250   : > { %p570_p4 = scmp.ne.s32.totalorder %s760_s16, %s569_s15  ;;  %p574_p9 = scmp.lt.u32.totalorder %s760_s16, %s808_s5 }
 0x251   : > { %p575_p10 = scmp.lt.u32.totalorder %s573_s7, %s569_s15  ;;  %p577_p12 = scmp.lt.u32.totalorder %s569_s15, %s760_s16 }
 0x252   : > { %p571_p7 = pnand %p570_p4, %p689_p5 }
 0x253   : > { %p576_p11 = por %p575_p10, %p574_p9 }
 0x254   : > { %p572_p8 = pneg %p571_p7 }
 0x255   : > { %p578_p13 = por %p577_p12, %p576_p11 }
 0x257   : > { %p579_p0 = pnand %p578_p13, %p572_p8 }
 0x259   : > { %582 = shalt.err (!%p579_p0)
}
 0x25a   : > { %501 = dma.vmem_to_hbm [thread:$0]  (%p689_p5), %s762_s12, 128, %s760_s16, %s402_s17  }
 0x25b PF: > { %p507_p1 = scmp.ge.s32.totalorder %s617_s21, 2  ;;  %s427_s10 = sand.u32 1, %s605_s18  }
 0x25c   : > { %s428_s11 = scalar_lea.sflag [#allocation3], %s427_s10 }
 0x25d   : > { %p504_p2 = pnand %p507_p1, %p693_p6 }
 0x25f   : > { %600 = dma.done.wait (!%p504_p2), %s428_s11, 128  }
 0x260   : > { %602 = vsyncadd (!%p504_p2), %s428_s11, 4294967168  ;;  %p15_p3 = scmp.ge.s32.totalorder %s676_s24, 4   ;;  %s811_s18 = smov %s609_s19 }
 0x261   : > { %s812_s19 = smov %s613_s20  ;;  %s813_s20 = smov %s687_s27 }
 0x262   : > { %s814_s21 = smov %s676_s24  ;;  %17 = sbr.rel (!%p15_p3) target bundleno = 3 (0x3), region = 75 }
 0x269   :  { %433 = vsyncpa [#allocation3], 1 }
 0x26a   :  { %435 = vsyncpa [#allocation3 + $0x1], 1 }

// kernel: frozen_clip_image_embedder.5
= control target key start
LH: loop header
LB: loop body
LE: loop exit
PB: predicated region body
PF: predicated region fallthrough
CT: control target
= control target key end

     0   :  { %s3541_s0 = inlined_call_operand.hbm [shape: f32[2,32], index: 0, kind: input, shape index: {}]   ;;  %s3542_s1 = inlined_call_operand.hbm [shape: f32[1,32], index: 1, kind: input, shape index: {}]   ;;  %s3543_s2 = inlined_call_operand.hbm [shape: f32[1,32], index: 2, kind: input, shape index: {}]   ;;  %s3544_s3 = inlined_call_operand.hbm [shape: f32[5,1,32], index: 3, kind: input, shape index: {}]   ;;  %s3545_s4 = inlined_call_operand.hbm [shape: f32[5,1,32], index: 4, kind: input, shape index: {}]   ;;  %s3546_s5 = inlined_call_operand.hbm [shape: bf16[5,32,32], index: 5, kind: input, shape index: {}]   ;;  %s3547_s6 = inlined_call_operand.hbm [shape: f32[5,1,32], index: 6, kind: input, shape index: {}]   ;;  %s3548_s7 = inlined_call_operand.hbm [shape: bf16[5,32,32], index: 7, kind: input, shape index: {}]   ;;  %s3549_s8 = inlined_call_operand.hbm [shape: f32[5,1,32], index: 8, kind: input, shape index: {}]   ;;  %s3550_s9 = inlined_call_operand.hbm [shape: f32[5,1,32], index: 9, kind: input, shape index: {}]   ;;  %s3551_s10 = inlined_call_operand.hbm [shape: f32[5,1,32], index: 10, kind: input, shape index: {}]   ;;  %s3552_s11 = inlined_call_operand.hbm [shape: bf16[5,32,128], index: 11, kind: input, shape index: {}]   ;;  %s3553_s12 = inlined_call_operand.hbm [shape: f32[5,1,128], index: 12, kind: input, shape index: {}]   ;;  %s3554_s13 = inlined_call_operand.hbm [shape: bf16[5,128,32], index: 13, kind: input, shape index: {}]   ;;  %s3555_s14 = inlined_call_operand.hbm [shape: f32[5,1,32], index: 14, kind: input, shape index: {}]   ;;  %s3556_s15 = inlined_call_operand.hbm [shape: f32[1,32], index: 15, kind: input, shape index: {}]   ;;  %s3557_s16 = inlined_call_operand.hbm [shape: f32[1,32], index: 16, kind: input, shape index: {}]   ;;  %s3558_s17 = inlined_call_operand.hbm [shape: f32[2,32], index: 17, kind: output, shape index: {}]  }
   0x1   :  { %3595 = sst [smem:[#allocation47_spill]] %s3541_s0 }
   0x2   :  { %3596 = sst [smem:[#allocation48_spill]] %s3542_s1 }
   0x3   :  { %3597 = sst [smem:[#allocation49_spill]] %s3544_s3 }
   0x4   :  { %3598 = sst [smem:[#allocation50_spill]] %s3546_s5 }
   0x5   :  { %3599 = sst [smem:[#allocation51_spill]] %s3548_s7 }
   0x6   :  { %3600 = sst [smem:[#allocation52_spill]] %s3550_s9 }
   0x7   :  { %3601 = sst [smem:[#allocation53_spill]] %s3551_s10 }
   0x8   :  { %3602 = sst [smem:[#allocation54_spill]] %s3553_s12 }
   0x9   :  { %3603 = sst [smem:[#allocation55_spill]] %s3555_s14 }
   0xa   :  { %3604 = sst [smem:[#allocation56_spill]] %s3556_s15 }
   0xb   :  { %3605 = sst [smem:[#allocation57_spill]] %s3558_s17 }
   0xc   :  { %22 = vsyncpa [#allocation3], 0 }
   0xd   :  { %23 = vsyncpa [#allocation6], 0 }
   0xe   :  { %24 = vsyncpa [#allocation9], 0 }
   0xf   :  { %26 = vsyncpa [#allocation9 + $0x1], 0 }
  0x10   :  { %27 = vsyncpa [#allocation12], 0 }
  0x11   :  { %29 = vsyncpa [#allocation12 + $0x1], 0 }
  0x12   :  { %30 = vsyncpa [#allocation15], 0 }
  0x13   :  { %32 = vsyncpa [#allocation15 + $0x1], 0 }
  0x14   :  { %33 = vsyncpa [#allocation18], 0 }
  0x15   :  { %35 = vsyncpa [#allocation18 + $0x1], 0 }
  0x16   :  { %36 = vsyncpa [#allocation21], 0 }
  0x17   :  { %38 = vsyncpa [#allocation21 + $0x1], 0 }
  0x18   :  { %39 = vsyncpa [#allocation24], 0 }
  0x19   :  { %41 = vsyncpa [#allocation24 + $0x1], 0 }
  0x1a   :  { %42 = vsyncpa [#allocation27], 0 }
  0x1b   :  { %43 = vsyncpa [#allocation4], 0  ;;  %s2803_s24 = smov 0   ;;  %s2805_s25 = smov 0  }
  0x1c   :  { %s2807_s26 = smov 0   ;;  %s2809_s27 = smov 0  }
  0x1d LB: > { %3606 = sst [smem:[#allocation40_spill]] %s2681_s25  ;;  %s2822_s28 = sadd.s32 4294967295, %s2689_s27   ;;  %s2689_s27 = sphi %s2809_s27, %s3666_s27   ;;  %s2685_s26 = sphi %s2807_s26, %s3669_s26   ;;  %s2681_s25 = sphi %s2805_s25, %s3668_s25   ;;  %s2677_s24 = sphi %s2803_s24, %s3667_s24  }
  0x1e   : > { %3607 = sst [smem:[#allocation41_spill]] %s2685_s26  ;;  %s2825_s29 = sadd.s32 1, %s2689_s27  }
  0x1f   : > { %3608 = sst [smem:[#allocation42_spill]] %s2822_s28  ;;  %s116_s0 = ssub.s32 %s2689_s27, %s2825_s29 }
  0x20   : > { %3609 = sst [smem:[#allocation43_spill]] %s2825_s29  ;;  %s119_s30 = sadd.s32 1, %s2685_s26 }
  0x21   : > { %p117_p0 = scmp.eq.s32.totalorder %s116_s0, 0  ;;  %p126_p1 = scmp.ne.s32.totalorder %s2685_s26, %s2681_s25 }
  0x22   : > { %p127_p2 = scmp.eq.s32.totalorder %s2689_s27, 0  ;;  %p132_p3 = scmp.ne.s32.totalorder %s2681_s25, %s2677_s24 }
  0x23   : > { %s2835_s18 = scalar_select %p117_p0, %s2685_s26, %s119_s30  }
  0x24   : > { %p2837_p4 = por %p127_p2, %p126_p1  ;;  %p3571_p5 = scmp.eq.s32.totalorder %s2822_s28, 0 }
  0x25   : > { %3610 = sst [smem:[#allocation44_spill]] %s2835_s18  ;;  %p1774_p6 = scmp.ge.s32.totalorder %s2689_s27, 1 }
  0x26   : > { %p492_p7 = scmp.lt.s32.totalorder %s2689_s27, 6  ;;  %p2846_p8 = por %p3571_p5, %p132_p3 }
  0x27   : > { %s2691_s21 = smov [#allocation5]   ;;  %p2019_p12 = scmp.lt.s32.totalorder %s2689_s27, 5 }
  0x28   : > { %s3612_s1 = scalar_select %p2846_p8, 1, 0 }
  0x29   : > { %p2851_p10 = pnand %p1774_p6, %p492_p7  ;;  %s516_s22 = sshll.u32 %s2691_s21, 4  ;;  %s517_s22 = int_to_ptr.vmem [resolvable:$true] %s516_s22 }
  0x2a   : > { %3613 = sst [smem:[#allocation45_spill]] %s3612_s1  ;;  %s2692_s24 = smov [#allocation26]  }
  0x2b   : > { %s3614_s20 = scalar_select %p2851_p10, 1, 0 }
  0x2c   : > { %p1961_p11 = pneg %p2851_p10  ;;  %s538_s0 = sshll.u32 %s2692_s24, 4  ;;  %s2870_s0 = int_to_ptr.vmem [resolvable:$true] %s538_s0 }
  0x2d   : > { %3615 = sst [smem:[#allocation46_spill]] %s3614_s20  ;;  %p2866_p0 = pnand %p2019_p12, %p2837_p4 }
  0x2e   : > { %p2860_p13 = pnand %p1961_p11, %p3571_p5  ;;  %s2873_s21 = sand.u32 1, %s2689_s27  }
  0x2f   : > { %s3617_s30 = scalar_select %p2866_p0, 1, 0 }
  0x30   : > { %s3616_s23 = scalar_select %p2860_p13, 1, 0 }
  0x31   : > { %s3618_s17 = sld [smem:[#allocation48_spill]]  ;;  %p2883_p2 = pneg %p2860_p13 }
  0x33   : > { %s3619_s24 = scalar_select %p2883_p2, 1, 0 }
  0x37   : > { %s2093_s1 = scalar_lea.hbm %s3618_s17, 16 }
  0x38   : > { %p2094_p1 = scmp.ne.s32.totalorder %s3618_s17, %s2093_s1  ;;  %p2100_p6 = scmp.lt.u32.totalorder %s2093_s1, %s3618_s17 }
  0x3a   : > { %p2096_p3 = pnand %p2883_p2, %p2094_p1 }
  0x3c   : > { %p2097_p4 = pneg %p2096_p3 }
  0x3e   : > { %p2102_p7 = pnand %p2100_p6, %p2097_p4 }
  0x40   : > { %2105 = shalt.err (!%p2102_p7)
}
  0x41   : > { %s2106_s29 = scalar_lea.vmem %s517_s22, 16  ;;  %s2113_s25 = scalar_lea.vmem %s517_s22, 32 }
  0x42   : > { %p2107_p11 = scmp.ne.s32.totalorder %s517_s22, %s2106_s29  ;;  %p2114_p5 = scmp.lt.s32.totalorder %s517_s22, %s517_s22 }
  0x43   : > { %p2115_p8 = scmp.lt.s32.totalorder %s2113_s25, %s2106_s29 }
  0x44   : > { %p2109_p12 = pnand %p2107_p11, %p2883_p2 }
  0x45   : > { %p2116_p10 = por %p2115_p8, %p2114_p5 }
  0x46   : > { %p2110_p9 = pneg %p2109_p12 }
  0x48   : > { %p2117_p0 = pnand %p2116_p10, %p2110_p9 }
  0x4a   : > { %2120 = shalt.err (!%p2117_p0)
}
  0x4b   : > { %1967 = dma.hbm_to_vmem [thread:$0]  (!%p2860_p13), %s3618_s17, 16, %s517_s22, [#allocation6]  }
  0x4c   : > { %s3620_s15 = sld [smem:[#allocation56_spill]] }
  0x52   : > { %s2121_s19 = scalar_lea.hbm %s3620_s15, 16 }
  0x53   : > { %p2122_p1 = scmp.ne.s32.totalorder %s3620_s15, %s2121_s19  ;;  %p2128_p8 = scmp.lt.u32.totalorder %s2121_s19, %s3620_s15 }
  0x55   : > { %p2124_p3 = pnand %p2122_p1, %p2883_p2 }
  0x57   : > { %p2125_p5 = pneg %p2124_p3 }
  0x59   : > { %p2130_p9 = pnand %p2128_p8, %p2125_p5 }
  0x5b   : > { %2133 = shalt.err (!%p2130_p9)
}
  0x5c   : > { %s2134_s22 = scalar_lea.vmem %s2870_s0, 16  ;;  %s2141_s12 = scalar_lea.vmem %s2870_s0, 32 }
  0x5d   : > { %p2135_p10 = scmp.ne.s32.totalorder %s2870_s0, %s2134_s22  ;;  %p2142_p6 = scmp.lt.s32.totalorder %s2870_s0, %s2870_s0 }
  0x5e   : > { %p2143_p7 = scmp.lt.s32.totalorder %s2141_s12, %s2134_s22 }
  0x5f   : > { %p2137_p0 = pnand %p2135_p10, %p2883_p2 }
  0x60   : > { %p2144_p11 = por %p2143_p7, %p2142_p6 }
  0x61   : > { %p2138_p4 = pneg %p2137_p0 }
  0x63   : > { %p2145_p12 = pnand %p2144_p11, %p2138_p4 }
  0x65   : > { %2148 = shalt.err (!%p2145_p12)
}
  0x66   : > { %1973 = dma.hbm_to_vmem [thread:$0]  (!%p2860_p13), %s3620_s15, 16, %s2870_s0, [#allocation27]  }
  0x67   : > { %s2924_s18 = sand.u32 1, %s2685_s26   ;;  %s2927_s1 = sshll.u32 %s2689_s27, 4 }
  0x68   : > { %s3621_s3 = sld [smem:[#allocation49_spill]]  ;;  %s563_s25 = scalar_lea.vmem [#allocation8], %s2924_s18 }
  0x69   : > { %s570_s22 = sshll.u32 %s563_s25, 4  ;;  %s2939_s0 = sshll.u32 %s2924_s18, 4  ;;  %s2936_s22 = int_to_ptr.vmem [resolvable:$true] %s570_s22 }
  0x6a   : > { %p3622_p3 = scmp.ne.s32.totalorder %s3617_s30, 0 }
  0x6c   : > { %p2946_p5 = pneg %p3622_p3 }
  0x6e   : > { %s2933_s29 = scalar_lea.hbm %s3621_s3, %s2927_s1  ;;  %s2154_s25 = scalar_lea.hbm %s3621_s3, 80 }
  0x6f   : > { %s2149_s14 = scalar_lea.hbm %s2933_s29, 16  ;;  %p2155_p10 = scmp.lt.u32.totalorder %s2933_s29, %s3621_s3 }
  0x70   : > { %p2150_p1 = scmp.ne.s32.totalorder %s2933_s29, %s2149_s14  ;;  %p2156_p0 = scmp.lt.u32.totalorder %s2154_s25, %s2149_s14 }
  0x71   : > { %s3623_s28 = scalar_select %p2946_p5, 1, 0 }
  0x72   : > { %p2152_p8 = pnand %p2946_p5, %p2150_p1  ;;  %p2157_p4 = por %p2156_p0, %p2155_p10 }
  0x73   : > { %p2158_p6 = scmp.lt.u32.totalorder %s2149_s14, %s2933_s29 }
  0x74   : > { %p2153_p9 = pneg %p2152_p8 }
  0x75   : > { %p2159_p7 = por %p2158_p6, %p2157_p4 }
  0x77   : > { %p2160_p11 = pnand %p2159_p7, %p2153_p9 }
  0x79   : > { %2163 = shalt.err (!%p2160_p11)
}
  0x7a   : > { %s2164_s12 = scalar_lea.vmem %s2936_s22, 16  ;;  %s2693_s20 = smov [#allocation8]  }
  0x7b   : > { %p2165_p12 = scmp.ne.s32.totalorder %s2936_s22, %s2164_s12  ;;  %s2169_s19 = sshll.u32 %s2693_s20, 4  ;;  %s2170_s19 = int_to_ptr.vmem [resolvable:$false] %s2169_s19 }
  0x7c   : > { %s2171_s15 = scalar_lea.vmem %s2170_s19, 32  ;;  %p2172_p13 = scmp.lt.s32.totalorder %s2936_s22, %s2170_s19 }
  0x7d   : > { %p2167_p1 = pnand %p2165_p12, %p2946_p5  ;;  %p2173_p2 = scmp.lt.s32.totalorder %s2171_s15, %s2164_s12 }
  0x7f   : > { %p2168_p8 = pneg %p2167_p1  ;;  %p2174_p10 = por %p2173_p2, %p2172_p13 }
  0x81   : > { %p2175_p0 = pnand %p2174_p10, %p2168_p8 }
  0x83   : > { %2178 = shalt.err (!%p2175_p0)
}
  0x84   : > { %s3624_s17 = scalar_lea.sflag [#allocation9], %s2873_s21  ;;  %s2972_s14 = sshll.u32 %s2689_s27, 8 }
  0x85   : > { %1980 = dma.hbm_to_vmem [thread:$0]  (!%p3622_p3), %s2933_s29, 16, %s2936_s22, %s3624_s17  }
  0x86   : > { %s3625_s5 = sld [smem:[#allocation50_spill]]  ;;  %s598_s19 = scalar_lea.vmem [#allocation11], %s2939_s0 }
  0x87   : > { %s605_s15 = sshll.u32 %s598_s19, 4  ;;  %s3584_s3 = scalar_lea.sflag [#allocation12], %s2873_s21  ;;  %s2981_s15 = int_to_ptr.vmem [resolvable:$true] %s605_s15 }
  0x8c   : > { %s2978_s12 = scalar_lea.hbm %s3625_s5, %s2972_s14  ;;  %s2184_s17 = scalar_lea.hbm %s3625_s5, 1280 }
  0x8d   : > { %s2179_s26 = scalar_lea.hbm %s2978_s12, 256  ;;  %p2185_p4 = scmp.lt.u32.totalorder %s2978_s12, %s3625_s5 }
  0x8e   : > { %p2180_p13 = scmp.ne.s32.totalorder %s2978_s12, %s2179_s26  ;;  %p2186_p6 = scmp.lt.u32.totalorder %s2184_s17, %s2179_s26 }
  0x8f   : > { %p2188_p11 = scmp.lt.u32.totalorder %s2179_s26, %s2978_s12 }
  0x90   : > { %p2182_p2 = pnand %p2180_p13, %p2946_p5  ;;  %p2187_p7 = por %p2186_p6, %p2185_p4 }
  0x92   : > { %p2183_p9 = pneg %p2182_p2  ;;  %p2189_p12 = por %p2188_p11, %p2187_p7 }
  0x94   : > { %p2190_p1 = pnand %p2189_p12, %p2183_p9 }
  0x96   : > { %2193 = shalt.err (!%p2190_p1)
}
  0x97   : > { %s2194_s19 = scalar_lea.vmem %s2981_s15, 256  ;;  %s2694_s29 = smov [#allocation11]  }
  0x98   : > { %p2195_p8 = scmp.ne.s32.totalorder %s2981_s15, %s2194_s19  ;;  %s2199_s22 = sshll.u32 %s2694_s29, 4  ;;  %s2200_s22 = int_to_ptr.vmem [resolvable:$false] %s2199_s22 }
  0x99   : > { %s2201_s25 = scalar_lea.vmem %s2200_s22, 512  ;;  %p2202_p13 = scmp.lt.s32.totalorder %s2981_s15, %s2200_s22 }
  0x9a   : > { %p2197_p10 = pnand %p2195_p8, %p2946_p5  ;;  %p2203_p2 = scmp.lt.s32.totalorder %s2201_s25, %s2194_s19 }
  0x9c   : > { %p2198_p0 = pneg %p2197_p10  ;;  %p2204_p4 = por %p2203_p2, %p2202_p13 }
  0x9e   : > { %p2205_p6 = pnand %p2204_p4, %p2198_p0 }
  0xa0   : > { %2208 = shalt.err (!%p2205_p6)
}
  0xa1   : > { %s3586_s26 = smov 64   ;;  %s2696_s17 = smov 4  }
  0xa2   : > { %1986 = dma.hbm_to_vmem [thread:$0]  (!%p3622_p3), %s2978_s12, 256, %s2981_s15, %s3584_s3, %s3586_s26, %s3586_s26, %s2696_s17  }
  0xa3   : > { %s3626_s7 = sld [smem:[#allocation51_spill]]  ;;  %s636_s22 = scalar_lea.vmem [#allocation14], %s2939_s0 }
  0xa4   : > { %s643_s25 = sshll.u32 %s636_s22, 4  ;;  %s3585_s5 = scalar_lea.sflag [#allocation15], %s2873_s21  ;;  %s3017_s25 = int_to_ptr.vmem [resolvable:$true] %s643_s25 }
  0xa9   : > { %s3014_s29 = scalar_lea.hbm %s3626_s7, %s2972_s14  ;;  %s2214_s20 = scalar_lea.hbm %s3626_s7, 1280 }
  0xaa   : > { %s2209_s10 = scalar_lea.hbm %s3014_s29, 256  ;;  %p2215_p12 = scmp.lt.u32.totalorder %s3014_s29, %s3626_s7 }
  0xab   : > { %p2210_p9 = scmp.ne.s32.totalorder %s3014_s29, %s2209_s10  ;;  %p2216_p1 = scmp.lt.u32.totalorder %s2214_s20, %s2209_s10 }
  0xac   : > { %p2218_p10 = scmp.lt.u32.totalorder %s2209_s10, %s3014_s29 }
  0xad   : > { %p2212_p7 = pnand %p2210_p9, %p2946_p5  ;;  %p2217_p8 = por %p2216_p1, %p2215_p12 }
  0xaf   : > { %p2213_p11 = pneg %p2212_p7  ;;  %p2219_p0 = por %p2218_p10, %p2217_p8 }
  0xb1   : > { %p2220_p13 = pnand %p2219_p0, %p2213_p11 }
  0xb3   : > { %2223 = shalt.err (!%p2220_p13)
}
  0xb4   : > { %s2224_s22 = scalar_lea.vmem %s3017_s25, 256  ;;  %s2697_s12 = smov [#allocation14]  }
  0xb5   : > { %p2225_p2 = scmp.ne.s32.totalorder %s3017_s25, %s2224_s22  ;;  %s2229_s15 = sshll.u32 %s2697_s12, 4  ;;  %s2230_s15 = int_to_ptr.vmem [resolvable:$false] %s2229_s15 }
  0xb6   : > { %s2231_s3 = scalar_lea.vmem %s2230_s15, 512  ;;  %p2232_p9 = scmp.lt.s32.totalorder %s3017_s25, %s2230_s15 }
  0xb7   : > { %p2227_p4 = pnand %p2225_p2, %p2946_p5  ;;  %p2233_p7 = scmp.lt.s32.totalorder %s2231_s3, %s2224_s22 }
  0xb9   : > { %p2228_p6 = pneg %p2227_p4  ;;  %p2234_p12 = por %p2233_p7, %p2232_p9 }
  0xbb   : > { %p2235_p1 = pnand %p2234_p12, %p2228_p6 }
  0xbd   : > { %2238 = shalt.err (!%p2235_p1)
}
  0xbe   : > { %1992 = dma.hbm_to_vmem [thread:$0]  (!%p3622_p3), %s3014_s29, 256, %s3017_s25, %s3585_s5, %s3586_s26, %s3586_s26, %s2696_s17  }
  0xbf   : > { %s3627_s9 = sld [smem:[#allocation52_spill]]  ;;  %s673_s22 = scalar_lea.vmem [#allocation17], %s2924_s18 }
  0xc0   : > { %s680_s12 = sshll.u32 %s673_s22, 4  ;;  %s3590_s15 = scalar_lea.sflag [#allocation18], %s2873_s21  ;;  %s681_s12 = int_to_ptr.vmem [resolvable:$true] %s680_s12 }
  0xc5   : > { %s3050_s19 = scalar_lea.hbm %s3627_s9, %s2927_s1  ;;  %s2244_s25 = scalar_lea.hbm %s3627_s9, 80 }
  0xc6   : > { %s2239_s3 = scalar_lea.hbm %s3050_s19, 16  ;;  %p2245_p0 = scmp.lt.u32.totalorder %s3050_s19, %s3627_s9 }
  0xc7   : > { %p2240_p11 = scmp.ne.s32.totalorder %s3050_s19, %s2239_s3  ;;  %p2246_p13 = scmp.lt.u32.totalorder %s2244_s25, %s2239_s3 }
  0xc8   : > { %p2248_p4 = scmp.lt.u32.totalorder %s2239_s3, %s3050_s19 }
  0xc9   : > { %p2242_p8 = pnand %p2240_p11, %p2946_p5  ;;  %p2247_p2 = por %p2246_p13, %p2245_p0 }
  0xcb   : > { %p2243_p10 = pneg %p2242_p8  ;;  %p2249_p6 = por %p2248_p4, %p2247_p2 }
  0xcd   : > { %p2250_p9 = pnand %p2249_p6, %p2243_p10 }
  0xcf   : > { %2253 = shalt.err (!%p2250_p9)
}
  0xd0   : > { %s2254_s22 = scalar_lea.vmem %s681_s12, 16  ;;  %s2698_s5 = smov [#allocation17]  }
  0xd1   : > { %p2255_p7 = scmp.ne.s32.totalorder %s681_s12, %s2254_s22  ;;  %s2259_s26 = sshll.u32 %s2698_s5, 4  ;;  %s2260_s26 = int_to_ptr.vmem [resolvable:$false] %s2259_s26 }
  0xd2   : > { %s2261_s7 = scalar_lea.vmem %s2260_s26, 32  ;;  %p2262_p11 = scmp.lt.s32.totalorder %s681_s12, %s2260_s26 }
  0xd3   : > { %p2257_p12 = pnand %p2255_p7, %p2946_p5  ;;  %p2263_p8 = scmp.lt.s32.totalorder %s2261_s7, %s2254_s22 }
  0xd5   : > { %p2258_p1 = pneg %p2257_p12  ;;  %p2264_p3 = por %p2263_p8, %p2262_p11 }
  0xd7   : > { %p2265_p0 = pnand %p2264_p3, %p2258_p1 }
  0xd9   : > { %2268 = shalt.err (!%p2265_p0)
}
  0xda   : > { %p3628_p13 = scmp.ne.s32.totalorder %s3617_s30, 0  ;;  %s3077_s29 = scalar_lea.hbm %s3552_s11, %s2972_s14 }
  0xdb   : > { %s708_s26 = scalar_lea.vmem [#allocation20], %s2939_s0  ;;  %s1797_s10 = sshll.u32 %s2924_s18, 6 }
  0xdc   : > { %1998 = dma.hbm_to_vmem [thread:$0]  (!%p3628_p13), %s3050_s19, 16, %s681_s12, %s3590_s15  }
  0xdd   : > { %s715_s25 = sshll.u32 %s708_s26, 4  ;;  %s3589_s20 = scalar_lea.sflag [#allocation21], %s2873_s21  ;;  %s3080_s25 = int_to_ptr.vmem [resolvable:$true] %s715_s25 }
  0xde   : > { %s2269_s22 = scalar_lea.hbm %s3077_s29, 256  ;;  %s2274_s14 = scalar_lea.hbm %s3552_s11, 1280 }
  0xdf   : > { %p2270_p3 = scmp.ne.s32.totalorder %s3077_s29, %s2269_s22  ;;  %p2275_p4 = scmp.lt.u32.totalorder %s3077_s29, %s3552_s11 }
  0xe0   : > { %p2276_p6 = scmp.lt.u32.totalorder %s2274_s14, %s2269_s22  ;;  %p2278_p7 = scmp.lt.u32.totalorder %s2269_s22, %s3077_s29 }
  0xe1   : > { %p2272_p10 = pnand %p2270_p3, %p2946_p5 }
  0xe2   : > { %p2277_p9 = por %p2276_p6, %p2275_p4 }
  0xe3   : > { %p2273_p2 = pneg %p2272_p10 }
  0xe4   : > { %p2279_p12 = por %p2278_p7, %p2277_p9 }
  0xe6   : > { %p2280_p1 = pnand %p2279_p12, %p2273_p2 }
  0xe8   : > { %2283 = shalt.err (!%p2280_p1)
}
  0xe9   : > { %s2284_s0 = scalar_lea.vmem %s3080_s25, 256  ;;  %s2699_s5 = smov [#allocation20]  }
  0xea   : > { %p2285_p11 = scmp.ne.s32.totalorder %s3080_s25, %s2284_s0  ;;  %s2289_s26 = sshll.u32 %s2699_s5, 4  ;;  %s2290_s26 = int_to_ptr.vmem [resolvable:$false] %s2289_s26 }
  0xeb   : > { %s2291_s19 = scalar_lea.vmem %s2290_s26, 512  ;;  %p2292_p3 = scmp.lt.s32.totalorder %s3080_s25, %s2290_s26 }
  0xec   : > { %p2287_p8 = pnand %p2285_p11, %p2946_p5  ;;  %p2293_p10 = scmp.lt.s32.totalorder %s2291_s19, %s2284_s0 }
  0xee   : > { %p2288_p0 = pneg %p2287_p8  ;;  %p2294_p4 = por %p2293_p10, %p2292_p3 }
  0xf0   : > { %p2295_p6 = pnand %p2294_p4, %p2288_p0 }
  0xf2   : > { %2298 = shalt.err (!%p2295_p6)
}
  0xf3   : > { %s3629_s22 = smov 64   ;;  %s1850_s12 = sshll.u32 %s2689_s27, 10 }
  0xf4   : > { %2004 = dma.hbm_to_vmem [thread:$0]  (!%p3628_p13), %s3077_s29, 256, %s3080_s25, %s3589_s20, %s3629_s22, %s3629_s22, %s2696_s17  }
  0xf5   : > { %s3114_s3 = scalar_lea.hbm %s3554_s13, %s1850_s12  ;;  %s746_s0 = scalar_lea.vmem [#allocation23], %s1797_s10 }
  0xf6   : > { %s753_s5 = sshll.u32 %s746_s0, 4  ;;  %s3594_s26 = scalar_lea.sflag [#allocation24], %s2873_s21  ;;  %s3118_s5 = int_to_ptr.vmem [resolvable:$true] %s753_s5 }
  0xf7   : > { %s2299_s19 = scalar_lea.hbm %s3114_s3, 1024  ;;  %s2304_s25 = scalar_lea.hbm %s3554_s13, 5120 }
  0xf8   : > { %p2300_p2 = scmp.ne.s32.totalorder %s3114_s3, %s2299_s19  ;;  %p2305_p12 = scmp.lt.u32.totalorder %s3114_s3, %s3554_s13 }
  0xf9   : > { %p2306_p1 = scmp.lt.u32.totalorder %s2304_s25, %s2299_s19  ;;  %p2308_p8 = scmp.lt.u32.totalorder %s2299_s19, %s3114_s3 }
  0xfa   : > { %p2302_p9 = pnand %p2300_p2, %p2946_p5 }
  0xfb   : > { %p2307_p11 = por %p2306_p1, %p2305_p12 }
  0xfc   : > { %p2303_p7 = pneg %p2302_p9 }
  0xfd   : > { %p2309_p0 = por %p2308_p8, %p2307_p11 }
  0xff   : > { %p2310_p3 = pnand %p2309_p0, %p2303_p7 }
 0x101   : > { %2313 = shalt.err (!%p2310_p3)
}
 0x102   : > { %s2314_s10 = scalar_lea.vmem %s3118_s5, 1024  ;;  %s2700_s7 = smov [#allocation23]  }
 0x103   : > { %p2315_p10 = scmp.ne.s32.totalorder %s3118_s5, %s2314_s10  ;;  %s2319_s0 = sshll.u32 %s2700_s7, 4  ;;  %s2320_s0 = int_to_ptr.vmem [resolvable:$false] %s2319_s0 }
 0x104   : > { %s2321_s27 = scalar_lea.vmem %s2320_s0, 2048  ;;  %p2322_p2 = scmp.lt.s32.totalorder %s3118_s5, %s2320_s0 }
 0x105   : > { %p2317_p4 = pnand %p2315_p10, %p2946_p5  ;;  %p2323_p9 = scmp.lt.s32.totalorder %s2321_s27, %s2314_s10 }
 0x107   : > { %p2318_p6 = pneg %p2317_p4  ;;  %p2324_p12 = por %p2323_p9, %p2322_p2 }
 0x109   : > { %p2325_p1 = pnand %p2324_p12, %p2318_p6 }
 0x10b   : > { %2328 = shalt.err (!%p2325_p1)
}
 0x10c   : > { %2010 = dma.hbm_to_vmem [thread:$0]  (!%p3628_p13), %s3114_s3, 1024, %s3118_s5, %s3594_s26, %s3629_s22, %s3629_s22, %s2696_s17  }
 0x10d   : > { %s2701_s19 = smov [#allocation2]   ;;  %s2702_s25 = smov [#allocation7]  }
 0x10e   : > { %s505_s29 = sshll.u32 %s2701_s19, 4  ;;  %s527_s12 = sshll.u32 %s2702_s25, 4  ;;  %s506_s29 = int_to_ptr.vmem [resolvable:$true] %s505_s29  ;;  %s528_s12 = int_to_ptr.vmem [resolvable:$true] %s527_s12 }
 0x10f   : > { %s3630_s7 = sld [smem:[#allocation47_spill]]  ;;  %p3631_p11 = scmp.ne.s32.totalorder %s3619_s24, 0 }
 0x115   : > { %s2329_s0 = scalar_lea.hbm %s3630_s7, 32 }
 0x116   : > { %p2330_p7 = scmp.ne.s32.totalorder %s3630_s7, %s2329_s0  ;;  %p2336_p3 = scmp.lt.u32.totalorder %s2329_s0, %s3630_s7 }
 0x118   : > { %p2332_p8 = pnand %p2330_p7, %p3631_p11 }
 0x11a   : > { %p2333_p0 = pneg %p2332_p8 }
 0x11c   : > { %p2338_p10 = pnand %p2336_p3, %p2333_p0 }
 0x11e   : > { %2341 = shalt.err (!%p2338_p10)
}
 0x11f   : > { %s2342_s17 = scalar_lea.vmem %s506_s29, 32  ;;  %p2350_p9 = scmp.lt.s32.totalorder %s506_s29, %s506_s29 }
 0x120   : > { %p2343_p4 = scmp.ne.s32.totalorder %s506_s29, %s2342_s17  ;;  %p2351_p12 = scmp.lt.s32.totalorder %s2342_s17, %s2342_s17 }
 0x122   : > { %p2345_p6 = pnand %p2343_p4, %p3631_p11  ;;  %p2352_p1 = por %p2351_p12, %p2350_p9 }
 0x124   : > { %p2346_p2 = pneg %p2345_p6 }
 0x126   : > { %p2353_p13 = pnand %p2352_p1, %p2346_p2 }
 0x128   : > { %2356 = shalt.err (!%p2353_p13)
}
 0x129   : > { %p3632_p7 = scmp.ne.s32.totalorder %s3616_s23, 0  ;;  %s2357_s3 = scalar_lea.hbm %s3543_s2, 16 }
 0x12a   : > { %p2358_p8 = scmp.ne.s32.totalorder %s3543_s2, %s2357_s3  ;;  %p2364_p13 = scmp.lt.u32.totalorder %s2357_s3, %s3543_s2 }
 0x12b   : > { %1964 = dma.hbm_to_vmem [thread:$0]  (!%p3632_p7), %s3630_s7, 32, %s506_s29, [#allocation3]  }
 0x12c   : > { %p2360_p0 = pnand %p2358_p8, %p3631_p11 }
 0x12e   : > { %p2361_p3 = pneg %p2360_p0 }
 0x130   : > { %p2366_p10 = pnand %p2364_p13, %p2361_p3 }
 0x132   : > { %2369 = shalt.err (!%p2366_p10)
}
 0x133   : > { %s2370_s10 = scalar_lea.vmem %s528_s12, 16  ;;  %s2377_s29 = scalar_lea.vmem %s528_s12, 32 }
 0x134   : > { %p2371_p4 = scmp.ne.s32.totalorder %s528_s12, %s2370_s10  ;;  %p2378_p9 = scmp.lt.s32.totalorder %s528_s12, %s528_s12 }
 0x135   : > { %p2379_p12 = scmp.lt.s32.totalorder %s2377_s29, %s2370_s10 }
 0x136   : > { %p2373_p6 = pnand %p2371_p4, %p3631_p11 }
 0x137   : > { %p2380_p1 = por %p2379_p12, %p2378_p9 }
 0x138   : > { %p2374_p2 = pneg %p2373_p6 }
 0x13a   : > { %p2381_p5 = pnand %p2380_p1, %p2374_p2 }
 0x13c   : > { %2384 = shalt.err (!%p2381_p5)
}
 0x13d   : > { %1970 = dma.hbm_to_vmem [thread:$0]  (!%p3632_p7), %s3543_s2, 16, %s528_s12, [#allocation6]  }
 0x13e   : > { %s2703_s17 = smov [#allocation28]   ;;  %s3187_s15 = scalar_lea.hbm %s3545_s4, %s2927_s1 }
 0x13f   : > { %s549_s20 = sshll.u32 %s2703_s17, 4  ;;  %s2385_s19 = scalar_lea.hbm %s3557_s16, 16  ;;  %s550_s20 = int_to_ptr.vmem [resolvable:$true] %s549_s20 }
 0x140   : > { %p2386_p5 = scmp.ne.s32.totalorder %s3557_s16, %s2385_s19  ;;  %p2392_p3 = scmp.lt.u32.totalorder %s2385_s19, %s3557_s16 }
 0x142   : > { %p2388_p8 = pnand %p2386_p5, %p3631_p11 }
 0x144   : > { %p2389_p0 = pneg %p2388_p8 }
 0x146   : > { %p2394_p13 = pnand %p2392_p3, %p2389_p0 }
 0x148   : > { %2397 = shalt.err (!%p2394_p13)
}
 0x149   : > { %s2398_s29 = scalar_lea.vmem %s550_s20, 16  ;;  %s2405_s0 = scalar_lea.vmem %s550_s20, 32 }
 0x14a   : > { %p2399_p10 = scmp.ne.s32.totalorder %s550_s20, %s2398_s29  ;;  %p2406_p2 = scmp.lt.s32.totalorder %s550_s20, %s550_s20 }
 0x14b   : > { %p2407_p9 = scmp.lt.s32.totalorder %s2405_s0, %s2398_s29 }
 0x14c   : > { %p2401_p4 = pnand %p2399_p10, %p3631_p11 }
 0x14d   : > { %p2408_p12 = por %p2407_p9, %p2406_p2 }
 0x14e   : > { %p2402_p6 = pneg %p2401_p4 }
 0x150   : > { %p2409_p1 = pnand %p2408_p12, %p2402_p6 }
 0x152   : > { %2412 = shalt.err (!%p2409_p1)
}
 0x153   : > { %1976 = dma.hbm_to_vmem [thread:$0]  (!%p3632_p7), %s3557_s16, 16, %s550_s20, [#allocation27]  }
 0x154   : > { %s580_s24 = scalar_lea.vmem [#allocation10], %s2924_s18  ;;  %s3212_s5 = scalar_lea.hbm %s3547_s6, %s2927_s1 }
 0x155   : > { %s587_s22 = sshll.u32 %s580_s24, 4  ;;  %s2413_s23 = scalar_lea.hbm %s3187_s15, 16  ;;  %s588_s22 = int_to_ptr.vmem [resolvable:$true] %s587_s22 }
 0x156   : > { %p2414_p11 = scmp.ne.s32.totalorder %s3187_s15, %s2413_s23  ;;  %p3633_p5 = scmp.ne.s32.totalorder %s3623_s28, 0 }
 0x157   : > { %s2418_s14 = scalar_lea.hbm %s3545_s4, 80  ;;  %p2419_p7 = scmp.lt.u32.totalorder %s3187_s15, %s3545_s4 }
 0x158   : > { %p2416_p8 = pnand %p2414_p11, %p3633_p5  ;;  %p2420_p3 = scmp.lt.u32.totalorder %s2418_s14, %s2413_s23 }
 0x159   : > { %p2422_p10 = scmp.lt.u32.totalorder %s2413_s23, %s3187_s15 }
 0x15a   : > { %p2417_p0 = pneg %p2416_p8  ;;  %p2421_p13 = por %p2420_p3, %p2419_p7 }
 0x15c   : > { %p2423_p4 = por %p2422_p10, %p2421_p13 }
 0x15e   : > { %p2424_p6 = pnand %p2423_p4, %p2417_p0 }
 0x160   : > { %2427 = shalt.err (!%p2424_p6)
}
 0x161   : > { %s2428_s20 = scalar_lea.vmem %s588_s22, 16  ;;  %s2704_s29 = smov [#allocation10]  }
 0x162   : > { %p2429_p2 = scmp.ne.s32.totalorder %s588_s22, %s2428_s20  ;;  %s2433_s0 = sshll.u32 %s2704_s29, 4  ;;  %s2434_s0 = int_to_ptr.vmem [resolvable:$false] %s2433_s0 }
 0x163   : > { %s2435_s27 = scalar_lea.vmem %s2434_s0, 32  ;;  %p2436_p1 = scmp.lt.s32.totalorder %s588_s22, %s2434_s0 }
 0x164   : > { %p2431_p9 = pnand %p2429_p2, %p3633_p5  ;;  %p2437_p11 = scmp.lt.s32.totalorder %s2435_s27, %s2428_s20 }
 0x166   : > { %p2432_p12 = pneg %p2431_p9  ;;  %p2438_p8 = por %p2437_p11, %p2436_p1 }
 0x168   : > { %p2439_p3 = pnand %p2438_p8, %p2432_p12 }
 0x16a   : > { %2442 = shalt.err (!%p2439_p3)
}
 0x16b   : > { %p3634_p7 = scmp.ne.s32.totalorder %s3617_s30, 0  ;;  %s3635_s17 = scalar_lea.sflag [#allocation9], %s2873_s21 }
 0x16c   : > { %s618_s24 = scalar_lea.vmem [#allocation13], %s2924_s18  ;;  %s3238_s19 = scalar_lea.hbm %s3549_s8, %s2927_s1 }
 0x16d   : > { %1983 = dma.hbm_to_vmem [thread:$0]  (!%p3634_p7), %s3187_s15, 16, %s588_s22, %s3635_s17  }
 0x16e   : > { %s625_s9 = sshll.u32 %s618_s24, 4  ;;  %s2443_s25 = scalar_lea.hbm %s3212_s5, 16  ;;  %s626_s9 = int_to_ptr.vmem [resolvable:$true] %s625_s9 }
 0x16f   : > { %p2444_p0 = scmp.ne.s32.totalorder %s3212_s5, %s2443_s25  ;;  %s2448_s10 = scalar_lea.hbm %s3547_s6, 80 }
 0x170   : > { %p2449_p4 = scmp.lt.u32.totalorder %s3212_s5, %s3547_s6  ;;  %p2450_p6 = scmp.lt.u32.totalorder %s2448_s10, %s2443_s25 }
 0x171   : > { %p2446_p13 = pnand %p2444_p0, %p3633_p5  ;;  %p2452_p9 = scmp.lt.u32.totalorder %s2443_s25, %s3212_s5 }
 0x172   : > { %p2451_p2 = por %p2450_p6, %p2449_p4 }
 0x173   : > { %p2447_p10 = pneg %p2446_p13 }
 0x174   : > { %p2453_p12 = por %p2452_p9, %p2451_p2 }
 0x176   : > { %p2454_p1 = pnand %p2453_p12, %p2447_p10 }
 0x178   : > { %2457 = shalt.err (!%p2454_p1)
}
 0x179   : > { %s2458_s15 = scalar_lea.vmem %s626_s9, 16  ;;  %s2705_s22 = smov [#allocation13]  }
 0x17a   : > { %p2459_p11 = scmp.ne.s32.totalorder %s626_s9, %s2458_s15  ;;  %s2463_s0 = sshll.u32 %s2705_s22, 4  ;;  %s2464_s0 = int_to_ptr.vmem [resolvable:$false] %s2463_s0 }
 0x17b   : > { %s2465_s27 = scalar_lea.vmem %s2464_s0, 32  ;;  %p2466_p0 = scmp.lt.s32.totalorder %s626_s9, %s2464_s0 }
 0x17c   : > { %p2461_p8 = pnand %p2459_p11, %p3633_p5  ;;  %p2467_p13 = scmp.lt.s32.totalorder %s2465_s27, %s2458_s15 }
 0x17e   : > { %p2462_p3 = pneg %p2461_p8  ;;  %p2468_p7 = por %p2467_p13, %p2466_p0 }
 0x180   : > { %p2469_p4 = pnand %p2468_p7, %p2462_p3 }
 0x182   : > { %2472 = shalt.err (!%p2469_p4)
}
 0x183   : > { %p3636_p6 = scmp.ne.s32.totalorder %s3617_s30, 0  ;;  %s3637_s17 = scalar_lea.sflag [#allocation12], %s2873_s21 }
 0x184   : > { %s656_s24 = scalar_lea.vmem [#allocation16], %s2924_s18  ;;  %s3638_s14 = sld [smem:[#allocation53_spill]] }
 0x185   : > { %1989 = dma.hbm_to_vmem [thread:$0]  (!%p3636_p6), %s3212_s5, 16, %s626_s9, %s3637_s17  }
 0x186   : > { %s663_s3 = sshll.u32 %s656_s24, 4  ;;  %s2473_s10 = scalar_lea.hbm %s3238_s19, 16  ;;  %s664_s3 = int_to_ptr.vmem [resolvable:$true] %s663_s3 }
 0x187   : > { %p2474_p7 = scmp.ne.s32.totalorder %s3238_s19, %s2473_s10  ;;  %s2478_s15 = scalar_lea.hbm %s3549_s8, 80 }
 0x188   : > { %p2479_p9 = scmp.lt.u32.totalorder %s3238_s19, %s3549_s8  ;;  %p2480_p12 = scmp.lt.u32.totalorder %s2478_s15, %s2473_s10 }
 0x189   : > { %p2476_p10 = pnand %p2474_p7, %p3633_p5  ;;  %p2482_p11 = scmp.lt.u32.totalorder %s2473_s10, %s3238_s19 }
 0x18a   : > { %s3264_s12 = scalar_lea.hbm %s3638_s14, %s2927_s1  ;;  %p2481_p1 = por %p2480_p12, %p2479_p9 }
 0x18b   : > { %p2477_p2 = pneg %p2476_p10 }
 0x18c   : > { %p2483_p8 = por %p2482_p11, %p2481_p1 }
 0x18e   : > { %p2484_p3 = pnand %p2483_p8, %p2477_p2 }
 0x190   : > { %2487 = shalt.err (!%p2484_p3)
}
 0x191   : > { %s2488_s5 = scalar_lea.vmem %s664_s3, 16  ;;  %s2706_s9 = smov [#allocation16]  }
 0x192   : > { %p2489_p0 = scmp.ne.s32.totalorder %s664_s3, %s2488_s5  ;;  %s2493_s27 = sshll.u32 %s2706_s9, 4  ;;  %s2494_s27 = int_to_ptr.vmem [resolvable:$false] %s2493_s27 }
 0x193   : > { %s2495_s17 = scalar_lea.vmem %s2494_s27, 32  ;;  %p2496_p7 = scmp.lt.s32.totalorder %s664_s3, %s2494_s27 }
 0x194   : > { %p2491_p13 = pnand %p2489_p0, %p3633_p5  ;;  %p2497_p10 = scmp.lt.s32.totalorder %s2495_s17, %s2488_s5 }
 0x196   : > { %p2492_p4 = pneg %p2491_p13  ;;  %p2498_p6 = por %p2497_p10, %p2496_p7 }
 0x198   : > { %p2499_p9 = pnand %p2498_p6, %p2492_p4 }
 0x19a   : > { %2502 = shalt.err (!%p2499_p9)
}
 0x19b   : > { %p3639_p12 = scmp.ne.s32.totalorder %s3617_s30, 0  ;;  %s3640_s24 = scalar_lea.sflag [#allocation15], %s2873_s21 }
 0x19c   : > { %s690_s23 = scalar_lea.vmem [#allocation19], %s2924_s18  ;;  %s3641_s29 = sld [smem:[#allocation54_spill]] }
 0x19d   : > { %1995 = dma.hbm_to_vmem [thread:$0]  (!%p3639_p12), %s3238_s19, 16, %s664_s3, %s3640_s24  }
 0x19e   : > { %s697_s25 = sshll.u32 %s690_s23, 4  ;;  %s2503_s22 = scalar_lea.hbm %s3264_s12, 16  ;;  %s698_s25 = int_to_ptr.vmem [resolvable:$true] %s697_s25 }
 0x19f   : > { %p2504_p6 = scmp.ne.s32.totalorder %s3264_s12, %s2503_s22  ;;  %s2508_s9 = scalar_lea.hbm %s3638_s14, 80 }
 0x1a0   : > { %p2509_p11 = scmp.lt.u32.totalorder %s3264_s12, %s3638_s14  ;;  %p2510_p8 = scmp.lt.u32.totalorder %s2508_s9, %s2503_s22 }
 0x1a1   : > { %p2506_p2 = pnand %p2504_p6, %p3633_p5  ;;  %p2512_p0 = scmp.lt.u32.totalorder %s2503_s22, %s3264_s12 }
 0x1a2   : > { %s3290_s15 = scalar_lea.hbm %s3641_s29, %s2927_s1  ;;  %p2511_p3 = por %p2510_p8, %p2509_p11 }
 0x1a3   : > { %p2507_p1 = pneg %p2506_p2 }
 0x1a4   : > { %p2513_p13 = por %p2512_p0, %p2511_p3 }
 0x1a6   : > { %p2514_p4 = pnand %p2513_p13, %p2507_p1 }
 0x1a8   : > { %2517 = shalt.err (!%p2514_p4)
}
 0x1a9   : > { %s2518_s19 = scalar_lea.vmem %s698_s25, 16  ;;  %s2707_s3 = smov [#allocation19]  }
 0x1aa   : > { %p2519_p7 = scmp.ne.s32.totalorder %s698_s25, %s2518_s19  ;;  %s2523_s24 = sshll.u32 %s2707_s3, 4  ;;  %s2524_s24 = int_to_ptr.vmem [resolvable:$false] %s2523_s24 }
 0x1ab   : > { %s2525_s23 = scalar_lea.vmem %s2524_s24, 32  ;;  %p2526_p6 = scmp.lt.s32.totalorder %s698_s25, %s2524_s24 }
 0x1ac   : > { %p2521_p10 = pnand %p2519_p7, %p3633_p5  ;;  %p2527_p2 = scmp.lt.s32.totalorder %s2525_s23, %s2518_s19 }
 0x1ae   : > { %p2522_p9 = pneg %p2521_p10  ;;  %p2528_p12 = por %p2527_p2, %p2526_p6 }
 0x1b0   : > { %p2529_p8 = pnand %p2528_p12, %p2522_p9 }
 0x1b2   : > { %2532 = shalt.err (!%p2529_p8)
}
 0x1b3   : > { %p3642_p11 = scmp.ne.s32.totalorder %s3617_s30, 0  ;;  %s3643_s10 = scalar_lea.sflag [#allocation18], %s2873_s21 }
 0x1b4   : > { %s728_s20 = scalar_lea.vmem [#allocation22], %s2924_s18  ;;  %s3644_s9 = sld [smem:[#allocation55_spill]] }
 0x1b5   : > { %2001 = dma.hbm_to_vmem [thread:$0]  (!%p3642_p11), %s3264_s12, 16, %s698_s25, %s3643_s10  }
 0x1b6   : > { %s735_s22 = sshll.u32 %s728_s20, 4  ;;  %s2533_s17 = scalar_lea.hbm %s3290_s15, 16  ;;  %s736_s22 = int_to_ptr.vmem [resolvable:$true] %s735_s22 }
 0x1b7   : > { %p2534_p12 = scmp.ne.s32.totalorder %s3290_s15, %s2533_s17  ;;  %s2538_s24 = scalar_lea.hbm %s3641_s29, 80 }
 0x1b8   : > { %p2539_p0 = scmp.lt.u32.totalorder %s3290_s15, %s3641_s29  ;;  %p2540_p13 = scmp.lt.u32.totalorder %s2538_s24, %s2533_s17 }
 0x1b9   : > { %p2536_p1 = pnand %p2534_p12, %p3633_p5  ;;  %p2542_p7 = scmp.lt.u32.totalorder %s2533_s17, %s3290_s15 }
 0x1ba   : > { %s3316_s27 = scalar_lea.hbm %s3644_s9, %s2927_s1  ;;  %p2541_p4 = por %p2540_p13, %p2539_p0 }
 0x1bb   : > { %p2537_p3 = pneg %p2536_p1 }
 0x1bc   : > { %p2543_p10 = por %p2542_p7, %p2541_p4 }
 0x1be   : > { %p2544_p9 = pnand %p2543_p10, %p2537_p3 }
 0x1c0   : > { %2547 = shalt.err (!%p2544_p9)
}
 0x1c1   : > { %s2548_s1 = scalar_lea.vmem %s736_s22, 16  ;;  %s2708_s12 = smov [#allocation22]  }
 0x1c2   : > { %p2549_p6 = scmp.ne.s32.totalorder %s736_s22, %s2548_s1  ;;  %s2553_s25 = sshll.u32 %s2708_s12, 4  ;;  %s2554_s25 = int_to_ptr.vmem [resolvable:$false] %s2553_s25 }
 0x1c3   : > { %s2555_s10 = scalar_lea.vmem %s2554_s25, 32  ;;  %p2556_p12 = scmp.lt.s32.totalorder %s736_s22, %s2554_s25 }
 0x1c4   : > { %p2551_p2 = pnand %p2549_p6, %p3633_p5  ;;  %p2557_p1 = scmp.lt.s32.totalorder %s2555_s10, %s2548_s1 }
 0x1c6   : > { %p2552_p8 = pneg %p2551_p2  ;;  %p2558_p11 = por %p2557_p1, %p2556_p12 }
 0x1c8   : > { %p2559_p0 = pnand %p2558_p11, %p2552_p8 }
 0x1ca   : > { %2562 = shalt.err (!%p2559_p0)
}
 0x1cb   : > { %p3645_p13 = scmp.ne.s32.totalorder %s3617_s30, 0  ;;  %s3646_s26 = scalar_lea.sflag [#allocation21], %s2873_s21 }
 0x1cc   : > { %s766_s20 = scalar_lea.vmem [#allocation25], %s2924_s18  ;;  %s2563_s5 = scalar_lea.hbm %s3316_s27, 16 }
 0x1cd   : > { %2007 = dma.hbm_to_vmem [thread:$0]  (!%p3645_p13), %s3290_s15, 16, %s736_s22, %s3646_s26  }
 0x1ce   : > { %s773_s0 = sshll.u32 %s766_s20, 4  ;;  %p2564_p3 = scmp.ne.s32.totalorder %s3316_s27, %s2563_s5  ;;  %s774_s0 = int_to_ptr.vmem [resolvable:$true] %s773_s0 }
 0x1cf   : > { %s2568_s3 = scalar_lea.hbm %s3644_s9, 80  ;;  %p2569_p7 = scmp.lt.u32.totalorder %s3316_s27, %s3644_s9 }
 0x1d0   : > { %p2566_p11 = pnand %p2564_p3, %p3633_p5  ;;  %p2570_p10 = scmp.lt.u32.totalorder %s2568_s3, %s2563_s5 }
 0x1d1   : > { %p2572_p6 = scmp.lt.u32.totalorder %s2563_s5, %s3316_s27 }
 0x1d2   : > { %p2567_p4 = pneg %p2566_p11  ;;  %p2571_p9 = por %p2570_p10, %p2569_p7 }
 0x1d4   : > { %p2573_p2 = por %p2572_p6, %p2571_p9 }
 0x1d6   : > { %p2574_p8 = pnand %p2573_p2, %p2567_p4 }
 0x1d8   : > { %2577 = shalt.err (!%p2574_p8)
}
 0x1d9   : > { %s2578_s18 = scalar_lea.vmem %s774_s0, 16  ;;  %s2709_s15 = smov [#allocation25]  }
 0x1da   : > { %p2579_p12 = scmp.ne.s32.totalorder %s774_s0, %s2578_s18  ;;  %s2583_s22 = sshll.u32 %s2709_s15, 4  ;;  %s2584_s22 = int_to_ptr.vmem [resolvable:$false] %s2583_s22 }
 0x1db   : > { %s2585_s1 = scalar_lea.vmem %s2584_s22, 32  ;;  %p2586_p3 = scmp.lt.s32.totalorder %s774_s0, %s2584_s22 }
 0x1dc   : > { %p2581_p1 = pnand %p2579_p12, %p3633_p5  ;;  %p2587_p11 = scmp.lt.s32.totalorder %s2585_s1, %s2578_s18 }
 0x1de   : > { %p2582_p0 = pneg %p2581_p1  ;;  %p2588_p13 = por %p2587_p11, %p2586_p3 }
 0x1e0   : > { %p2589_p7 = pnand %p2588_p13, %p2582_p0 }
 0x1e2   : > { %2592 = shalt.err (!%p2589_p7)
}
 0x1e3   : > { %p3647_p10 = scmp.ne.s32.totalorder %s3617_s30, 0  ;;  %s3648_s12 = scalar_lea.sflag [#allocation24], %s2873_s21 }
 0x1e4   : > { %s3649_s25 = sld [smem:[#allocation46_spill]] }
 0x1e5   : > { %2013 = dma.hbm_to_vmem [thread:$0]  (!%p3647_p10), %s3316_s27, 16, %s774_s0, %s3648_s12  }
 0x1ea   : > { %p3650_p4 = scmp.ne.s32.totalorder %s3649_s25, 0 }
 0x1eb   : > { %s3651_s28 = sld [smem:[#allocation42_spill]] (!%p3650_p4) }
 0x1ec   : > { %782 = sbr.rel (%p3650_p4) target bundleno = 2728 (0xaa8), region = 88 }
 0x1f1   : > { %p3652_p5 = scmp.eq.s32.totalorder (!%p3650_p4), %s3651_s28, 0 }
 0x1f3   : > { %2636 = dma.done.wait (%p3652_p5), [#allocation3], 32   ;;  %p3653_p9 = pmov %p3652_p5 }
 0x1f4   : > { %p3654_p6 = pmov %p3652_p5 }
 0x1f5   : > { %2638 = vsyncadd (%p3653_p9), [#allocation3], 4294967264 }
 0x1f6   : > { %2640 = dma.done.wait (%p3654_p6), [#allocation6], 32   ;;  %p3655_p13 = pmov %p3652_p5 }
 0x1f7   : > { %s3656_s30 = sld [smem:[#allocation40_spill]]  ;;  %s3657_s21 = sld [smem:[#allocation45_spill]] }
 0x1f8   : > { %2642 = vsyncadd (%p3655_p13), [#allocation6], 4294967264  ;;  %s3368_s10 = sand.u32 1, %s3651_s28  }
 0x1f9   : > { %s797_s26 = scalar_lea.sflag [#allocation9], %s3368_s10 }
 0x1fd   : > { %s3371_s27 = sand.u32 1, %s3656_s30   ;;  %p3658_p2 = scmp.ne.s32.totalorder %s3657_s21, 0 }
 0x1fe   : > { %s799_s20 = scalar_lea.vmem [#allocation8], %s3371_s27 }
 0x1ff   : > { %2644 = dma.done.wait (%p3658_p2), %s797_s26, 32  }
 0x200   : > { %2646 = vsyncadd (%p3658_p2), %s797_s26, 4294967264  ;;  %s3380_s0 = sshll.u32 %s3371_s27, 4  ;;  %s807_s5 = scalar_lea.vmem [#allocation10], %s3371_s27 }
 0x201   : > { %s813_s17 = scalar_lea.sflag [#allocation12], %s3368_s10  ;;  %s816_s19 = scalar_lea.vmem [#allocation11], %s3380_s0 }
 0x202   : > { %2648 = dma.done.wait (%p3658_p2), %s813_s17, 272  }
 0x203   : > { %2650 = vsyncadd (%p3658_p2), %s813_s17, 4294967024  ;;  %s824_s3 = scalar_lea.vmem [#allocation13], %s3371_s27  ;;  %s830_s24 = scalar_lea.sflag [#allocation15], %s3368_s10 }
 0x204   : > { %s833_s23 = scalar_lea.vmem [#allocation14], %s3380_s0 }
 0x205   : > { %2652 = dma.done.wait (%p3658_p2), %s830_s24, 272  }
 0x206   : > { %2654 = vsyncadd (%p3658_p2), %s830_s24, 4294967024  ;;  %s841_s18 = scalar_lea.vmem [#allocation16], %s3371_s27  ;;  %s847_s15 = scalar_lea.sflag [#allocation18], %s3368_s10 }
 0x207   : > { %s849_s22 = scalar_lea.vmem [#allocation17], %s3371_s27 }
 0x208   : > { %2656 = dma.done.wait (%p3658_p2), %s847_s15, 32  }
 0x209   : > { %2658 = vsyncadd (%p3658_p2), %s847_s15, 4294967264  ;;  %s857_s1 = scalar_lea.vmem [#allocation19], %s3371_s27  ;;  %s863_s12 = scalar_lea.sflag [#allocation21], %s3368_s10 }
 0x20a   : > { %s866_s25 = scalar_lea.vmem [#allocation20], %s3380_s0 }
 0x20b   : > { %2660 = dma.done.wait (%p3658_p2), %s863_s12, 272  }
 0x20c   : > { %2662 = vsyncadd (%p3658_p2), %s863_s12, 4294967024  ;;  %s1808_s30 = sshll.u32 %s3371_s27, 6  ;;  %s874_s26 = scalar_lea.vmem [#allocation22], %s3371_s27 }
 0x20d   : > { %s880_s17 = scalar_lea.sflag [#allocation24], %s3368_s10  ;;  %s3413_s24 = scalar_lea.vmem [#allocation23], %s1808_s30 }
 0x20e   : > { %2664 = dma.done.wait (%p3658_p2), %s880_s17, 1040  }
 0x20f   : > { %2666 = vsyncadd (%p3658_p2), %s880_s17, 4294966256  ;;  %s891_s15 = scalar_lea.vmem [#allocation25], %s3371_s27  ;;  %p3659_p8 = pmov %p3652_p5 }
 0x210   : > { %p3660_p12 = pmov %p3652_p5 }
 0x211   : > { %2668 = dma.done.wait (%p3659_p8), [#allocation27], 32  }
 0x212   : > { %2670 = vsyncadd (%p3660_p12), [#allocation27], 4294967264  ;;  %p3661_p1 = scmp.ne.s32.totalorder %s3651_s28, 0 }
 0x213   : > { %v997_v0 = vld [vmem:[#allocation2] sm:$0x3] (!%p3661_p1)  ;;  %vm1000_vm0 = vcmask (!%p3661_p1), 254976   ;;  %v1812_v11 = vld [vmem:[#allocation5] ss:$0 sm:$0xff] (!%p3661_p1) }
 0x214   : > { %996 = sbr.rel (%p3661_p1) target bundleno = 846 (0x34e), region = 160  ;;  %v1001_v1 = vsel (!%p3661_p1), %vm1000_vm0, %v997_v0, 0.0  ;;  %v1813_v13 = vld [vmem:[#allocation7] ss:$0 sm:$0xff] (!%p3661_p1) }
 0x215   : > { %1002 = vadd.xlane.f32.xlu0 (!%p3661_p1), %v1001_v1 }
 0x2a2   : > { %v1003_v2 = vpop.xlane.xlu0 %1002 }
 0x2a3   : > { %v1005_v3 = vmul.f32 0.03125, %v1003_v2 }
 0x2a5   : > { %v1006_v4 = vsub.f32 %v997_v0, %v1005_v3 }
 0x2a7   : > { %v1007_v5 = vmul.f32 %v1006_v4, %v1006_v4 }
 0x2a9   : > { %v1008_v6 = vsel %vm1000_vm0, %v1007_v5, 0.0 }
 0x2aa   : > { %1009 = vadd.xlane.f32.xlu0 %v1008_v6 }
 0x337   : > { %v1010_v7 = vpop.xlane.xlu0 %1009 }
 0x338   : > { %v1011_v8 = vmul.f32 0.03125, %v1010_v7 }
 0x33a   : > { %v1012_v9 = vadd.f32 1e-05, %v1011_v8 }
 0x33c   : > { %2069 = vrsqrt.f32 %v1012_v9 }
 0x346   : > { %v2070_v10 = vpop.eup %2069 }
 0x347   : > { %v1014_v12 = vmul.f32 %v2070_v10, %v1006_v4 }
 0x349   : > { %v1021_v14 = vmul.f32 %v1812_v11, %v1014_v12 }
 0x34b   : > { %v1028_v15 = vadd.f32 %v1813_v13, %v1021_v14 }
 0x34d   : > { %1029 = vst.msk [vmem:[#allocation29] sm:$0x3] %vm1000_vm0, %v1028_v15 }
 0x34e PF: > { %vm1033_vm1 = vcmask 254976   ;;  %v2071_v23 = vld [vmem:[%s816_s19] sm:$0xff]   ;;  %v2710_v24 = vmov 0.0   ;;  %v2072_v25 = vld [vmem:[%s816_s19 + $0x8] sm:$0xff]   ;;  %vm2711_vm2 = vmmov 0   ;;  %vm1086_vm3 = vcmask 261120  }
 0x34f   : > { %1869 = vmatprep.subr.bf16.mxu0 %v2710_v24  ;;  %1893 = vmatprep.subr.bf16.mxu1 %v2710_v24  ;;  %v1814_v30 = vld [vmem:[%s799_s20] ss:$0 sm:$0xff]  ;;  %v2074_v37 = vld [vmem:[%s833_s23 + $0x8] sm:$0xff]   ;;  %v2080_v9 = vld [vmem:[%s3413_s24 + $0x18] sm:$0xff]   ;;  %s3662_s28 = sld [smem:[#allocation42_spill]] }
 0x350   : > { %1870 = vmatpush3.bf16.msra.mxu0 %v2071_v23  ;;  %1873 = vmatprep.mubr.msk.bf16.mxu0 %vm2711_vm2, %v2710_v24  ;;  %v1815_v32 = vld [vmem:[%s807_s5] ss:$0 sm:$0xff]  ;;  %v2075_v58 = vld [vmem:[%s866_s25] sm:$0xff]  }
 0x351   : > { %1871 = vmatprep.subr.bf16.mxu0 %v2710_v24  ;;  %1909 = vmatprep.mubr.msk.bf16.mxu1 %vm2711_vm2, %v2710_v24  ;;  %v2073_v35 = vld [vmem:[%s833_s23] sm:$0xff]   ;;  %v2076_v59 = vld [vmem:[%s866_s25 + $0x8] sm:$0xff]  }
 0x352   : > { %v1816_v38 = vld [vmem:[%s824_s3] ss:$0 sm:$0xff]  ;;  %v2077_v60 = vld [vmem:[%s3413_s24] sm:$0xff]   ;;  %v2079_v8 = vld [vmem:[%s3413_s24 + $0x10] sm:$0xff]  }
 0x353   : > { %v1820_v45 = vld [vmem:[%s841_s18] ss:$0 sm:$0xff]  ;;  %1894 = vmatpush3.bf16.msra.mxu1 %v2077_v60  ;;  %v2081_v10 = vld [vmem:[%s3413_s24 + $0x20] sm:$0xff]   ;;  %v2083_v12 = vld [vmem:[%s3413_s24 + $0x30] sm:$0xff]  }
 0x354   : > { %v1030_v16 = vld [vmem:[#allocation29] sm:$0x3]  ;;  %1872 = vmatpush3.bf16.msra.mxu0 %v2072_v25  ;;  %1895 = vmatprep.subr.bf16.mxu1 %v2710_v24  ;;  %v1824_v1 = vld [vmem:[%s849_s22] ss:$0 sm:$0xff]  ;;  %v2084_v13 = vld [vmem:[%s3413_s24 + $0x38] sm:$0xff]  }
 0x355   : > { %v1034_v17 = vsel %vm1033_vm1, %v1030_v16, 0.0  ;;  %1877 = vmatprep.subr.bf16.mxu0 %v2710_v24  ;;  %v1825_v3 = vld [vmem:[%s857_s1] ss:$0 sm:$0xff]  ;;  %p1839_p0 = scmp.ge.s32.totalorder %s3662_s28, 4 }
 0x356   : > { %1035 = vadd.xlane.f32.xlu0 %v1034_v17  ;;  %v2078_v7 = vld [vmem:[%s3413_s24 + $0x8] sm:$0xff]  }
 0x357   : > { %1896 = vmatpush3.bf16.msra.mxu1 %v2078_v7  ;;  %v2082_v11 = vld [vmem:[%s3413_s24 + $0x28] sm:$0xff]  }
 0x358   : > { %1897 = vmatprep.subr.bf16.mxu1 %v2710_v24  ;;  %v1826_v14 = vld [vmem:[%s874_s26] ss:$0 sm:$0xff] }
 0x35b   : > { %1898 = vmatpush3.bf16.msra.mxu1 %v2079_v8 }
 0x35c   : > { %1899 = vmatprep.subr.bf16.mxu1 %v2710_v24 }
 0x35f   : > { %1900 = vmatpush3.bf16.msra.mxu1 %v2080_v9 }
 0x360   : > { %1901 = vmatprep.subr.bf16.mxu1 %v2710_v24 }
 0x363   : > { %1902 = vmatpush3.bf16.msra.mxu1 %v2081_v10 }
 0x364   : > { %1903 = vmatprep.subr.bf16.mxu1 %v2710_v24 }
 0x367   : > { %1904 = vmatpush3.bf16.msra.mxu1 %v2082_v11 }
 0x368   : > { %1905 = vmatprep.subr.bf16.mxu1 %v2710_v24 }
 0x36b   : > { %1906 = vmatpush3.bf16.msra.mxu1 %v2083_v12 }
 0x36c   : > { %1907 = vmatprep.subr.bf16.mxu1 %v2710_v24 }
 0x36f   : > { %1908 = vmatpush3.bf16.msra.mxu1 %v2084_v13 }
 0x3e3   : > { %v1036_v18 = vpop.xlane.xlu0 %1035 }
 0x3e4   : > { %v1038_v19 = vmul.f32 0.03125, %v1036_v18 }
 0x3e6   : > { %v1039_v20 = vsub.f32 %v1030_v16, %v1038_v19 }
 0x3e8   : > { %v1040_v21 = vmul.f32 %v1039_v20, %v1039_v20 }
 0x3ea   : > { %v1041_v22 = vsel %vm1033_vm1, %v1040_v21, 0.0 }
 0x3eb   : > { %1042 = vadd.xlane.f32.xlu0 %v1041_v22 }
 0x478   : > { %v1043_v26 = vpop.xlane.xlu0 %1042 }
 0x479   : > { %v1044_v27 = vmul.f32 0.03125, %v1043_v26 }
 0x47b   : > { %v1045_v28 = vadd.f32 1e-05, %v1044_v27 }
 0x47d   : > { %2085 = vrsqrt.f32 %v1045_v28 }
 0x487   : > { %v2086_v29 = vpop.eup %2085 }
 0x488   : > { %v1047_v31 = vmul.f32 %v2086_v29, %v1039_v20 }
 0x48a   : > { %v1054_v33 = vmul.f32 %v1814_v30, %v1047_v31  ;;  %v1830_v30 = vld [vmem:[%s891_s15] ss:$0 sm:$0xff] }
 0x48c   : > { %v1061_v34 = vadd.f32 %v1815_v32, %v1054_v33 }
 0x48e   : > { %v1066_v36 = vpack.c.bf16 %v1061_v34, %v1061_v34 }
 0x490   : > { %1874 = vmatmul.mubr.msk.bf16.vlgmr.msra.gmra.mrb[0].mxu0 %vm1086_vm3, %v1066_v36 }
 0x491   : > { %1878 = vmatpush3.bf16.msra.mxu0 %v2073_v35  ;;  %1881 = vmatprep.mubr.msk.bf16.mxu0 %vm2711_vm2, %v2710_v24 }
 0x492   : > { %1879 = vmatprep.subr.bf16.mxu0 %v2710_v24 }
 0x495   : > { %1880 = vmatpush3.bf16.msra.mxu0 %v2074_v37 }
 0x496   : > { %1885 = vmatprep.subr.bf16.mxu0 %v2710_v24 }
 0x563   : > { %v1124_v39 = vpop.f32.mrb[0].mxu0 }
 0x564   : > { %v1125_v40 = vadd.f32 %v1816_v38, %v1124_v39  ;;  %v1875_v41 = vpop.f32.mrb[1].mxu0 }
 0x565   : > { %v1127_v42 = vpop.f32.mrb[2].mxu0 }
 0x566   : > { %v1134_v43 = vpack.c.bf16 %v1125_v40, %v1125_v40  ;;  %v1876_v44 = vpop.f32.mrb[3].mxu0 }
 0x568   : > { %1882 = vmatmul.mubr.msk.bf16.vlgmr.msra.gmra.mrb[4].mxu0 %vm1086_vm3, %v1134_v43 }
 0x569   : > { %1889 = vmatprep.mubr.msk.bf16.mxu0 %vm2711_vm2, %v2710_v24  ;;  %1886 = vmatpush3.bf16.msra.mxu0 %v2075_v58 }
 0x56a   : > { %1887 = vmatprep.subr.bf16.mxu0 %v2710_v24 }
 0x56d   : > { %1888 = vmatpush3.bf16.msra.mxu0 %v2076_v59 }
 0x63b   : > { %v1191_v46 = vpop.f32.mrb[4].mxu0 }
 0x63c   : > { %v1192_v47 = vadd.f32 %v1820_v45, %v1191_v46  ;;  %v1883_v48 = vpop.f32.mrb[5].mxu0 }
 0x63d   : > { %v1194_v49 = vpop.f32.mrb[6].mxu0 }
 0x63e   : > { %v3463_v50 = vadd.f32 %v1192_v47, %v1030_v16  ;;  %v1884_v51 = vpop.f32.mrb[7].mxu0 }
 0x640   : > { %v1200_v52 = vsel %vm1033_vm1, %v3463_v50, 0.0 }
 0x641   : > { %1201 = vadd.xlane.f32.xlu1 %v1200_v52 }
 0x6ce   : > { %v1202_v53 = vpop.xlane.xlu1 %1201 }
 0x6cf   : > { %v1203_v54 = vmul.f32 0.03125, %v1202_v53 }
 0x6d1   : > { %v1204_v55 = vsub.f32 %v3463_v50, %v1203_v54 }
 0x6d3   : > { %v1205_v56 = vmul.f32 %v1204_v55, %v1204_v55 }
 0x6d5   : > { %v1206_v57 = vsel %vm1033_vm1, %v1205_v56, 0.0 }
 0x6d6   : > { %1207 = vadd.xlane.f32.xlu1 %v1206_v57 }
 0x763   : > { %v1208_v61 = vpop.xlane.xlu1 %1207 }
 0x764   : > { %v1209_v62 = vmul.f32 0.03125, %v1208_v61 }
 0x766   : > { %v1210_v63 = vadd.f32 1e-05, %v1209_v62 }
 0x768   : > { %2087 = vrsqrt.f32 %v1210_v63 }
 0x772   : > { %v2088_v0 = vpop.eup %2087 }
 0x773   : > { %v1212_v2 = vmul.f32 %v2088_v0, %v1204_v55 }
 0x775   : > { %v1219_v4 = vmul.f32 %v1824_v1, %v1212_v2 }
 0x777   : > { %v1226_v5 = vadd.f32 %v1825_v3, %v1219_v4 }
 0x779   : > { %v1231_v6 = vpack.c.bf16 %v1226_v5, %v1226_v5 }
 0x77b   : > { %1890 = vmatmul.mubr.msk.bf16.vlgmr.msra.gmra.mrb[8].mxu0 %vm1086_vm3, %v1231_v6 }
 0x84e   : > { %v1288_v15 = vpop.f32.mrb[8].mxu0 }
 0x84f   : > { %v1289_v16 = vadd.f32 %v1826_v14, %v1288_v15  ;;  %v1891_v17 = vpop.f32.mrb[9].mxu0 }
 0x850   : > { %v1291_v18 = vpop.f32.mrb[10].mxu0 }
 0x851   : > { %v1295_v19 = vmul.f32 0.044715, %v1289_v16  ;;  %v1892_v20 = vpop.f32.mrb[11].mxu0  ;;  %v1294_v27 = vmul.f32 0.5, %v1289_v16 }
 0x853   : > { %v1296_v21 = vmul.f32 %v1295_v19, %v1289_v16 }
 0x855   : > { %v1297_v22 = vmul.f32 %v1296_v21, %v1289_v16 }
 0x857   : > { %v1298_v23 = vadd.f32 %v1297_v22, %v1289_v16 }
 0x859   : > { %v1299_v25 = vmul.f32 0.7978846, %v1298_v23 }
 0x85b   : > { %2089 = vtanh.f32 %v1299_v25 }
 0x865   : > { %v2090_v26 = vpop.eup %2089 }
 0x866   : > { %v1301_v28 = vadd.f32 1.0, %v2090_v26 }
 0x868   : > { %v1302_v29 = vmul.f32 %v1301_v28, %v1294_v27 }
 0x86a   : > { %v1319_v24 = vpack.c.bf16 %v1302_v29, %v1302_v29 }
 0x86c   : > { %1910 = vmatmul.mubr.bf16.vlgmr.msra.gmra.mrb[0].mxu1 %v1319_v24 }
 0x93c   : > { %1419 = sbr.rel (%p1839_p0) target bundleno = 2373 (0x945), region = 164 }
 0x93f   : > { %v1409_v31 = vpop.f32.mrb[0].mxu1 }
 0x940   : > { %v1410_v32 = vadd.f32 %v1830_v30, %v1409_v31  ;;  %v1911_v33 = vpop.f32.mrb[1].mxu1 }
 0x941   : > { %v1412_v34 = vpop.f32.mrb[2].mxu1 }
 0x942   : > { %v1415_v35 = vadd.f32 %v1410_v32, %v3463_v50  ;;  %v1912_v36 = vpop.f32.mrb[3].mxu1 }
 0x944   : > { %1420 = vst.msk [vmem:[#allocation29] sm:$0x3] %vm1033_vm1, %v1415_v35 }
 0x945 PF: > { %s3663_s21 = sld [smem:[#allocation42_spill]] }
 0x94b   : > { %p1840_p3 = scmp.ne.s32.totalorder %s3663_s21, 4 }
 0x94c   : > { %v1427_v37 = vsel (!%p1840_p3), %vm1033_vm1, %v1415_v35, 0.0  ;;  %v1841_v47 = vld [vmem:[#allocation26] ss:$0 sm:$0xff] (!%p1840_p3)  ;;  %v1842_v49 = vld [vmem:[#allocation28] ss:$0 sm:$0xff] (!%p1840_p3) }
 0x94d   : > { %1424 = sbr.rel (%p1840_p3) target bundleno = 2694 (0xa86), region = 168  ;;  %1428 = vadd.xlane.f32.xlu0 (!%p1840_p3), %v1427_v37 }
 0x9da   : > { %v1429_v38 = vpop.xlane.xlu0 %1428 }
 0x9db   : > { %v1430_v39 = vmul.f32 0.03125, %v1429_v38 }
 0x9dd   : > { %v1431_v40 = vsub.f32 %v1415_v35, %v1430_v39 }
 0x9df   : > { %v1432_v41 = vmul.f32 %v1431_v40, %v1431_v40 }
 0x9e1   : > { %v1433_v42 = vsel %vm1033_vm1, %v1432_v41, 0.0 }
 0x9e2   : > { %1434 = vadd.xlane.f32.xlu0 %v1433_v42 }
 0xa6f   : > { %v1435_v43 = vpop.xlane.xlu0 %1434 }
 0xa70   : > { %v1436_v44 = vmul.f32 0.03125, %v1435_v43 }
 0xa72   : > { %v1437_v45 = vadd.f32 1e-05, %v1436_v44 }
 0xa74   : > { %2091 = vrsqrt.f32 %v1437_v45 }
 0xa7e   : > { %v2092_v46 = vpop.eup %2091 }
 0xa7f   : > { %v1439_v48 = vmul.f32 %v2092_v46, %v1431_v40 }
 0xa81   : > { %v1446_v50 = vmul.f32 %v1841_v47, %v1439_v48 }
 0xa83   : > { %v1453_v51 = vadd.f32 %v1842_v49, %v1446_v50 }
 0xa85   : > { %1454 = vst.msk [vmem:[#allocation29] sm:$0x3] %vm1033_vm1, %v1453_v51 }
 0xa86 PF: > { %s3664_s10 = sld [smem:[#allocation42_spill]]  ;;  %s2712_s27 = smov [#allocation29]  }
 0xa87   : > { %s1462_s20 = sshll.u32 %s2712_s27, 4  ;;  %s1463_s20 = int_to_ptr.vmem [resolvable:$true] %s1462_s20 }
 0xa88   : > { %s2593_s0 = scalar_lea.vmem %s1463_s20, 32  ;;  %p2600_p5 = scmp.lt.s32.totalorder %s1463_s20, %s1463_s20 }
 0xa89   : > { %p2594_p7 = scmp.ne.s32.totalorder %s1463_s20, %s2593_s0  ;;  %p2601_p9 = scmp.lt.s32.totalorder %s2593_s0, %s2593_s0 }
 0xa8b   : > { %p2602_p6 = por %p2601_p9, %p2600_p5 }
 0xa8c   : > { %p2025_p11 = scmp.eq.s32.totalorder %s3664_s10, 4 }
 0xa8e   : > { %p2595_p10 = pnand %p2594_p7, %p2025_p11 }
 0xa90   : > { %p2596_p4 = pneg %p2595_p10 }
 0xa92   : > { %p2603_p13 = pnand %p2602_p6, %p2596_p4 }
 0xa94   : > { %2606 = shalt.err (!%p2603_p13)
}
 0xa95   : > { %s3665_s3 = sld [smem:[#allocation57_spill]] }
 0xa9b   : > { %s2607_s23 = scalar_lea.hbm %s3665_s3, 32 }
 0xa9c   : > { %p2608_p2 = scmp.ne.s32.totalorder %s3665_s3, %s2607_s23  ;;  %p2613_p1 = scmp.lt.u32.totalorder %s2607_s23, %s3665_s3 }
 0xa9e   : > { %p2609_p8 = pnand %p2608_p2, %p2025_p11 }
 0xaa0   : > { %p2610_p12 = pneg %p2609_p8 }
 0xaa2   : > { %p2615_p0 = pnand %p2613_p1, %p2610_p12 }
 0xaa4   : > { %2618 = shalt.err (!%p2615_p0)
}
 0xaa5   : > { %1958 = dma.vmem_to_hbm [thread:$0]  (%p2025_p11), %s1463_s20, 32, %s3665_s3, [#allocation4]  }
 0xaa6   : > { %2672 = dma.done.wait (%p2025_p11), [#allocation4], 32  }
 0xaa7   : > { %2674 = vsyncadd (%p2025_p11), [#allocation4], 4294967264 }
 0xaa8 PF: > { %s3666_s27 = sld [smem:[#allocation43_spill]]  ;;  %s3667_s24 = sld [smem:[#allocation40_spill]] }
 0xaa9   : > { %s3668_s25 = sld [smem:[#allocation41_spill]]  ;;  %s3669_s26 = sld [smem:[#allocation44_spill]] }
 0xaae   : > { %p46_p3 = scmp.ge.s32.totalorder %s3666_s27, 7  }
 0xab0   :  { %48 = sbr.rel (!%p46_p3) target bundleno = 29 (0x1d), region = 289 }
 0xab7   :  { %1475 = vsyncpa [#allocation3], 1 }
 0xab8   :  { %1477 = vsyncpa [#allocation3 + $0x1], 1 }
 0xab9   :  { %1478 = vsyncpa [#allocation6], 1 }
 0xaba   :  { %1479 = vsyncpa [#allocation9], 1 }
 0xabb   :  { %1481 = vsyncpa [#allocation9 + $0x1], 1 }
 0xabc   :  { %1482 = vsyncpa [#allocation12], 1 }
 0xabd   :  { %1484 = vsyncpa [#allocation12 + $0x1], 1 }
 0xabe   :  { %1485 = vsyncpa [#allocation15], 1 }
 0xabf   :  { %1487 = vsyncpa [#allocation15 + $0x1], 1 }
 0xac0   :  { %1488 = vsyncpa [#allocation18], 1 }
 0xac1   :  { %1490 = vsyncpa [#allocation18 + $0x1], 1 }
 0xac2   :  { %1491 = vsyncpa [#allocation21], 1 }
 0xac3   :  { %1493 = vsyncpa [#allocation21 + $0x1], 1 }
 0xac4   :  { %1494 = vsyncpa [#allocation24], 1 }
 0xac5   :  { %1496 = vsyncpa [#allocation24 + $0x1], 1 }
 0xac6   :  { %1497 = vsyncpa [#allocation27], 1 }
 0xac7   :  { %1498 = vsyncpa [#allocation4], 1 }
 0xac8   :  { %1500 = vsyncpa [#allocation4 + $0x1], 1 }

// kernel: frozen_clip_image_embedder.4
= control target key start
LH: loop header
LB: loop body
LE: loop exit
PB: predicated region body
PF: predicated region fallthrough
CT: control target
= control target key end

     0   :  { %s4269_s0 = inlined_call_operand.hbm [shape: f32[2,8,32], index: 0, kind: input, shape index: {}]   ;;  %s4270_s1 = inlined_call_operand.hbm [shape: f32[2,1,32], index: 1, kind: input, shape index: {}]   ;;  %s4271_s2 = inlined_call_operand.hbm [shape: f32[2,1,32], index: 2, kind: input, shape index: {}]   ;;  %s4272_s3 = inlined_call_operand.hbm [shape: bf16[2,32,96], index: 3, kind: input, shape index: {}]   ;;  %s4273_s4 = inlined_call_operand.hbm [shape: f32[2,1,96], index: 4, kind: input, shape index: {}]   ;;  %s4274_s5 = inlined_call_operand.hbm [shape: bf16[2,32,32], index: 5, kind: input, shape index: {}]   ;;  %s4275_s6 = inlined_call_operand.hbm [shape: f32[2,1,32], index: 6, kind: input, shape index: {}]   ;;  %s4276_s7 = inlined_call_operand.hbm [shape: f32[2,1,32], index: 7, kind: input, shape index: {}]   ;;  %s4277_s8 = inlined_call_operand.hbm [shape: f32[2,1,32], index: 8, kind: input, shape index: {}]   ;;  %s4278_s9 = inlined_call_operand.hbm [shape: bf16[2,32,128], index: 9, kind: input, shape index: {}]   ;;  %s4279_s10 = inlined_call_operand.hbm [shape: f32[2,1,128], index: 10, kind: input, shape index: {}]   ;;  %s4280_s11 = inlined_call_operand.hbm [shape: bf16[2,128,32], index: 11, kind: input, shape index: {}]   ;;  %s4281_s12 = inlined_call_operand.hbm [shape: f32[2,1,32], index: 12, kind: input, shape index: {}]   ;;  %s4282_s13 = inlined_call_operand.hbm [shape: f32[2,8,32], index: 13, kind: output, shape index: {}]  }
   0x1   :  { %4319 = sst [smem:[#allocation45_spill]] %s4269_s0 }
   0x2   :  { %4320 = sst [smem:[#allocation46_spill]] %s4270_s1 }
   0x3   :  { %4321 = sst [smem:[#allocation47_spill]] %s4271_s2 }
   0x4   :  { %4322 = sst [smem:[#allocation48_spill]] %s4272_s3 }
   0x5   :  { %4323 = sst [smem:[#allocation49_spill]] %s4273_s4 }
   0x6   :  { %4324 = sst [smem:[#allocation50_spill]] %s4274_s5 }
   0x7   :  { %4325 = sst [smem:[#allocation51_spill]] %s4275_s6 }
   0x8   :  { %4326 = sst [smem:[#allocation52_spill]] %s4276_s7 }
   0x9   :  { %4327 = sst [smem:[#allocation53_spill]] %s4277_s8 }
   0xa   :  { %4328 = sst [smem:[#allocation54_spill]] %s4278_s9 }
   0xb   :  { %4329 = sst [smem:[#allocation55_spill]] %s4279_s10 }
   0xc   :  { %4330 = sst [smem:[#allocation56_spill]] %s4280_s11 }
   0xd   :  { %4331 = sst [smem:[#allocation57_spill]] %s4281_s12 }
   0xe   :  { %4332 = sst [smem:[#allocation58_spill]] %s4282_s13 }
   0xf   :  { %18 = vsyncpa [#allocation4], 0 }
  0x10   :  { %20 = vsyncpa [#allocation4 + $0x1], 0 }
  0x11   :  { %21 = vsyncpa [#allocation7], 0 }
  0x12   :  { %23 = vsyncpa [#allocation7 + $0x1], 0 }
  0x13   :  { %24 = vsyncpa [#allocation10], 0 }
  0x14   :  { %26 = vsyncpa [#allocation10 + $0x1], 0 }
  0x15   :  { %27 = vsyncpa [#allocation13], 0 }
  0x16   :  { %29 = vsyncpa [#allocation13 + $0x1], 0 }
  0x17   :  { %30 = vsyncpa [#allocation16], 0 }
  0x18   :  { %32 = vsyncpa [#allocation16 + $0x1], 0 }
  0x19   :  { %33 = vsyncpa [#allocation19], 0 }
  0x1a   :  { %35 = vsyncpa [#allocation19 + $0x1], 0 }
  0x1b   :  { %36 = vsyncpa [#allocation22], 0 }
  0x1c   :  { %38 = vsyncpa [#allocation22 + $0x1], 0 }
  0x1d   :  { %39 = vsyncpa [#allocation5], 0 }
  0x1e   :  { %41 = vsyncpa [#allocation5 + $0x1], 0  ;;  %s3400_s25 = smov 0   ;;  %s3402_s26 = smov 0  }
  0x1f   :  { %s3404_s27 = smov 0   ;;  %s3406_s28 = smov 0  }
  0x20   :  { %s3408_s29 = smov 0   ;;  %s3410_s30 = smov 0  }
  0x21   :  { %s3412_s14 = smov 0   ;;  %s3414_s15 = smov 0  }
  0x22   :  { %s3416_s16 = smov 0   ;;  %s3418_s17 = smov 0  }
  0x23   :  { %s3420_s18 = smov 0  }
  0x24 LB: > { %4333 = sst [smem:[#allocation33_spill]] %s3260_s26  ;;  %p4290_p0 = scmp.eq.s32.totalorder %s3296_s18, 0  ;;  %s3296_s18 = sphi %s3420_s18, %s47_s18   ;;  %s3292_s17 = sphi %s3418_s17, %s4409_s17   ;;  %s3288_s16 = sphi %s3416_s16, %s4408_s16   ;;  %s3284_s15 = sphi %s3414_s15, %s4407_s15   ;;  %s3280_s14 = sphi %s3412_s14, %s4406_s14   ;;  %s3276_s30 = sphi %s3410_s30, %s4405_s30   ;;  %s3272_s29 = sphi %s3408_s29, %s4411_s29   ;;  %s3268_s28 = sphi %s3406_s28, %s4410_s28   ;;  %s3264_s27 = sphi %s3404_s27, %s4403_s27   ;;  %s3260_s26 = sphi %s3402_s26, %s4402_s26   ;;  %s3256_s25 = sphi %s3400_s25, %s4401_s25  }
  0x25   : > { %4334 = sst [smem:[#allocation34_spill]] %s3264_s27  ;;  %p99_p1 = scmp.ne.s32.totalorder %s3264_s27, %s3260_s26 }
  0x26   : > { %4335 = sst [smem:[#allocation35_spill]] %s3276_s30  ;;  %p4289_p2 = scmp.lt.s32.totalorder %s3296_s18, 4 }
  0x27   : > { %4336 = sst [smem:[#allocation36_spill]] %s3280_s14  ;;  %p101_p3 = por %p99_p1, %p4290_p0 }
  0x28   : > { %4337 = sst [smem:[#allocation37_spill]] %s3284_s15  ;;  %s3462_s19 = sand.u32 1, %s3296_s18  }
  0x29   : > { %4338 = sst [smem:[#allocation38_spill]] %s3288_s16  ;;  %s3465_s20 = sand.u32 1, %s3264_s27  }
  0x2a   : > { %4339 = sst [smem:[#allocation39_spill]] %s3292_s17  ;;  %s3468_s21 = sshll.u32 %s3288_s16, 4 }
  0x2b   : > { %s4340_s1 = sld [smem:[#allocation46_spill]]  ;;  %s462_s13 = scalar_lea.vmem [#allocation6], %s3465_s20 }
  0x2c   : > { %s469_s15 = sshll.u32 %s462_s13, 4  ;;  %p3481_p4 = pnand %p4289_p2, %p101_p3  ;;  %s3477_s15 = int_to_ptr.vmem [resolvable:$true] %s469_s15 }
  0x2e   : > { %s4341_s14 = scalar_select %p3481_p4, 1, 0 }
  0x2f   : > { %p3492_p8 = pneg %p3481_p4 }
  0x31   : > { %s3474_s24 = scalar_lea.hbm %s4340_s1, %s3468_s21  ;;  %s2765_s8 = scalar_lea.hbm %s4340_s1, 32 }
  0x32   : > { %s2760_s22 = scalar_lea.hbm %s3474_s24, 16  ;;  %p2766_p11 = scmp.lt.u32.totalorder %s3474_s24, %s4340_s1 }
  0x33   : > { %p2761_p7 = scmp.ne.s32.totalorder %s3474_s24, %s2760_s22  ;;  %p2767_p12 = scmp.lt.u32.totalorder %s2765_s8, %s2760_s22 }
  0x34   : > { %p2769_p1 = scmp.lt.u32.totalorder %s2760_s22, %s3474_s24 }
  0x35   : > { %p2763_p9 = pnand %p3492_p8, %p2761_p7  ;;  %p2768_p13 = por %p2767_p12, %p2766_p11 }
  0x37   : > { %p2764_p10 = pneg %p2763_p9  ;;  %p2770_p3 = por %p2769_p1, %p2768_p13 }
  0x39   : > { %p2771_p2 = pnand %p2770_p3, %p2764_p10 }
  0x3b   : > { %2774 = shalt.err (!%p2771_p2)
}
  0x3c   : > { %s2775_s12 = scalar_lea.vmem %s3477_s15, 16  ;;  %s3298_s10 = smov [#allocation6]  }
  0x3d   : > { %p2776_p7 = scmp.ne.s32.totalorder %s3477_s15, %s2775_s12  ;;  %s2780_s13 = sshll.u32 %s3298_s10, 4  ;;  %s2781_s13 = int_to_ptr.vmem [resolvable:$false] %s2780_s13 }
  0x3e   : > { %s2782_s4 = scalar_lea.vmem %s2781_s13, 32  ;;  %p2783_p5 = scmp.lt.s32.totalorder %s3477_s15, %s2781_s13 }
  0x3f   : > { %p2778_p9 = pnand %p2776_p7, %p3492_p8  ;;  %p2784_p6 = scmp.lt.s32.totalorder %s2782_s4, %s2775_s12 }
  0x41   : > { %p2779_p0 = pneg %p2778_p9  ;;  %p2785_p11 = por %p2784_p6, %p2783_p5 }
  0x43   : > { %p2786_p12 = pnand %p2785_p11, %p2779_p0 }
  0x45   : > { %2789 = shalt.err (!%p2786_p12)
}
  0x46   : > { %s4343_s6 = scalar_lea.sflag [#allocation7], %s3462_s19  ;;  %p4344_p2 = scmp.lt.s32.totalorder %s3296_s18, 5 }
  0x47   : > { %2576 = dma.hbm_to_vmem [thread:$0]  (!%p3481_p4), %s3474_s24, 16, %s3477_s15, %s4343_s6  }
  0x48   : > { %p4345_p10 = scmp.ge.s32.totalorder %s3296_s18, 1  ;;  %s3526_s12 = sshll.u32 %s3465_s20, 4 }
  0x49   : > { %s3529_s22 = sshll.u32 %s3288_s16, 8  ;;  %s4348_s3 = sld [smem:[#allocation48_spill]] }
  0x4a   : > { %p3521_p13 = pnand %p4345_p10, %p4344_p2  ;;  %s497_s15 = scalar_lea.vmem [#allocation9], %s3526_s12 }
  0x4b   : > { %s504_s24 = sshll.u32 %s497_s15, 4  ;;  %s4295_s6 = scalar_lea.sflag [#allocation10], %s3462_s19  ;;  %s3538_s24 = int_to_ptr.vmem [resolvable:$true] %s504_s24 }
  0x4c   : > { %s4346_s8 = scalar_select %p3521_p13, 1, 0 }
  0x4e   : > { %4347 = sst [smem:[#allocation40_spill]] %s4346_s8 }
  0x4f   : > { %s3535_s4 = scalar_lea.hbm %s4348_s3, %s3529_s22  ;;  %s2795_s10 = scalar_lea.hbm %s4348_s3, 512 }
  0x50   : > { %s2790_s1 = scalar_lea.hbm %s3535_s4, 256  ;;  %p2796_p1 = scmp.lt.u32.totalorder %s3535_s4, %s4348_s3 }
  0x51   : > { %p2791_p0 = scmp.ne.s32.totalorder %s3535_s4, %s2790_s1  ;;  %p2797_p3 = scmp.lt.u32.totalorder %s2795_s10, %s2790_s1 }
  0x52   : > { %p2799_p9 = scmp.lt.u32.totalorder %s2790_s1, %s3535_s4 }
  0x53   : > { %p2793_p5 = pnand %p2791_p0, %p3492_p8  ;;  %p2798_p7 = por %p2797_p3, %p2796_p1 }
  0x55   : > { %p2794_p6 = pneg %p2793_p5  ;;  %p2800_p11 = por %p2799_p9, %p2798_p7 }
  0x57   : > { %p2801_p12 = pnand %p2800_p11, %p2794_p6 }
  0x59   : > { %2804 = shalt.err (!%p2801_p12)
}
  0x5a   : > { %s2805_s15 = scalar_lea.vmem %s3538_s24, 256  ;;  %s3299_s2 = smov [#allocation9]  }
  0x5b   : > { %p2806_p2 = scmp.ne.s32.totalorder %s3538_s24, %s2805_s15  ;;  %s2810_s8 = sshll.u32 %s3299_s2, 4  ;;  %s2811_s8 = int_to_ptr.vmem [resolvable:$false] %s2810_s8 }
  0x5c   : > { %s2812_s0 = scalar_lea.vmem %s2811_s8, 512  ;;  %p2813_p5 = scmp.lt.s32.totalorder %s3538_s24, %s2811_s8 }
  0x5d   : > { %p2808_p10 = pnand %p2806_p2, %p3492_p8  ;;  %p2814_p13 = scmp.lt.s32.totalorder %s2812_s0, %s2805_s15 }
  0x5f   : > { %p2809_p0 = pneg %p2808_p10  ;;  %p2815_p1 = por %p2814_p13, %p2813_p5 }
  0x61   : > { %p2816_p3 = pnand %p2815_p1, %p2809_p0 }
  0x63   : > { %2819 = shalt.err (!%p2816_p3)
}
  0x64   : > { %s4297_s1 = smov 64   ;;  %s3301_s10 = smov 4  }
  0x65   : > { %2582 = dma.hbm_to_vmem [thread:$0]  (!%p3481_p4), %s3535_s4, 256, %s3538_s24, %s4295_s6, %s4297_s1, %s4297_s1, %s3301_s10  }
  0x66   : > { %s4349_s5 = sld [smem:[#allocation50_spill]]  ;;  %s535_s8 = scalar_lea.vmem [#allocation12], %s3526_s12 }
  0x67   : > { %s542_s0 = sshll.u32 %s535_s8, 4  ;;  %s4296_s3 = scalar_lea.sflag [#allocation13], %s3462_s19  ;;  %s3574_s0 = int_to_ptr.vmem [resolvable:$true] %s542_s0 }
  0x6c   : > { %s3571_s2 = scalar_lea.hbm %s4349_s5, %s3529_s22  ;;  %s2825_s13 = scalar_lea.hbm %s4349_s5, 512 }
  0x6d   : > { %s2820_s26 = scalar_lea.hbm %s3571_s2, 256  ;;  %p2826_p9 = scmp.lt.u32.totalorder %s3571_s2, %s4349_s5 }
  0x6e   : > { %p2821_p13 = scmp.ne.s32.totalorder %s3571_s2, %s2820_s26  ;;  %p2827_p11 = scmp.lt.u32.totalorder %s2825_s13, %s2820_s26 }
  0x6f   : > { %p2829_p2 = scmp.lt.u32.totalorder %s2820_s26, %s3571_s2 }
  0x70   : > { %p2823_p6 = pnand %p2821_p13, %p3492_p8  ;;  %p2828_p12 = por %p2827_p11, %p2826_p9 }
  0x72   : > { %p2824_p7 = pneg %p2823_p6  ;;  %p2830_p10 = por %p2829_p2, %p2828_p12 }
  0x74   : > { %p2831_p0 = pnand %p2830_p10, %p2824_p7 }
  0x76   : > { %2834 = shalt.err (!%p2831_p0)
}
  0x77   : > { %s2835_s8 = scalar_lea.vmem %s3574_s0, 256  ;;  %s3302_s4 = smov [#allocation12]  }
  0x78   : > { %p2836_p5 = scmp.ne.s32.totalorder %s3574_s0, %s2835_s8  ;;  %s2840_s24 = sshll.u32 %s3302_s4, 4  ;;  %s2841_s24 = int_to_ptr.vmem [resolvable:$false] %s2840_s24 }
  0x79   : > { %s2842_s6 = scalar_lea.vmem %s2841_s24, 512  ;;  %p2843_p13 = scmp.lt.s32.totalorder %s3574_s0, %s2841_s24 }
  0x7a   : > { %p2838_p1 = pnand %p2836_p5, %p3492_p8  ;;  %p2844_p6 = scmp.lt.s32.totalorder %s2842_s6, %s2835_s8 }
  0x7c   : > { %p2839_p3 = pneg %p2838_p1  ;;  %p2845_p9 = por %p2844_p6, %p2843_p13 }
  0x7e   : > { %p2846_p11 = pnand %p2845_p9, %p2839_p3 }
  0x80   : > { %2849 = shalt.err (!%p2846_p11)
}
  0x81   : > { %2588 = dma.hbm_to_vmem [thread:$0]  (!%p3481_p4), %s3571_s2, 256, %s3574_s0, %s4296_s3, %s4297_s1, %s4297_s1, %s3301_s10  }
  0x82   : > { %s4350_s7 = sld [smem:[#allocation52_spill]]  ;;  %s572_s8 = scalar_lea.vmem [#allocation15], %s3465_s20 }
  0x83   : > { %s579_s4 = sshll.u32 %s572_s8, 4  ;;  %s4303_s24 = scalar_lea.sflag [#allocation16], %s3462_s19  ;;  %s580_s4 = int_to_ptr.vmem [resolvable:$true] %s579_s4 }
  0x88   : > { %s3607_s15 = scalar_lea.hbm %s4350_s7, %s3468_s21  ;;  %s2855_s0 = scalar_lea.hbm %s4350_s7, 32 }
  0x89   : > { %s2850_s6 = scalar_lea.hbm %s3607_s15, 16  ;;  %p2856_p10 = scmp.lt.u32.totalorder %s3607_s15, %s4350_s7 }
  0x8a   : > { %p2851_p7 = scmp.ne.s32.totalorder %s3607_s15, %s2850_s6  ;;  %p2857_p0 = scmp.lt.u32.totalorder %s2855_s0, %s2850_s6 }
  0x8b   : > { %p2859_p1 = scmp.lt.u32.totalorder %s2850_s6, %s3607_s15 }
  0x8c   : > { %p2853_p12 = pnand %p2851_p7, %p3492_p8  ;;  %p2858_p5 = por %p2857_p0, %p2856_p10 }
  0x8e   : > { %p2854_p2 = pneg %p2853_p12  ;;  %p2860_p3 = por %p2859_p1, %p2858_p5 }
  0x90   : > { %p2861_p13 = pnand %p2860_p3, %p2854_p2 }
  0x92   : > { %2864 = shalt.err (!%p2861_p13)
}
  0x93   : > { %s2865_s8 = scalar_lea.vmem %s580_s4, 16  ;;  %s3303_s3 = smov [#allocation15]  }
  0x94   : > { %p2866_p6 = scmp.ne.s32.totalorder %s580_s4, %s2865_s8  ;;  %s2870_s1 = sshll.u32 %s3303_s3, 4  ;;  %s2871_s1 = int_to_ptr.vmem [resolvable:$false] %s2870_s1 }
  0x95   : > { %s2872_s5 = scalar_lea.vmem %s2871_s1, 32  ;;  %p2873_p7 = scmp.lt.s32.totalorder %s580_s4, %s2871_s1 }
  0x96   : > { %p2868_p9 = pnand %p2866_p6, %p3492_p8  ;;  %p2874_p12 = scmp.lt.s32.totalorder %s2872_s5, %s2865_s8 }
  0x98   : > { %p2869_p11 = pneg %p2868_p9  ;;  %p2875_p4 = por %p2874_p12, %p2873_p7 }
  0x9a   : > { %p2876_p0 = pnand %p2875_p4, %p2869_p11 }
  0x9c   : > { %2879 = shalt.err (!%p2876_p0)
}
  0x9d   : > { %p4351_p10 = scmp.ne.s32.totalorder %s4341_s14, 0  ;;  %s4352_s9 = sld [smem:[#allocation54_spill]] }
  0x9e   : > { %s607_s1 = scalar_lea.vmem [#allocation18], %s3526_s12  ;;  %s2366_s26 = sshll.u32 %s3465_s20, 6 }
  0x9f   : > { %2594 = dma.hbm_to_vmem [thread:$0]  (!%p4351_p10), %s3607_s15, 16, %s580_s4, %s4303_s24  }
  0xa0   : > { %s614_s0 = sshll.u32 %s607_s1, 4  ;;  %s4302_s13 = scalar_lea.sflag [#allocation19], %s3462_s19  ;;  %s3637_s0 = int_to_ptr.vmem [resolvable:$true] %s614_s0 }
  0xa3   : > { %s3634_s2 = scalar_lea.hbm %s4352_s9, %s3529_s22  ;;  %s2885_s22 = scalar_lea.hbm %s4352_s9, 512 }
  0xa4   : > { %s2880_s8 = scalar_lea.hbm %s3634_s2, 256  ;;  %p2886_p1 = scmp.lt.u32.totalorder %s3634_s2, %s4352_s9 }
  0xa5   : > { %p2881_p4 = scmp.ne.s32.totalorder %s3634_s2, %s2880_s8  ;;  %p2887_p3 = scmp.lt.u32.totalorder %s2885_s22, %s2880_s8 }
  0xa6   : > { %p2889_p6 = scmp.lt.u32.totalorder %s2880_s8, %s3634_s2 }
  0xa7   : > { %p2883_p2 = pnand %p2881_p4, %p3492_p8  ;;  %p2888_p13 = por %p2887_p3, %p2886_p1 }
  0xa9   : > { %p2884_p5 = pneg %p2883_p2  ;;  %p2890_p9 = por %p2889_p6, %p2888_p13 }
  0xab   : > { %p2891_p11 = pnand %p2890_p9, %p2884_p5 }
  0xad   : > { %2894 = shalt.err (!%p2891_p11)
}
  0xae   : > { %s2895_s12 = scalar_lea.vmem %s3637_s0, 256  ;;  %s3304_s3 = smov [#allocation18]  }
  0xaf   : > { %p2896_p7 = scmp.ne.s32.totalorder %s3637_s0, %s2895_s12  ;;  %s2900_s1 = sshll.u32 %s3304_s3, 4  ;;  %s2901_s1 = int_to_ptr.vmem [resolvable:$false] %s2900_s1 }
  0xb0   : > { %s2902_s15 = scalar_lea.vmem %s2901_s1, 512  ;;  %p2903_p4 = scmp.lt.s32.totalorder %s3637_s0, %s2901_s1 }
  0xb1   : > { %p2898_p12 = pnand %p2896_p7, %p3492_p8  ;;  %p2904_p2 = scmp.lt.s32.totalorder %s2902_s15, %s2895_s12 }
  0xb3   : > { %p2899_p0 = pneg %p2898_p12  ;;  %p2905_p1 = por %p2904_p2, %p2903_p4 }
  0xb5   : > { %p2906_p3 = pnand %p2905_p1, %p2899_p0 }
  0xb7   : > { %2909 = shalt.err (!%p2906_p3)
}
  0xb8   : > { %s4353_s8 = smov 64   ;;  %s2423_s4 = sshll.u32 %s3288_s16, 10 }
  0xb9   : > { %2600 = dma.hbm_to_vmem [thread:$0]  (!%p4351_p10), %s3634_s2, 256, %s3637_s0, %s4302_s13, %s4353_s8, %s4353_s8, %s3301_s10  }
  0xba   : > { %s4354_s11 = sld [smem:[#allocation56_spill]]  ;;  %s645_s12 = scalar_lea.vmem [#allocation21], %s2366_s26 }
  0xbb   : > { %s652_s3 = sshll.u32 %s645_s12, 4  ;;  %s4301_s1 = scalar_lea.sflag [#allocation22], %s3462_s19  ;;  %s3675_s3 = int_to_ptr.vmem [resolvable:$true] %s652_s3 }
  0xc0   : > { %s3671_s6 = scalar_lea.hbm %s4354_s11, %s2423_s4  ;;  %s2915_s4 = scalar_lea.hbm %s4354_s11, 2048 }
  0xc1   : > { %s2910_s15 = scalar_lea.hbm %s3671_s6, 1024  ;;  %p2916_p9 = scmp.lt.u32.totalorder %s3671_s6, %s4354_s11 }
  0xc2   : > { %p2911_p5 = scmp.ne.s32.totalorder %s3671_s6, %s2910_s15  ;;  %p2917_p11 = scmp.lt.u32.totalorder %s2915_s4, %s2910_s15 }
  0xc3   : > { %p2919_p12 = scmp.lt.u32.totalorder %s2910_s15, %s3671_s6 }
  0xc4   : > { %p2913_p13 = pnand %p2911_p5, %p3492_p8  ;;  %p2918_p7 = por %p2917_p11, %p2916_p9 }
  0xc6   : > { %p2914_p6 = pneg %p2913_p13  ;;  %p2920_p0 = por %p2919_p12, %p2918_p7 }
  0xc8   : > { %p2921_p4 = pnand %p2920_p0, %p2914_p6 }
  0xca   : > { %2924 = shalt.err (!%p2921_p4)
}
  0xcb   : > { %s2925_s26 = scalar_lea.vmem %s3675_s3, 1024  ;;  %s3305_s12 = smov [#allocation21]  }
  0xcc   : > { %p2926_p2 = scmp.ne.s32.totalorder %s3675_s3, %s2925_s26  ;;  %s2930_s2 = sshll.u32 %s3305_s12, 4  ;;  %s2931_s2 = int_to_ptr.vmem [resolvable:$false] %s2930_s2 }
  0xcd   : > { %s2932_s0 = scalar_lea.vmem %s2931_s2, 2048  ;;  %p2933_p5 = scmp.lt.s32.totalorder %s3675_s3, %s2931_s2 }
  0xce   : > { %p2928_p1 = pnand %p2926_p2, %p3492_p8  ;;  %p2934_p13 = scmp.lt.s32.totalorder %s2932_s0, %s2925_s26 }
  0xd0   : > { %p2929_p3 = pneg %p2928_p1  ;;  %p2935_p9 = por %p2934_p13, %p2933_p5 }
  0xd2   : > { %p2936_p11 = pnand %p2935_p9, %p2929_p3 }
  0xd4   : > { %2939 = shalt.err (!%p2936_p11)
}
  0xd5   : > { %2606 = dma.hbm_to_vmem [thread:$0]  (!%p4351_p10), %s3671_s6, 1024, %s3675_s3, %s4301_s1, %s4353_s8, %s4353_s8, %s3301_s10  }
  0xd6   : > { %s3705_s15 = sadd.s32 4294967295, %s3296_s18   ;;  %s2345_s4 = sadd.s32 4294967294, %s3296_s18  }
  0xd7   : > { %s56_s22 = sadd.s32 1, %s3288_s16  ;;  %s4355_s5 = sld [smem:[#allocation33_spill]] }
  0xd8   : > { %p57_p6 = scmp.ge.s32.totalorder %s56_s22, 2  ;;  %s59_s26 = sadd.s32 1, %s3292_s17 }
  0xd9   : > { %s66_s12 = sadd.s32 1, %s3276_s30  ;;  %p73_p7 = scmp.ne.s32.totalorder %s3276_s30, %s3272_s29 }
  0xda   : > { %s4413_s22 = smov (%p57_p6, %s56_s22), 0  ;;  %s4415_s26 = smov (!%p57_p6, %s59_s26), %s3292_s17 }
  0xdb   : > { %4356 = sst [smem:[#allocation41_spill]] %s4413_s22  ;;  %p4357_p12 = scmp.eq.s32.totalorder %s3296_s18, 0 }
  0xdc   : > { %p79_p4 = scmp.ne.s32.totalorder %s3272_s29, %s3268_s28  ;;  %p61_p2 = scmp.ge.s32.totalorder %s4415_s26, 2 }
  0xdd   : > { %p3721_p0 = por %p4357_p12, %p73_p7  ;;  %p80_p1 = scmp.eq.s32.totalorder %s3705_s15, 0 }
  0xde   : > { %s89_s8 = ssub.s32 %s3288_s16, %s4413_s22  ;;  %s92_s6 = sadd.s32 1, %s3264_s27 }
  0xdf   : > { %s4417_s26 = smov (%p61_p2, %s4415_s26), 0  ;;  %p3736_p3 = por %p80_p1, %p79_p4 }
  0xe0   : > { %4359 = sst [smem:[#allocation42_spill]] %s4417_s26  ;;  %p90_p5 = scmp.eq.s32.totalorder %s89_s8, 0 }
  0xe1   : > { %s4360_s3 = scalar_select %p3736_p3, 1, 0 }
  0xe2   : > { %s63_s2 = ssub.s32 %s3292_s17, %s4417_s26  ;;  %p105_p13 = scmp.ne.s32.totalorder %s4355_s5, %s3256_s25 }
  0xe3   : > { %p64_p9 = scmp.eq.s32.totalorder %s63_s2, 0  ;;  %p415_p11 = scmp.eq.s32.totalorder %s3705_s15, 3 }
  0xe4   : > { %s3746_s0 = scalar_select %p90_p5, %s3264_s27, %s92_s6  }
  0xe5   : > { %s3749_s1 = scalar_select %p64_p9, %s3276_s30, %s66_s12  }
  0xe6   : > { %4361 = sst [smem:[#allocation43_spill]] %s3746_s0  ;;  %p3751_p6 = por %p105_p13, %p80_p1 }
  0xe7   : > { %4362 = sst [smem:[#allocation44_spill]] %s3749_s1  ;;  %p3758_p12 = por %p415_p11, %p73_p7 }
  0xe8   : > { %s4363_s13 = scalar_select %p3751_p6, 1, 0 }
  0xe9   : > { %s4364_s24 = scalar_select %p3758_p12, 1, 0 }
  0xea   : > { %p421_p2 = scmp.eq.s32.totalorder %s2345_s4, 3  ;;  %s441_s25 = sand.u32 1, %s3276_s30  }
  0xeb   : > { %s2348_s5 = sshll.u32 %s441_s25, 3  ;;  %s2349_s6 = sshll.u32 %s3292_s17, 7 }
  0xec   : > { %p3766_p3 = por %p421_p2, %p79_p4  ;;  %s445_s12 = scalar_lea.vmem [#allocation3], %s2348_s5 }
  0xed   : > { %s452_s2 = sshll.u32 %s445_s12, 4  ;;  %s4366_s11 = sld [smem:[#allocation45_spill]]  ;;  %s3776_s2 = int_to_ptr.vmem [resolvable:$true] %s452_s2 }
  0xee   : > { %s4365_s8 = scalar_select %p3766_p3, 1, 0 }
  0xef   : > { %p4367_p7 = scmp.lt.s32.totalorder %s3296_s18, 4  ;;  %s4369_s12 = sld [smem:[#allocation47_spill]] }
  0xf0   : > { %s479_s9 = scalar_lea.vmem [#allocation8], %s3465_s20  ;;  %s442_s17 = scalar_lea.sflag [#allocation4], %s441_s25 }
  0xf1   : > { %p3782_p4 = pnand %p4367_p7, %p3721_p0 }
  0xf3   : > { %s3774_s26 = scalar_lea.hbm %s4366_s11, %s2349_s6  ;;  %s486_s6 = sshll.u32 %s479_s9, 4  ;;  %s3793_s6 = int_to_ptr.vmem [resolvable:$true] %s486_s6 }
  0xf4   : > { %s2940_s16 = scalar_lea.hbm %s3774_s26, 128  ;;  %p2942_p5 = pneg %p3782_p4 }
  0xf5   : > { %s3790_s7 = scalar_lea.hbm %s4369_s12, %s3468_s21  ;;  %p2941_p1 = scmp.ne.s32.totalorder %s3774_s26, %s2940_s16 }
  0xf6   : > { %s2945_s22 = scalar_lea.hbm %s4366_s11, 256  ;;  %p2946_p9 = scmp.lt.u32.totalorder %s3774_s26, %s4366_s11 }
  0xf7   : > { %p2943_p0 = pnand %p2942_p5, %p2941_p1  ;;  %p2947_p11 = scmp.lt.u32.totalorder %s2945_s22, %s2940_s16 }
  0xf8   : > { %p2949_p7 = scmp.lt.u32.totalorder %s2940_s16, %s3774_s26 }
  0xf9   : > { %p2944_p13 = pneg %p2943_p0  ;;  %p2948_p2 = por %p2947_p11, %p2946_p9 }
  0xfb   : > { %p2950_p3 = por %p2949_p7, %p2948_p2 }
  0xfd   : > { %p2951_p12 = pnand %p2950_p3, %p2944_p13 }
  0xff   : > { %2954 = shalt.err (!%p2951_p12)
}
 0x100   : > { %s2955_s25 = scalar_lea.vmem %s3776_s2, 128  ;;  %s3306_s1 = smov [#allocation3]  }
 0x101   : > { %p2956_p1 = scmp.ne.s32.totalorder %s3776_s2, %s2955_s25  ;;  %s2960_s9 = sshll.u32 %s3306_s1, 4  ;;  %s2961_s9 = int_to_ptr.vmem [resolvable:$false] %s2960_s9 }
 0x102   : > { %s2962_s30 = scalar_lea.vmem %s2961_s9, 256  ;;  %p2963_p10 = scmp.lt.s32.totalorder %s3776_s2, %s2961_s9 }
 0x103   : > { %p2958_p0 = pnand %p2956_p1, %p2942_p5  ;;  %p2964_p9 = scmp.lt.s32.totalorder %s2962_s30, %s2955_s25 }
 0x105   : > { %p2959_p6 = pneg %p2958_p0  ;;  %p2965_p11 = por %p2964_p9, %p2963_p10 }
 0x107   : > { %p2966_p2 = pnand %p2965_p11, %p2959_p6 }
 0x109   : > { %2969 = shalt.err (!%p2966_p2)
}
 0x10a   : > { %2573 = dma.hbm_to_vmem [thread:$0]  (!%p3782_p4), %s3774_s26, 128, %s3776_s2, %s442_s17  }
 0x10b   : > { %s2970_s16 = scalar_lea.hbm %s3790_s7, 16  ;;  %s2975_s5 = scalar_lea.hbm %s4369_s12, 32 }
 0x10c   : > { %p2971_p3 = scmp.ne.s32.totalorder %s3790_s7, %s2970_s16  ;;  %p2976_p10 = scmp.lt.u32.totalorder %s3790_s7, %s4369_s12 }
 0x10d   : > { %p2977_p6 = scmp.lt.u32.totalorder %s2975_s5, %s2970_s16  ;;  %p2979_p7 = scmp.lt.u32.totalorder %s2970_s16, %s3790_s7 }
 0x10e   : > { %p2973_p12 = pnand %p2971_p3, %p3492_p8 }
 0x10f   : > { %p2978_p13 = por %p2977_p6, %p2976_p10 }
 0x110   : > { %p2974_p5 = pneg %p2973_p12 }
 0x111   : > { %p2980_p1 = por %p2979_p7, %p2978_p13 }
 0x113   : > { %p2981_p0 = pnand %p2980_p1, %p2974_p5 }
 0x115   : > { %2984 = shalt.err (!%p2981_p0)
}
 0x116   : > { %s2985_s17 = scalar_lea.vmem %s3793_s6, 16  ;;  %s3307_s26 = smov [#allocation8]  }
 0x117   : > { %p2986_p4 = scmp.ne.s32.totalorder %s3793_s6, %s2985_s17  ;;  %s2990_s2 = sshll.u32 %s3307_s26, 4  ;;  %s2991_s2 = int_to_ptr.vmem [resolvable:$false] %s2990_s2 }
 0x118   : > { %s2992_s4 = scalar_lea.vmem %s2991_s2, 32  ;;  %p2993_p2 = scmp.lt.s32.totalorder %s3793_s6, %s2991_s2 }
 0x119   : > { %p2988_p9 = pnand %p2986_p4, %p3492_p8  ;;  %p2994_p3 = scmp.lt.s32.totalorder %s2992_s4, %s2985_s17 }
 0x11b   : > { %p2989_p11 = pneg %p2988_p9  ;;  %p2995_p12 = por %p2994_p3, %p2993_p2 }
 0x11d   : > { %p2996_p10 = pnand %p2995_p12, %p2989_p11 }
 0x11f   : > { %2999 = shalt.err (!%p2996_p10)
}
 0x120   : > { %p4370_p5 = scmp.ne.s32.totalorder %s4341_s14, 0  ;;  %s4371_s9 = scalar_lea.sflag [#allocation7], %s3462_s19 }
 0x121   : > { %s4372_s10 = sld [smem:[#allocation49_spill]]  ;;  %s517_s5 = scalar_lea.vmem [#allocation11], %s3465_s20 }
 0x122   : > { %2579 = dma.hbm_to_vmem [thread:$0]  (!%p4370_p5), %s3790_s7, 16, %s3793_s6, %s4371_s9  }
 0x123   : > { %s524_s25 = sshll.u32 %s517_s5, 4  ;;  %s4373_s26 = sld [smem:[#allocation51_spill]]  ;;  %s525_s25 = int_to_ptr.vmem [resolvable:$true] %s524_s25 }
 0x127   : > { %s3847_s22 = scalar_lea.hbm %s4372_s10, %s3468_s21  ;;  %s3005_s9 = scalar_lea.hbm %s4372_s10, 32 }
 0x128   : > { %s3000_s11 = scalar_lea.hbm %s3847_s22, 16  ;;  %p3006_p1 = scmp.lt.u32.totalorder %s3847_s22, %s4372_s10 }
 0x129   : > { %s4374_s2 = smov %s4373_s26  ;;  %s3854_s4 = scalar_lea.hbm %s4373_s26, %s3468_s21 }
 0x12a   : > { %p3001_p6 = scmp.ne.s32.totalorder %s3847_s22, %s3000_s11  ;;  %p3007_p0 = scmp.lt.u32.totalorder %s3005_s9, %s3000_s11 }
 0x12b   : > { %p3009_p9 = scmp.lt.u32.totalorder %s3000_s11, %s3847_s22 }
 0x12c   : > { %p3003_p13 = pnand %p3001_p6, %p3492_p8  ;;  %p3008_p4 = por %p3007_p0, %p3006_p1 }
 0x12e   : > { %p3004_p7 = pneg %p3003_p13  ;;  %p3010_p11 = por %p3009_p9, %p3008_p4 }
 0x130   : > { %p3011_p2 = pnand %p3010_p11, %p3004_p7 }
 0x132   : > { %3014 = shalt.err (!%p3011_p2)
}
 0x133   : > { %s3015_s5 = scalar_lea.vmem %s525_s25, 16  ;;  %s3308_s1 = smov [#allocation11]  }
 0x134   : > { %p3016_p3 = scmp.ne.s32.totalorder %s525_s25, %s3015_s5  ;;  %s3020_s17 = sshll.u32 %s3308_s1, 4  ;;  %s3021_s17 = int_to_ptr.vmem [resolvable:$false] %s3020_s17 }
 0x135   : > { %s3022_s26 = scalar_lea.vmem %s3021_s17, 32  ;;  %p3023_p6 = scmp.lt.s32.totalorder %s525_s25, %s3021_s17 }
 0x136   : > { %p3018_p12 = pnand %p3016_p3, %p3492_p8  ;;  %p3024_p13 = scmp.lt.s32.totalorder %s3022_s26, %s3015_s5 }
 0x138   : > { %p3019_p10 = pneg %p3018_p12  ;;  %p3025_p5 = por %p3024_p13, %p3023_p6 }
 0x13a   : > { %p3026_p0 = pnand %p3025_p5, %p3019_p10 }
 0x13c   : > { %3029 = shalt.err (!%p3026_p0)
}
 0x13d   : > { %p4375_p1 = scmp.ne.s32.totalorder %s4341_s14, 0  ;;  %s4376_s11 = scalar_lea.sflag [#allocation10], %s3462_s19 }
 0x13e   : > { %s555_s7 = scalar_lea.vmem [#allocation14], %s3465_s20  ;;  %s4377_s16 = sld [smem:[#allocation53_spill]] }
 0x13f   : > { %2585 = dma.hbm_to_vmem [thread:$0]  (!%p4375_p1), %s3847_s22, 16, %s525_s25, %s4376_s11  }
 0x140   : > { %s562_s6 = sshll.u32 %s555_s7, 4  ;;  %s3030_s17 = scalar_lea.hbm %s3854_s4, 16  ;;  %s563_s6 = int_to_ptr.vmem [resolvable:$true] %s562_s6 }
 0x141   : > { %p3031_p5 = scmp.ne.s32.totalorder %s3854_s4, %s3030_s17  ;;  %s3035_s12 = scalar_lea.hbm %s4374_s2, 32 }
 0x142   : > { %p3036_p9 = scmp.lt.u32.totalorder %s3854_s4, %s4374_s2  ;;  %p3037_p11 = scmp.lt.u32.totalorder %s3035_s12, %s3030_s17 }
 0x143   : > { %p3033_p7 = pnand %p3031_p5, %p3492_p8  ;;  %p3039_p3 = scmp.lt.u32.totalorder %s3030_s17, %s3854_s4 }
 0x144   : > { %s4378_s5 = smov %s4377_s16  ;;  %s3880_s1 = scalar_lea.hbm %s4377_s16, %s3468_s21 }
 0x145   : > { %p3034_p4 = pneg %p3033_p7  ;;  %p3038_p2 = por %p3037_p11, %p3036_p9 }
 0x147   : > { %p3040_p12 = por %p3039_p3, %p3038_p2 }
 0x149   : > { %p3041_p10 = pnand %p3040_p12, %p3034_p4 }
 0x14b   : > { %3044 = shalt.err (!%p3041_p10)
}
 0x14c   : > { %s3045_s22 = scalar_lea.vmem %s563_s6, 16  ;;  %s3309_s25 = smov [#allocation14]  }
 0x14d   : > { %p3046_p6 = scmp.ne.s32.totalorder %s563_s6, %s3045_s22  ;;  %s3050_s11 = sshll.u32 %s3309_s25, 4  ;;  %s3051_s11 = int_to_ptr.vmem [resolvable:$false] %s3050_s11 }
 0x14e   : > { %s3052_s10 = scalar_lea.vmem %s3051_s11, 32  ;;  %p3053_p5 = scmp.lt.s32.totalorder %s563_s6, %s3051_s11 }
 0x14f   : > { %p3048_p13 = pnand %p3046_p6, %p3492_p8  ;;  %p3054_p7 = scmp.lt.s32.totalorder %s3052_s10, %s3045_s22 }
 0x151   : > { %p3049_p0 = pneg %p3048_p13  ;;  %p3055_p1 = por %p3054_p7, %p3053_p5 }
 0x153   : > { %p3056_p9 = pnand %p3055_p1, %p3049_p0 }
 0x155   : > { %3059 = shalt.err (!%p3056_p9)
}
 0x156   : > { %p4379_p11 = scmp.ne.s32.totalorder %s4341_s14, 0  ;;  %s4380_s27 = scalar_lea.sflag [#allocation13], %s3462_s19 }
 0x157   : > { %s589_s0 = scalar_lea.vmem [#allocation17], %s3465_s20  ;;  %s4381_s30 = sld [smem:[#allocation55_spill]] }
 0x158   : > { %2591 = dma.hbm_to_vmem [thread:$0]  (!%p4379_p11), %s3854_s4, 16, %s563_s6, %s4380_s27  }
 0x159   : > { %s596_s12 = sshll.u32 %s589_s0, 4  ;;  %s3060_s17 = scalar_lea.hbm %s3880_s1, 16  ;;  %s597_s12 = int_to_ptr.vmem [resolvable:$true] %s596_s12 }
 0x15a   : > { %p3061_p1 = scmp.ne.s32.totalorder %s3880_s1, %s3060_s17  ;;  %s3065_s11 = scalar_lea.hbm %s4378_s5, 32 }
 0x15b   : > { %p3066_p3 = scmp.lt.u32.totalorder %s3880_s1, %s4378_s5  ;;  %p3067_p12 = scmp.lt.u32.totalorder %s3065_s11, %s3060_s17 }
 0x15c   : > { %p3063_p4 = pnand %p3061_p1, %p3492_p8  ;;  %p3069_p6 = scmp.lt.u32.totalorder %s3060_s17, %s3880_s1 }
 0x15d   : > { %s4382_s22 = smov %s4381_s30  ;;  %s3906_s16 = scalar_lea.hbm %s4381_s30, %s3468_s21 }
 0x15e   : > { %p3064_p2 = pneg %p3063_p4  ;;  %p3068_p10 = por %p3067_p12, %p3066_p3 }
 0x160   : > { %p3070_p13 = por %p3069_p6, %p3068_p10 }
 0x162   : > { %p3071_p0 = pnand %p3070_p13, %p3064_p2 }
 0x164   : > { %3074 = shalt.err (!%p3071_p0)
}
 0x165   : > { %s3075_s4 = scalar_lea.vmem %s597_s12, 16  ;;  %s3310_s6 = smov [#allocation17]  }
 0x166   : > { %p3076_p5 = scmp.ne.s32.totalorder %s597_s12, %s3075_s4  ;;  %s3080_s27 = sshll.u32 %s3310_s6, 4  ;;  %s3081_s27 = int_to_ptr.vmem [resolvable:$false] %s3080_s27 }
 0x167   : > { %s3082_s0 = scalar_lea.vmem %s3081_s27, 32  ;;  %p3083_p1 = scmp.lt.s32.totalorder %s597_s12, %s3081_s27 }
 0x168   : > { %p3078_p7 = pnand %p3076_p5, %p3492_p8  ;;  %p3084_p4 = scmp.lt.s32.totalorder %s3082_s0, %s3075_s4 }
 0x16a   : > { %p3079_p9 = pneg %p3078_p7  ;;  %p3085_p11 = por %p3084_p4, %p3083_p1 }
 0x16c   : > { %p3086_p3 = pnand %p3085_p11, %p3079_p9 }
 0x16e   : > { %3089 = shalt.err (!%p3086_p3)
}
 0x16f   : > { %p4383_p12 = scmp.ne.s32.totalorder %s4341_s14, 0  ;;  %s4384_s2 = scalar_lea.sflag [#allocation16], %s3462_s19 }
 0x170   : > { %s627_s7 = scalar_lea.vmem [#allocation20], %s3465_s20  ;;  %s4385_s26 = sld [smem:[#allocation57_spill]] }
 0x171   : > { %2597 = dma.hbm_to_vmem [thread:$0]  (!%p4383_p12), %s3880_s1, 16, %s597_s12, %s4384_s2  }
 0x172   : > { %s634_s9 = sshll.u32 %s627_s7, 4  ;;  %s3090_s10 = scalar_lea.hbm %s3906_s16, 16  ;;  %s635_s9 = int_to_ptr.vmem [resolvable:$true] %s634_s9 }
 0x173   : > { %p3091_p11 = scmp.ne.s32.totalorder %s3906_s16, %s3090_s10  ;;  %s3095_s27 = scalar_lea.hbm %s4382_s22, 32 }
 0x174   : > { %p3096_p6 = scmp.lt.u32.totalorder %s3906_s16, %s4382_s22  ;;  %p3097_p13 = scmp.lt.u32.totalorder %s3095_s27, %s3090_s10 }
 0x175   : > { %p3093_p2 = pnand %p3091_p11, %p3492_p8  ;;  %p3099_p5 = scmp.lt.u32.totalorder %s3090_s10, %s3906_s16 }
 0x176   : > { %s4386_s11 = smov %s4385_s26  ;;  %s3932_s25 = scalar_lea.hbm %s4385_s26, %s3468_s21 }
 0x177   : > { %p3094_p10 = pneg %p3093_p2  ;;  %p3098_p0 = por %p3097_p13, %p3096_p6 }
 0x179   : > { %p3100_p7 = por %p3099_p5, %p3098_p0 }
 0x17b   : > { %p3101_p9 = pnand %p3100_p7, %p3094_p10 }
 0x17d   : > { %3104 = shalt.err (!%p3101_p9)
}
 0x17e   : > { %s3105_s21 = scalar_lea.vmem %s635_s9, 16  ;;  %s3311_s1 = smov [#allocation20]  }
 0x17f   : > { %p3106_p1 = scmp.ne.s32.totalorder %s635_s9, %s3105_s21  ;;  %s3110_s12 = sshll.u32 %s3311_s1, 4  ;;  %s3111_s12 = int_to_ptr.vmem [resolvable:$false] %s3110_s12 }
 0x180   : > { %s3112_s2 = scalar_lea.vmem %s3111_s12, 32  ;;  %p3113_p11 = scmp.lt.s32.totalorder %s635_s9, %s3111_s12 }
 0x181   : > { %p3108_p4 = pnand %p3106_p1, %p3492_p8  ;;  %p3114_p2 = scmp.lt.s32.totalorder %s3112_s2, %s3105_s21 }
 0x183   : > { %p3109_p3 = pneg %p3108_p4  ;;  %p3115_p12 = por %p3114_p2, %p3113_p11 }
 0x185   : > { %p3116_p6 = pnand %p3115_p12, %p3109_p3 }
 0x187   : > { %3119 = shalt.err (!%p3116_p6)
}
 0x188   : > { %p4387_p13 = scmp.ne.s32.totalorder %s4341_s14, 0  ;;  %s4388_s5 = scalar_lea.sflag [#allocation19], %s3462_s19 }
 0x189   : > { %s665_s7 = scalar_lea.vmem [#allocation23], %s3465_s20  ;;  %s3120_s17 = scalar_lea.hbm %s3932_s25, 16 }
 0x18a   : > { %2603 = dma.hbm_to_vmem [thread:$0]  (!%p4387_p13), %s3906_s16, 16, %s635_s9, %s4388_s5  }
 0x18b   : > { %s672_s30 = sshll.u32 %s665_s7, 4  ;;  %p3121_p10 = scmp.ne.s32.totalorder %s3932_s25, %s3120_s17  ;;  %s673_s30 = int_to_ptr.vmem [resolvable:$true] %s672_s30 }
 0x18c   : > { %s3125_s4 = scalar_lea.hbm %s4386_s11, 32  ;;  %p3126_p5 = scmp.lt.u32.totalorder %s3932_s25, %s4386_s11 }
 0x18d   : > { %p3123_p12 = pnand %p3121_p10, %p3492_p8  ;;  %p3127_p7 = scmp.lt.u32.totalorder %s3125_s4, %s3120_s17 }
 0x18e   : > { %p3129_p1 = scmp.lt.u32.totalorder %s3120_s17, %s3932_s25 }
 0x18f   : > { %p3124_p0 = pneg %p3123_p12  ;;  %p3128_p9 = por %p3127_p7, %p3126_p5 }
 0x191   : > { %p3130_p4 = por %p3129_p1, %p3128_p9 }
 0x193   : > { %p3131_p3 = pnand %p3130_p4, %p3124_p0 }
 0x195   : > { %3134 = shalt.err (!%p3131_p3)
}
 0x196   : > { %s3135_s20 = scalar_lea.vmem %s673_s30, 16  ;;  %s3312_s16 = smov [#allocation23]  }
 0x197   : > { %p3136_p11 = scmp.ne.s32.totalorder %s673_s30, %s3135_s20  ;;  %s3140_s9 = sshll.u32 %s3312_s16, 4  ;;  %s3141_s9 = int_to_ptr.vmem [resolvable:$false] %s3140_s9 }
 0x198   : > { %s3142_s0 = scalar_lea.vmem %s3141_s9, 32  ;;  %p3143_p10 = scmp.lt.s32.totalorder %s673_s30, %s3141_s9 }
 0x199   : > { %p3138_p2 = pnand %p3136_p11, %p3492_p8  ;;  %p3144_p12 = scmp.lt.s32.totalorder %s3142_s0, %s3135_s20 }
 0x19b   : > { %p3139_p6 = pneg %p3138_p2  ;;  %p3145_p13 = por %p3144_p12, %p3143_p10 }
 0x19d   : > { %p3146_p5 = pnand %p3145_p13, %p3139_p6 }
 0x19f   : > { %3149 = shalt.err (!%p3146_p5)
}
 0x1a0   : > { %p4389_p7 = scmp.ne.s32.totalorder %s4341_s14, 0  ;;  %s4390_s21 = scalar_lea.sflag [#allocation22], %s3462_s19 }
 0x1a1   : > { %s4391_s1 = sld [smem:[#allocation40_spill]] }
 0x1a2   : > { %2609 = dma.hbm_to_vmem [thread:$0]  (!%p4389_p7), %s3932_s25, 16, %s673_s30, %s4390_s21  }
 0x1a7   : > { %p4392_p0 = scmp.ne.s32.totalorder %s4391_s1, 0 }
 0x1a8   : > { %s3976_s23 = sand.u32 (!%p4392_p0), 1, %s3272_s29   ;;  %p4393_p8 = scmp.ne.s32.totalorder (!%p4392_p0), %s4360_s3, 0 }
 0x1a9   : > { %681 = sbr.rel (%p4392_p0) target bundleno = 3016 (0xbc8), region = 72  ;;  %s2371_s12 = sshll.u32 (!%p4392_p0), %s3976_s23, 3 }
 0x1aa   : > { %s684_s2 = scalar_lea.sflag (!%p4392_p0), [#allocation4], %s3976_s23  ;;  %s3982_s5 = scalar_lea.vmem (!%p4392_p0), [#allocation3], %s2371_s12 }
 0x1b0   : > { %3223 = dma.done.wait (%p4393_p8), %s684_s2, 128  }
 0x1b1   : > { %3225 = vsyncadd (%p4393_p8), %s684_s2, 4294967168  ;;  %s4394_s14 = sld [smem:[#allocation33_spill]]  ;;  %s3989_s19 = sand.u32 1, %s3705_s15  }
 0x1b2   : > { %s693_s7 = scalar_lea.sflag [#allocation7], %s3989_s19  ;;  %p4395_p13 = scmp.ne.s32.totalorder %s4363_s13, 0 }
 0x1b7   : > { %s3992_s25 = sand.u32 1, %s4394_s14  }
 0x1b8   : > { %s695_s30 = scalar_lea.vmem [#allocation6], %s3992_s25 }
 0x1b9   : > { %3227 = dma.done.wait (%p4395_p13), %s693_s7, 32  }
 0x1ba   : > { %3229 = vsyncadd (%p4395_p13), %s693_s7, 4294967264  ;;  %s4001_s3 = sshll.u32 %s3992_s25, 4  ;;  %s703_s15 = scalar_lea.vmem [#allocation8], %s3992_s25 }
 0x1bb   : > { %s709_s17 = scalar_lea.sflag [#allocation10], %s3989_s19  ;;  %s712_s26 = scalar_lea.vmem [#allocation9], %s4001_s3 }
 0x1bc   : > { %3231 = dma.done.wait (%p4395_p13), %s709_s17, 272  }
 0x1bd   : > { %3233 = vsyncadd (%p4395_p13), %s709_s17, 4294967024  ;;  %s720_s10 = scalar_lea.vmem [#allocation11], %s3992_s25  ;;  %s726_s4 = scalar_lea.sflag [#allocation13], %s3989_s19 }
 0x1be   : > { %s729_s6 = scalar_lea.vmem [#allocation12], %s4001_s3 }
 0x1bf   : > { %3235 = dma.done.wait (%p4395_p13), %s726_s4, 272  }
 0x1c0   : > { %3237 = vsyncadd (%p4395_p13), %s726_s4, 4294967024  ;;  %s737_s27 = scalar_lea.vmem [#allocation14], %s3992_s25  ;;  %s743_s20 = scalar_lea.sflag [#allocation16], %s3989_s19 }
 0x1c1   : > { %s745_s16 = scalar_lea.vmem [#allocation15], %s3992_s25 }
 0x1c2   : > { %3239 = dma.done.wait (%p4395_p13), %s743_s20, 32  }
 0x1c3   : > { %3241 = vsyncadd (%p4395_p13), %s743_s20, 4294967264  ;;  %s753_s9 = scalar_lea.vmem [#allocation17], %s3992_s25  ;;  %s759_s0 = scalar_lea.sflag [#allocation19], %s3989_s19 }
 0x1c4   : > { %s762_s21 = scalar_lea.vmem [#allocation18], %s4001_s3 }
 0x1c5   : > { %3243 = dma.done.wait (%p4395_p13), %s759_s0, 272  }
 0x1c6   : > { %3245 = vsyncadd (%p4395_p13), %s759_s0, 4294967024  ;;  %s2375_s1 = sshll.u32 %s3992_s25, 6  ;;  %s770_s2 = scalar_lea.vmem [#allocation20], %s3992_s25 }
 0x1c7   : > { %s776_s14 = scalar_lea.sflag [#allocation22], %s3989_s19  ;;  %s4034_s7 = scalar_lea.vmem [#allocation21], %s2375_s1 }
 0x1c8   : > { %3247 = dma.done.wait (%p4395_p13), %s776_s14, 1040  }
 0x1c9   : > { %3249 = vsyncadd (%p4395_p13), %s776_s14, 4294966256  ;;  %s787_s17 = scalar_lea.vmem [#allocation23], %s3992_s25  ;;  %s4043_s4 = scalar_lea.vmem [#allocation24], %s2371_s12 }
 0x1ca   : > { %s4396_s20 = sld [smem:[#allocation36_spill]] }
 0x1d0   : > { %p2377_p9 = scmp.ne.s32.totalorder %s4396_s20, 0 }
 0x1d1   : > { %v887_v0 = vld [vmem:[%s3982_s5] sm:$0xff] (!%p2377_p9)  ;;  %vm888_vm0 = vcmask (!%p2377_p9), 261120  }
 0x1d2   : > { %886 = sbr.rel (%p2377_p9) target bundleno = 473 (0x1d9), region = 128  ;;  %889 = vst.msk [vmem:[%s4043_s4] sm:$0xff] (!%p2377_p9), %vm888_vm0, %v887_v0 }
 0x1d9 PF: > { %v4049_v1 = vld [vmem:[%s4043_s4] sm:$0xff]  ;;  %vm893_vm1 = vcmask 261120   ;;  %v3313_v9 = vmov 0.0   ;;  %vm3314_vm2 = vmmov 0   ;;  %vm989_vm3 = vcmask 64512   ;;  %s3315_s13 = smov 120  }
 0x1da   : > { %v894_v2 = vsel %vm893_vm1, %v4049_v1, 0.0  ;;  %v2722_v8 = vld [vmem:[%s712_s26] sm:$0xff]   ;;  %2458 = vmatprep.subr.bf16.mxu0 %v3313_v9  ;;  %2462 = vmatprep.mubr.msk.bf16.mxu0 %vm3314_vm2, %v3313_v9  ;;  %v2723_v10 = vld [vmem:[%s712_s26 + $0x8] sm:$0xff]   ;;  %s3316_s12 = smov 96   ;;  %s3317_s5 = smov 88   ;;  %v1367_v46 = vlaneseq  ;;  %vm1725_vm5 = vcmask 130048  }
 0x1db   : > { %895 = vadd.xlane.f32.xlu0 %v894_v2  ;;  %2459 = vmatpush3.bf16.msra.mxu0 %v2722_v8  ;;  %v2378_v15 = vld [vmem:[%s695_s30] ss:$0 sm:$0xff]  ;;  %s3318_s19 = smov 80   ;;  %s3319_s30 = smov 112   ;;  %vm1727_vm6 = vcmask 195584  }
 0x1dc   : > { %2471 = vmatprep.subr.mxu1 %v3313_v9  ;;  %2460 = vmatprep.subr.bf16.mxu0 %v3313_v9  ;;  %v2379_v17 = vld [vmem:[%s703_s15] ss:$0 sm:$0xff]  ;;  %s3320_s15 = smov 72   ;;  %s3321_s26 = smov 104   ;;  %v1368_v47 = vand.u32 127, %v1367_v46 }
 0x1dd   : > { %2473 = vmatprep.mubr.msk.f32.mxu1 %vm3314_vm2, %v3313_v9  ;;  %v2380_v21 = vld [vmem:[%s720_s10] ss:$0 sm:$0xff]  ;;  %s3322_s10 = smov 64   ;;  %s3323_s0 = smov 48  }
 0x1de   : > { %vm1369_vm4 = vcmp.lt.s32.totalorder %v1368_v47, 5  ;;  %s3324_s1 = smov 40   ;;  %s3325_s14 = smov 56  }
 0x1df   : > { %2461 = vmatpush3.bf16.msra.mxu0 %v2723_v10  ;;  %s3326_s20 = smov 16   ;;  %s4397_s3 = sld [smem:[#allocation37_spill]] }
 0x1e0   : > { %2466 = vmatprep.subr.mxu0 %v3313_v9  ;;  %s2016_s25 = scalar_lea.sflag [#allocation5], %s3976_s23  ;;  %p4399_p4 = scmp.ne.s32.totalorder %s4364_s24, 0 }
 0x268   : > { %v896_v3 = vpop.xlane.xlu0 %895 }
 0x269   : > { %v898_v4 = vmul.f32 0.03125, %v896_v3 }
 0x26b   : > { %v899_v5 = vsub.f32 %v4049_v1, %v898_v4 }
 0x26d   : > { %v900_v6 = vmul.f32 %v899_v5, %v899_v5 }
 0x26f   : > { %v901_v7 = vsel %vm893_vm1, %v900_v6, 0.0 }
 0x270   : > { %902 = vadd.xlane.f32.xlu0 %v901_v7 }
 0x2fd   : > { %v903_v11 = vpop.xlane.xlu0 %902 }
 0x2fe   : > { %v904_v12 = vmul.f32 0.03125, %v903_v11 }
 0x300   : > { %v905_v13 = vadd.f32 1e-05, %v904_v12 }
 0x302   : > { %2736 = vrsqrt.f32 %v905_v13 }
 0x30c   : > { %v2737_v14 = vpop.eup %2736 }
 0x30d   : > { %v907_v16 = vmul.f32 %v2737_v14, %v899_v5 }
 0x30f   : > { %v914_v18 = vmul.f32 %v2378_v15, %v907_v16 }
 0x311   : > { %v921_v19 = vadd.f32 %v2379_v17, %v914_v18 }
 0x313   : > { %v926_v20 = vpack.c.bf16 %v921_v19, %v921_v19 }
 0x315   : > { %2463 = vmatmul.mubr.msk.bf16.vlgmr.msra.gmra.mrb[0].mxu0 %vm893_vm1, %v926_v20 }
 0x316   : > { %2468 = vmatprep.mubr.msk.f32.mxu0 %vm3314_vm2, %v3313_v9 }
 0x3e8   : > { %v983_v22 = vpop.f32.mrb[0].mxu0 }
 0x3e9   : > { %v4076_v23 = vadd.f32 %v2380_v21, %v983_v22  ;;  %v2464_v24 = vpop.f32.mrb[1].mxu0 }
 0x3ea   : > { %v986_v25 = vpop.f32.mrb[2].mxu0 }
 0x3eb   : > { %992 = vrot.lane.b32.xlu0 %v4076_v23, %s3315_s13  ;;  %1007 = vrot.lane.b32.xlu1 %v4076_v23, %s3316_s12  ;;  %v2465_v26 = vpop.f32.mrb[3].mxu0  ;;  %990 = vst.msk [vmem:[#allocation2] sm:$0xff] %vm989_vm3, %v4076_v23  ;;  %s3327_s13 = smov 8   ;;  %s3328_s12 = smov 24  }
 0x3ef   : > { %1012 = vrot.lane.b32.xlu1 %v4076_v23, %s3317_s5 }
 0x3f2   : > { %v1047_v30 = vld [vmem:[#allocation2] sm:$0xff] }
 0x3f3   : > { %1017 = vrot.lane.b32.xlu1 %v4076_v23, %s3318_s19  ;;  %v1051_v33 = vmul.f32 0.35355338, %v1047_v30 }
 0x3f7   : > { %997 = vrot.lane.b32.xlu1 %v4076_v23, %s3319_s30 }
 0x3fb   : > { %1022 = vrot.lane.b32.xlu1 %v4076_v23, %s3320_s15 }
 0x3ff   : > { %1002 = vrot.lane.b32.xlu1 %v4076_v23, %s3321_s26 }
 0x45d   : > { %v993_v27 = vpop.permute.xlu0 %992  ;;  %v1008_v28 = vpop.permute.xlu1 %1007 }
 0x45e   : > { %996 = vst.msk [vmem:[#allocation2 + $0x8] sm:$0xff] %vm989_vm3, %v993_v27  ;;  %1011 = vst.msk [vmem:[#allocation2 + $0x20] sm:$0xff] %vm989_vm3, %v1008_v28 }
 0x461   : > { %v1013_v29 = vpop.permute.xlu1 %1012 }
 0x462   : > { %1016 = vst.msk [vmem:[#allocation2 + $0x28] sm:$0xff] %vm989_vm3, %v1013_v29 }
 0x465   : > { %v1018_v31 = vpop.permute.xlu1 %1017  ;;  %v1055_v32 = vld [vmem:[#allocation2 + $0x20] sm:$0xff]  ;;  %v1048_v34 = vld [vmem:[#allocation2 + $0x8] sm:$0xff] }
 0x466   : > { %1021 = vst.msk [vmem:[#allocation2 + $0x30] sm:$0xff] %vm989_vm3, %v1018_v31  ;;  %2467 = vmatpush3.xpose.msk.msra.mxu0 %vm989_vm3, %v1055_v32  ;;  %v1052_v37 = vmul.f32 0.35355338, %v1048_v34 }
 0x467   : > { %2481 = vmatprep.subr.mxu0 %v3313_v9 }
 0x469   : > { %v998_v35 = vpop.permute.xlu1 %997  ;;  %2469 = vmatmul.mubr.msk.f32.vlgmr.msra.gmra.mrb[4].mxu0 %vm989_vm3, %v1051_v33  ;;  %v1056_v36 = vld [vmem:[#allocation2 + $0x28] sm:$0xff] }
 0x46a   : > { %1001 = vst.msk [vmem:[#allocation2 + $0x10] sm:$0xff] %vm989_vm3, %v998_v35  ;;  %2472 = vmatpush3.xpose.msk.msra.mxu1 %vm989_vm3, %v1056_v36  ;;  %2483 = vmatprep.mubr.msk.f32.mxu0 %vm3314_vm2, %v3313_v9 }
 0x46b   : > { %2476 = vmatprep.subr.mxu1 %v3313_v9 }
 0x46d   : > { %2474 = vmatmul.mubr.msk.f32.vlgmr.msra.gmra.mrb[0].mxu1 %vm989_vm3, %v1052_v37  ;;  %v1023_v38 = vpop.permute.xlu1 %1022  ;;  %v1057_v39 = vld [vmem:[#allocation2 + $0x30] sm:$0xff] }
 0x46e   : > { %1026 = vst.msk [vmem:[#allocation2 + $0x38] sm:$0xff] %vm989_vm3, %v1023_v38  ;;  %2477 = vmatpush3.xpose.msk.msra.mxu1 %vm989_vm3, %v1057_v39  ;;  %2478 = vmatprep.mubr.msk.f32.mxu1 %vm3314_vm2, %v3313_v9 }
 0x46f   : > { %2486 = vmatprep.subr.mxu1 %v3313_v9 }
 0x471   : > { %v1003_v40 = vpop.permute.xlu1 %1002  ;;  %v1049_v41 = vld [vmem:[#allocation2 + $0x10] sm:$0xff] }
 0x472   : > { %1006 = vst.msk [vmem:[#allocation2 + $0x18] sm:$0xff] %vm989_vm3, %v1003_v40  ;;  %v1053_v42 = vmul.f32 0.35355338, %v1049_v41 }
 0x474   : > { %2479 = vmatmul.mubr.msk.f32.vlgmr.msra.gmra.mrb[2].mxu1 %vm989_vm3, %v1053_v42 }
 0x475   : > { %v1058_v43 = vld [vmem:[#allocation2 + $0x38] sm:$0xff]  ;;  %2488 = vmatprep.mubr.msk.f32.mxu1 %vm3314_vm2, %v3313_v9 }
 0x476   : > { %2482 = vmatpush3.xpose.msk.msra.mxu0 %vm989_vm3, %v1058_v43 }
 0x477   : > { %2491 = vmatprep.subr.mxu0 %v3313_v9 }
 0x479   : > { %v1050_v44 = vld [vmem:[#allocation2 + $0x18] sm:$0xff] }
 0x47a   : > { %v1054_v45 = vmul.f32 0.35355338, %v1050_v44  ;;  %v2724_v44 = vld [vmem:[%s729_s6] sm:$0xff]  }
 0x47c   : > { %2484 = vmatmul.mubr.msk.f32.vlgmr.msra.gmra.mrb[6].mxu0 %vm989_vm3, %v1054_v45  ;;  %v2725_v45 = vld [vmem:[%s729_s6 + $0x8] sm:$0xff]   ;;  %s2417_s6 = sshll.u32 %s4397_s3, 7 }
 0x47d   : > { %2493 = vmatprep.mubr.msk.f32.mxu0 %vm3314_vm2, %v3313_v9 }
 0x53c   : > { %v1135_v48 = vpop.f32.mrb[4].mxu0 }
 0x53d   : > { %v1372_v49 = vsel %vm1369_vm4, %v1135_v48, -1e+30  ;;  %v2470_v50 = vpop.f32.mrb[5].mxu0 }
 0x53e   : > { %v1376_v51 = vsel %vm989_vm3, %v1372_v49, -inf }
 0x53f   : > { %1377 = vmax.xlane.f32.xlu1 %v1376_v51 }
 0x540   : > { %v1211_v52 = vpop.f32.mrb[0].mxu1 }
 0x541   : > { %v1373_v53 = vsel %vm1369_vm4, %v1211_v52, -1e+30  ;;  %v2475_v54 = vpop.f32.mrb[1].mxu1 }
 0x542   : > { %v1379_v55 = vsel %vm989_vm3, %v1373_v53, -inf }
 0x543   : > { %1380 = vmax.xlane.f32.xlu0 %v1379_v55 }
 0x547   : > { %v1287_v56 = vpop.f32.mrb[2].mxu1 }
 0x548   : > { %v1374_v57 = vsel %vm1369_vm4, %v1287_v56, -1e+30  ;;  %v2480_v58 = vpop.f32.mrb[3].mxu1 }
 0x549   : > { %v1382_v59 = vsel %vm989_vm3, %v1374_v57, -inf }
 0x54a   : > { %1383 = vmax.xlane.f32.xlu1 %v1382_v59  ;;  %v2396_v59 = vld [vmem:[%s737_s27] ss:$0 sm:$0xff]  ;;  %s2029_s27 = sshll.u32 %s4043_s4, 4  ;;  %s4206_s27 = int_to_ptr.vmem [resolvable:$true] %s2029_s27 }
 0x54f   : > { %v1363_v60 = vpop.f32.mrb[6].mxu0 }
 0x550   : > { %v1375_v61 = vsel %vm1369_vm4, %v1363_v60, -1e+30  ;;  %v2485_v62 = vpop.f32.mrb[7].mxu0 }
 0x551   : > { %v1385_v63 = vsel %vm989_vm3, %v1375_v61, -inf }
 0x552   : > { %1386 = vmax.xlane.f32.xlu0 %v1385_v63 }
 0x55b   : > { %1027 = vrot.lane.b32.xlu1 %v4076_v23, %s3322_s10 }
 0x5cc   : > { %v1378_v0 = vpop.xlane.xlu1 %1377 }
 0x5cd   : > { %v1388_v2 = vsub.f32 %v1372_v49, %v1378_v0 }
 0x5cf   : > { %v1392_v3 = vmul.f32 1.442695, %v1388_v2 }
 0x5d0   : > { %v1381_v4 = vpop.xlane.xlu0 %1380 }
 0x5d1   : > { %2738 = vpow2.f32 %v1392_v3  ;;  %v1389_v5 = vsub.f32 %v1373_v53, %v1381_v4 }
 0x5d3   : > { %v1394_v6 = vmul.f32 1.442695, %v1389_v5 }
 0x5d5   : > { %2740 = vpow2.f32 %v1394_v6 }
 0x5d7   : > { %v1384_v7 = vpop.xlane.xlu1 %1383 }
 0x5d8   : > { %v1390_v8 = vsub.f32 %v1374_v57, %v1384_v7 }
 0x5da   : > { %v1396_v10 = vmul.f32 1.442695, %v1390_v8 }
 0x5db   : > { %v2739_v11 = vpop.eup %2738  ;;  %v1028_v12 = vpop.permute.xlu1 %1027 }
 0x5dc   : > { %2742 = vpow2.f32 %v1396_v10  ;;  %1031 = vst.msk [vmem:[#allocation2 + $0x40] sm:$0xff] %vm989_vm3, %v1028_v12  ;;  %v1400_v13 = vsel %vm989_vm3, %v2739_v11, 0.0  ;;  %v2726_v10 = vld [vmem:[%s762_s21] sm:$0xff]  }
 0x5dd   : > { %1401 = vadd.xlane.f32.xlu1 %v1400_v13 }
 0x5df   : > { %v2741_v14 = vpop.eup %2740  ;;  %v1387_v15 = vpop.xlane.xlu0 %1386 }
 0x5e0   : > { %v1391_v16 = vsub.f32 %v1375_v61, %v1387_v15  ;;  %v1403_v17 = vsel %vm989_vm3, %v2741_v14, 0.0  ;;  %v2400_v15 = vld [vmem:[%s745_s16] ss:$0 sm:$0xff] }
 0x5e1   : > { %1404 = vadd.xlane.f32.xlu0 %v1403_v17  ;;  %v2401_v17 = vld [vmem:[%s753_s9] ss:$0 sm:$0xff] }
 0x5e2   : > { %v1398_v18 = vmul.f32 1.442695, %v1391_v16 }
 0x5e3   : > { %v1059_v19 = vld [vmem:[#allocation2 + $0x40] sm:$0xff] }
 0x5e4   : > { %2744 = vpow2.f32 %v1398_v18  ;;  %2487 = vmatpush3.msra.mxu1 %v1059_v19 }
 0x5e5   : > { %2496 = vmatprep.subr.mxu1 %v3313_v9 }
 0x5e6   : > { %v2743_v20 = vpop.eup %2742 }
 0x5e7   : > { %v1406_v21 = vsel %vm989_vm3, %v2743_v20, 0.0 }
 0x5e8   : > { %1407 = vadd.xlane.f32.xlu1 %v1406_v21  ;;  %v2728_v21 = vld [vmem:[%s4034_s7] sm:$0xff]  }
 0x5ee   : > { %v2745_v22 = vpop.eup %2744 }
 0x5ef   : > { %v1409_v24 = vsel %vm989_vm3, %v2745_v22, 0.0 }
 0x5f0   : > { %1410 = vadd.xlane.f32.xlu0 %v1409_v24  ;;  %v2730_v24 = vld [vmem:[%s4034_s7 + $0x10] sm:$0xff]  }
 0x5f9   : > { %1037 = vrot.lane.b32.xlu1 %v4076_v23, %s3323_s0 }
 0x5fd   : > { %1042 = vrot.lane.b32.xlu1 %v4076_v23, %s3324_s1 }
 0x606   : > { %1032 = vrot.lane.b32.xlu0 %v4076_v23, %s3325_s14 }
 0x66a   : > { %v1402_v25 = vpop.xlane.xlu1 %1401 }
 0x66b   : > { %2746 = vrcp.f32 %v1402_v25  ;;  %v2731_v25 = vld [vmem:[%s4034_s7 + $0x18] sm:$0xff]  }
 0x66e   : > { %v1405_v29 = vpop.xlane.xlu0 %1404 }
 0x675   : > { %v2747_v26 = vpop.eup %2746  ;;  %v1408_v27 = vpop.xlane.xlu1 %1407 }
 0x676   : > { %v1416_v28 = vmul.f32 %v2747_v26, %v2739_v11  ;;  %2748 = vrcp.f32 %v1408_v27  ;;  %v2732_v26 = vld [vmem:[%s4034_s7 + $0x20] sm:$0xff]   ;;  %v2733_v27 = vld [vmem:[%s4034_s7 + $0x28] sm:$0xff]  }
 0x677   : > { %2750 = vrcp.f32 %v1405_v29  ;;  %v2735_v29 = vld [vmem:[%s4034_s7 + $0x38] sm:$0xff]  }
 0x678   : > { %2489 = vmatmul.mubr.msk.f32.vlgmr.msra.gmra.mrb[4].mxu1 %vm989_vm3, %v1416_v28  ;;  %v2734_v28 = vld [vmem:[%s4034_s7 + $0x30] sm:$0xff]  }
 0x679   : > { %v1038_v30 = vpop.permute.xlu1 %1037  ;;  %2498 = vmatprep.mubr.msk.f32.mxu1 %vm3314_vm2, %v3313_v9 }
 0x67a   : > { %1041 = vst.msk [vmem:[#allocation2 + $0x50] sm:$0xff] %vm989_vm3, %v1038_v30  ;;  %v2402_v30 = vld [vmem:[%s770_s2] ss:$0 sm:$0xff] }
 0x67d   : > { %v1043_v31 = vpop.permute.xlu1 %1042  ;;  %v1411_v32 = vpop.xlane.xlu0 %1410 }
 0x67e   : > { %1046 = vst.msk [vmem:[#allocation2 + $0x58] sm:$0xff] %vm989_vm3, %v1043_v31  ;;  %2752 = vrcp.f32 %v1411_v32 }
 0x680   : > { %v2749_v23 = vpop.eup %2748 }
 0x681   : > { %v1418_v33 = vmul.f32 %v2749_v23, %v2743_v20  ;;  %v1033_v34 = vpop.permute.xlu0 %1032  ;;  %v1061_v35 = vld [vmem:[#allocation2 + $0x50] sm:$0xff]  ;;  %v2751_v36 = vpop.eup %2750 }
 0x682   : > { %1036 = vst.msk [vmem:[#allocation2 + $0x48] sm:$0xff] %vm989_vm3, %v1033_v34  ;;  %2497 = vmatpush3.msra.mxu1 %v1061_v35  ;;  %v1417_v37 = vmul.f32 %v2751_v36, %v2741_v14 }
 0x683   : > { %2499 = vmatmul.mubr.msk.f32.vlgmr.msra.gmra.mrb[6].mxu1 %vm989_vm3, %v1418_v33  ;;  %2522 = vmatprep.subr.bf16.mxu1 %v3313_v9 }
 0x684   : > { %2538 = vmatprep.mubr.msk.bf16.mxu1 %vm3314_vm2, %v3313_v9  ;;  %2523 = vmatpush3.bf16.msra.mxu1 %v2728_v21 }
 0x685   : > { %v1062_v40 = vld [vmem:[#allocation2 + $0x58] sm:$0xff]  ;;  %2524 = vmatprep.subr.bf16.mxu1 %v3313_v9 }
 0x688   : > { %v2753_v39 = vpop.eup %2752 }
 0x689   : > { %v1060_v38 = vld [vmem:[#allocation2 + $0x48] sm:$0xff]  ;;  %v1419_v41 = vmul.f32 %v2753_v39, %v2745_v22 }
 0x68a   : > { %2492 = vmatpush3.msra.mxu0 %v1060_v38  ;;  %v2729_v22 = vld [vmem:[%s4034_s7 + $0x8] sm:$0xff]   ;;  %s3150_s7 = scalar_lea.vmem %s4206_s27, 128 }
 0x68b   : > { %2494 = vmatmul.mubr.msk.f32.vlgmr.msra.gmra.mrb[8].mxu0 %vm989_vm3, %v1417_v37  ;;  %2501 = vmatprep.subr.mxu0 %v3313_v9  ;;  %p3151_p1 = scmp.ne.s32.totalorder %s4206_s27, %s3150_s7 }
 0x68c   : > { %2502 = vmatpush3.msra.mxu0 %v1062_v40  ;;  %2503 = vmatprep.mubr.msk.f32.mxu0 %vm3314_vm2, %v3313_v9 }
 0x68d   : > { %2506 = vmatprep.subr.bf16.mxu0 %v3313_v9  ;;  %2525 = vmatpush3.bf16.msra.mxu1 %v2729_v22  ;;  %p3152_p3 = pnand %p3151_p1, %p4399_p4 }
 0x68e   : > { %2526 = vmatprep.subr.bf16.mxu1 %v3313_v9 }
 0x68f   : > { %2504 = vmatmul.mubr.msk.f32.vlgmr.msra.gmra.mrb[10].mxu0 %vm989_vm3, %v1419_v41  ;;  %v2407_v41 = vld [vmem:[%s787_s17] ss:$0 sm:$0xff]  ;;  %p3153_p11 = pneg %p3152_p3  ;;  %s3329_s17 = smov [#allocation24]  }
 0x690   : > { %2510 = vmatprep.mubr.msk.bf16.mxu0 %vm3314_vm2, %v3313_v9  ;;  %2507 = vmatpush3.bf16.msra.mxu0 %v2724_v44  ;;  %s3154_s5 = sshll.u32 %s3329_s17, 4  ;;  %s3155_s5 = int_to_ptr.vmem [resolvable:$false] %s3154_s5 }
 0x691   : > { %2508 = vmatprep.subr.bf16.mxu0 %v3313_v9  ;;  %2527 = vmatpush3.bf16.msra.mxu1 %v2730_v24  ;;  %s3156_s19 = scalar_lea.vmem %s3155_s5, 256  ;;  %p3157_p2 = scmp.lt.s32.totalorder %s4206_s27, %s3155_s5 }
 0x692   : > { %2528 = vmatprep.subr.bf16.mxu1 %v3313_v9  ;;  %p3158_p6 = scmp.lt.s32.totalorder %s3156_s19, %s3150_s7 }
 0x694   : > { %2509 = vmatpush3.bf16.msra.mxu0 %v2725_v45  ;;  %p3159_p10 = por %p3158_p6, %p3157_p2 }
 0x695   : > { %2514 = vmatprep.subr.bf16.mxu0 %v3313_v9  ;;  %2529 = vmatpush3.bf16.msra.mxu1 %v2731_v25 }
 0x696   : > { %2530 = vmatprep.subr.bf16.mxu1 %v3313_v9  ;;  %p3160_p12 = pnand %p3159_p10, %p3153_p11 }
 0x699   : > { %2531 = vmatpush3.bf16.msra.mxu1 %v2732_v26 }
 0x69a   : > { %2532 = vmatprep.subr.bf16.mxu1 %v3313_v9 }
 0x69d   : > { %2533 = vmatpush3.bf16.msra.mxu1 %v2733_v27 }
 0x69e   : > { %2534 = vmatprep.subr.bf16.mxu1 %v3313_v9 }
 0x6a1   : > { %2535 = vmatpush3.bf16.msra.mxu1 %v2734_v28 }
 0x6a2   : > { %2536 = vmatprep.subr.bf16.mxu1 %v3313_v9 }
 0x6a5   : > { %2537 = vmatpush3.bf16.msra.mxu1 %v2735_v29 }
 0x74b   : > { %v1489_v42 = vpop.f32.mrb[4].mxu1 }
 0x74c   : > { %v2490_v43 = vpop.f32.mrb[5].mxu1 }
 0x756   : > { %v1635_v46 = vpop.f32.mrb[6].mxu1 }
 0x757   : > { %1717 = vrot.lane.b32.xlu1 %v1635_v46, %s3326_s20  ;;  %v2500_v47 = vpop.f32.mrb[7].mxu1 }
 0x75e   : > { %v1562_v48 = vpop.f32.mrb[8].mxu0 }
 0x75f   : > { %1713 = vrot.lane.b32.xlu0 %v1562_v48, %s3327_s13  ;;  %v2495_v49 = vpop.f32.mrb[9].mxu0 }
 0x762   : > { %v1708_v50 = vpop.f32.mrb[10].mxu0 }
 0x763   : > { %1721 = vrot.lane.b32.xlu0 %v1708_v50, %s3328_s12  ;;  %v2505_v51 = vpop.f32.mrb[11].mxu0 }
 0x7c9   : > { %v1718_v54 = vpop.permute.xlu1 %1717 }
 0x7d1   : > { %v1714_v52 = vpop.permute.xlu0 %1713 }
 0x7d2   : > { %v1724_v53 = vsel %vm989_vm3, %v1489_v42, %v1714_v52 }
 0x7d3   : > { %v1726_v55 = vsel %vm1725_vm5, %v1724_v53, %v1718_v54 }
 0x7d5   : > { %v1722_v56 = vpop.permute.xlu0 %1721 }
 0x7d6   : > { %v1728_v57 = vsel %vm1727_vm6, %v1726_v55, %v1722_v56 }
 0x7d7   : > { %v1733_v58 = vpack.c.bf16 %v1728_v57, %v1728_v57 }
 0x7d9   : > { %2511 = vmatmul.mubr.msk.bf16.vlgmr.msra.gmra.mrb[12].mxu0 %vm893_vm1, %v1733_v58 }
 0x7da   : > { %2518 = vmatprep.mubr.msk.bf16.mxu0 %vm3314_vm2, %v3313_v9  ;;  %2515 = vmatpush3.bf16.msra.mxu0 %v2726_v10 }
 0x7db   : > { %2516 = vmatprep.subr.bf16.mxu0 %v3313_v9 }
 0x8ac   : > { %v1790_v60 = vpop.f32.mrb[12].mxu0 }
 0x8ad   : > { %v1791_v61 = vadd.f32 %v2396_v59, %v1790_v60  ;;  %v2512_v62 = vpop.f32.mrb[13].mxu0 }
 0x8ae   : > { %v1793_v63 = vpop.f32.mrb[14].mxu0 }
 0x8af   : > { %v4163_v0 = vadd.f32 %v1791_v61, %v4049_v1  ;;  %v2513_v2 = vpop.f32.mrb[15].mxu0  ;;  %v2727_v1 = vld [vmem:[%s762_s21 + $0x8] sm:$0xff]   ;;  %s4398_s21 = sld [smem:[#allocation58_spill]] }
 0x8b0   : > { %2517 = vmatpush3.bf16.msra.mxu0 %v2727_v1 }
 0x8b1   : > { %v1799_v3 = vsel %vm893_vm1, %v4163_v0, 0.0 }
 0x8b2   : > { %1800 = vadd.xlane.f32.xlu1 %v1799_v3 }
 0x8b5   : > { %s4204_s2 = scalar_lea.hbm %s4398_s21, %s2417_s6 }
 0x93f   : > { %v1801_v4 = vpop.xlane.xlu1 %1800 }
 0x940   : > { %v1802_v5 = vmul.f32 0.03125, %v1801_v4 }
 0x942   : > { %v1803_v6 = vsub.f32 %v4163_v0, %v1802_v5 }
 0x944   : > { %v1804_v7 = vmul.f32 %v1803_v6, %v1803_v6 }
 0x946   : > { %v1805_v8 = vsel %vm893_vm1, %v1804_v7, 0.0 }
 0x947   : > { %1806 = vadd.xlane.f32.xlu0 %v1805_v8 }
 0x9d4   : > { %v1807_v11 = vpop.xlane.xlu0 %1806 }
 0x9d5   : > { %v1808_v12 = vmul.f32 0.03125, %v1807_v11 }
 0x9d7   : > { %v1809_v13 = vadd.f32 1e-05, %v1808_v12 }
 0x9d9   : > { %2754 = vrsqrt.f32 %v1809_v13 }
 0x9e3   : > { %v2755_v14 = vpop.eup %2754 }
 0x9e4   : > { %v1811_v16 = vmul.f32 %v2755_v14, %v1803_v6 }
 0x9e6   : > { %v1818_v18 = vmul.f32 %v2400_v15, %v1811_v16 }
 0x9e8   : > { %v1825_v19 = vadd.f32 %v2401_v17, %v1818_v18 }
 0x9ea   : > { %v1830_v20 = vpack.c.bf16 %v1825_v19, %v1825_v19 }
 0x9ec   : > { %2519 = vmatmul.mubr.msk.bf16.vlgmr.msra.gmra.mrb[16].mxu0 %vm893_vm1, %v1830_v20 }
 0xabf   : > { %v1887_v31 = vpop.f32.mrb[16].mxu0 }
 0xac0   : > { %v1888_v32 = vadd.f32 %v2402_v30, %v1887_v31  ;;  %v2520_v23 = vpop.f32.mrb[17].mxu0 }
 0xac1   : > { %v1890_v33 = vpop.f32.mrb[18].mxu0 }
 0xac2   : > { %v2406_v34 = vmul.f32 -1.702, %v1888_v32  ;;  %v2521_v35 = vpop.f32.mrb[19].mxu0 }
 0xac4   : > { %v1895_v36 = vmul.f32 1.442695, %v2406_v34 }
 0xac6   : > { %2756 = vpow2.f32 %v1895_v36 }
 0xad0   : > { %v2757_v37 = vpop.eup %2756 }
 0xad1   : > { %v1897_v38 = vadd.f32 1.0, %v2757_v37 }
 0xad3   : > { %2758 = vrcp.f32 %v1897_v38 }
 0xadd   : > { %v2759_v9 = vpop.eup %2758 }
 0xade   : > { %v1900_v39 = vmul.f32 %v2759_v9, %v1888_v32 }
 0xae0   : > { %v1917_v40 = vpack.c.bf16 %v1900_v39, %v1900_v39 }
 0xae2   : > { %2539 = vmatmul.mubr.bf16.vlgmr.msra.gmra.mrb[8].mxu1 %v1917_v40 }
 0xbb5   : > { %v2007_v42 = vpop.f32.mrb[8].mxu1 }
 0xbb6   : > { %v2008_v43 = vadd.f32 %v2407_v41, %v2007_v42  ;;  %v2540_v44 = vpop.f32.mrb[9].mxu1 }
 0xbb7   : > { %v2010_v45 = vpop.f32.mrb[10].mxu1 }
 0xbb8   : > { %v2013_v46 = vadd.f32 %v2008_v43, %v4163_v0  ;;  %v2541_v47 = vpop.f32.mrb[11].mxu1 }
 0xbba   : > { %2014 = vst.msk [vmem:[%s4043_s4] sm:$0xff] %vm893_vm1, %v2013_v46 }
 0xbbb   : > { %3163 = shalt.err (!%p3160_p12)
}
 0xbbc   : > { %s3164_s23 = scalar_lea.hbm %s4204_s2, 128  ;;  %s3168_s15 = scalar_lea.hbm %s4398_s21, 256 }
 0xbbd   : > { %p3165_p5 = scmp.ne.s32.totalorder %s4204_s2, %s3164_s23  ;;  %p3169_p8 = scmp.lt.u32.totalorder %s4204_s2, %s4398_s21 }
 0xbbe   : > { %p3170_p13 = scmp.lt.u32.totalorder %s3168_s15, %s3164_s23  ;;  %p3172_p1 = scmp.lt.u32.totalorder %s3164_s23, %s4204_s2 }
 0xbbf   : > { %p3166_p7 = pnand %p3165_p5, %p4399_p4 }
 0xbc0   : > { %p3171_p9 = por %p3170_p13, %p3169_p8 }
 0xbc1   : > { %p3167_p0 = pneg %p3166_p7 }
 0xbc2   : > { %p3173_p3 = por %p3172_p1, %p3171_p9 }
 0xbc4   : > { %p3174_p11 = pnand %p3173_p3, %p3167_p0 }
 0xbc6   : > { %3177 = shalt.err (!%p3174_p11)
}
 0xbc7   : > { %2568 = dma.vmem_to_hbm [thread:$0]  (%p4399_p4), %s4206_s27, 128, %s4204_s2, %s2016_s25  }
 0xbc8 PF: > { %p2615_p2 = scmp.ge.s32.totalorder %s3296_s18, 2  ;;  %s2041_s0 = sand.u32 1, %s3268_s28  }
 0xbc9   : > { %p4400_p6 = scmp.ne.s32.totalorder %s4365_s8, 0  ;;  %s2042_s1 = scalar_lea.sflag [#allocation5], %s2041_s0 }
 0xbcb   : > { %p2611_p10 = pnand %p2615_p2, %p4400_p6 }
 0xbcd   : > { %3251 = dma.done.wait (!%p2611_p10), %s2042_s1, 128  }
 0xbce   : > { %3253 = vsyncadd (!%p2611_p10), %s2042_s1, 4294967168  ;;  %s47_s18 = sadd.s32 1, %s3296_s18   ;;  %s4401_s25 = sld [smem:[#allocation33_spill]] }
 0xbcf   : > { %p44_p12 = scmp.ge.s32.totalorder %s47_s18, 6   ;;  %s4402_s26 = sld [smem:[#allocation34_spill]] }
 0xbd0   : > { %s4403_s27 = sld [smem:[#allocation43_spill]]  ;;  %s4404_s24 = sld [smem:[#allocation35_spill]] }
 0xbd1   : > { %s4405_s30 = sld [smem:[#allocation44_spill]]  ;;  %s4406_s14 = sld [smem:[#allocation38_spill]] }
 0xbd2   : > { %s4407_s15 = sld [smem:[#allocation39_spill]]  ;;  %s4408_s16 = sld [smem:[#allocation41_spill]] }
 0xbd3   : > { %s4409_s17 = sld [smem:[#allocation42_spill]]  ;;  %s4410_s28 = smov %s3272_s29 }
 0xbd4   :  { %46 = sbr.rel (!%p44_p12) target bundleno = 36 (0x24), region = 276 }
 0xbd6   : > { %s4411_s29 = smov %s4404_s24 }
 0xbdb   :  { %2047 = vsyncpa [#allocation4], 1 }
 0xbdc   :  { %2049 = vsyncpa [#allocation4 + $0x1], 1 }
 0xbdd   :  { %2050 = vsyncpa [#allocation7], 1 }
 0xbde   :  { %2052 = vsyncpa [#allocation7 + $0x1], 1 }
 0xbdf   :  { %2053 = vsyncpa [#allocation10], 1 }
 0xbe0   :  { %2055 = vsyncpa [#allocation10 + $0x1], 1 }
 0xbe1   :  { %2056 = vsyncpa [#allocation13], 1 }
 0xbe2   :  { %2058 = vsyncpa [#allocation13 + $0x1], 1 }
 0xbe3   :  { %2059 = vsyncpa [#allocation16], 1 }
 0xbe4   :  { %2061 = vsyncpa [#allocation16 + $0x1], 1 }
 0xbe5   :  { %2062 = vsyncpa [#allocation19], 1 }
 0xbe6   :  { %2064 = vsyncpa [#allocation19 + $0x1], 1 }
 0xbe7   :  { %2065 = vsyncpa [#allocation22], 1 }
 0xbe8   :  { %2067 = vsyncpa [#allocation22 + $0x1], 1 }
 0xbe9   :  { %2068 = vsyncpa [#allocation5], 1 }
 0xbea   :  { %2070 = vsyncpa [#allocation5 + $0x1], 1 }

</bundles_post_ra>
